<compile_context>
chip_gen: v7x
topology: tpu7x:2x2x1
jax: 0.10.0
libtpu: 0.0.40
codegen_flags: <defaults>
</compile_context>

<pallas_src>
import functools

import jax
import jax.numpy as jnp
from jax.experimental import pallas as pl
from jax.experimental.pallas import tpu as pltpu

GATE = 128  # one 128-lane slot per LSTM gate (i | f | g | o)


# ----------------------------------------------------------------------------
# Fused kernel:
#   char-embedding lookup (one-hot @ LUT) -> masked char LSTM (batched over words)
#   -> word-embedding lookup (one-hot @ LUT) -> word LSTM -> hidden2tag -> log_softmax
# ----------------------------------------------------------------------------
def dual_tagger_kernel(lens_ref, words_ref, sent_ref,
                       char_lut_ref, whhc_ref,
                       word_lut_ref, wihwc_ref, whhw_ref,
                       wtag_ref, btag_ref,
                       out_ref,
                       *, n_words, char_len, seq_len):
    N, Tc, Tw, G = n_words, char_len, seq_len, GATE
    char_vocab = char_lut_ref.shape[0]
    word_vocab = word_lut_ref.shape[0]
    f32, bf16 = jnp.float32, jnp.bfloat16

    lens = lens_ref[...]                                   # (N, 1) int32
    words = words_ref[...]                                 # (N, Tc) int32

    # ---- char embedding + input projection, fused: one-hot @ (emb @ W_ih + b) LUT ----
    # Hoisted before the recurrence -> off the serial dependency chain.
    char_lut = char_lut_ref[...]                           # (char_vocab, 4G) bf16
    cv_iota = jax.lax.broadcasted_iota(jnp.int32, (N, char_vocab), 1)
    xp_c = []
    for t in range(Tc):                                    # static -> unrolled
        onehot = jnp.where(words[:, t:t + 1] == cv_iota, 1.0, 0.0).astype(bf16)
        xp_c.append(jnp.dot(onehot, char_lut, preferred_element_type=f32))  # (N, 4G)

    whh_c = whhc_ref[...]                                  # (G, 4G) bf16, hoisted

    # ---- char LSTM, batched over the N words; state lane-padded to 128 ----
    h = jnp.zeros((N, G), f32)
    c = jnp.zeros((N, G), f32)
    for t in range(Tc):                                    # static -> unrolled
        gates = xp_c[t] + jnp.dot(h.astype(bf16), whh_c, preferred_element_type=f32)
        i = jax.nn.sigmoid(gates[:, 0 * G:1 * G])          # whole-vreg gate slices
        f = jax.nn.sigmoid(gates[:, 1 * G:2 * G])
        g = jnp.tanh(gates[:, 2 * G:3 * G])
        o = jax.nn.sigmoid(gates[:, 3 * G:4 * G])
        c_new = f * c + i * g
        h_new = o * jnp.tanh(c_new)
        m = lens > t                                       # freeze state past word length
        h = jnp.where(m, h_new, h)
        c = jnp.where(m, c_new, c)
    char_h = h                                             # (N, G); lanes >= Hc are 0

    # ---- word embedding + input projection (dot + dot + bias-in-LUT, MRB-friendly) ----
    word_lut = word_lut_ref[...]                           # (word_vocab, 4G) bf16, bias folded in
    wv_iota = jax.lax.broadcasted_iota(jnp.int32, (Tw, word_vocab), 1)
    onehot_w = jnp.where(sent_ref[...] == wv_iota, 1.0, 0.0).astype(bf16)   # (Tw, word_vocab)
    xp_w = (jnp.dot(onehot_w, word_lut, preferred_element_type=f32)
            + jnp.dot(char_h.astype(bf16), wihwc_ref[...], preferred_element_type=f32))
    xp_rows = [xp_w[t:t + 1, :] for t in range(Tw)]        # hoisted row extraction (off chain)

    whh_w = whhw_ref[...]                                  # (G, 4G) bf16, hoisted

    # ---- word LSTM (batch 1); per-step h kept in registers (no VMEM scratch) ----
    h = jnp.zeros((1, G), f32)
    c = jnp.zeros((1, G), f32)
    hs = []
    for t in range(Tw):                                    # static -> unrolled
        gates = xp_rows[t] + jnp.dot(h.astype(bf16), whh_w, preferred_element_type=f32)
        i = jax.nn.sigmoid(gates[:, 0 * G:1 * G])
        f = jax.nn.sigmoid(gates[:, 1 * G:2 * G])
        g = jnp.tanh(gates[:, 2 * G:3 * G])
        o = jax.nn.sigmoid(gates[:, 3 * G:4 * G])
        c = f * c + i * g
        h = o * jnp.tanh(c)
        hs.append(h)
    hs = jnp.concatenate(hs, axis=0)                       # (Tw, G) register value

    # ---- hidden2tag + log_softmax (lane-dense 128-wide output) ----
    logits = jnp.dot(hs.astype(bf16), wtag_ref[...], preferred_element_type=f32) + btag_ref[...]
    # padded lanes carry bias -1e30 -> never win the max, exp underflows to 0.
    m = jnp.max(logits, axis=1, keepdims=True)
    lse = m + jnp.log(jnp.sum(jnp.exp(logits - m), axis=1, keepdims=True))
    out_ref[...] = logits - lse


def dual_tagger_pallas(lens, words, sent,
                       char_lut, whhc, word_lut, wihwc, whhw, wtag, btag,
                       *, n_words, char_len, seq_len):
    vmem = pl.BlockSpec(memory_space=pltpu.MemorySpace.VMEM)
    kernel = functools.partial(dual_tagger_kernel, n_words=n_words,
                               char_len=char_len, seq_len=seq_len)
    return pl.pallas_call(
        kernel,
        out_shape=jax.ShapeDtypeStruct((seq_len, GATE), jnp.float32),
        in_specs=[vmem] * 10,
        out_specs=vmem,
    )(lens, words, sent, char_lut, whhc, word_lut, wihwc, whhw, wtag, btag)


# ----------------------------------------------------------------------------
# Parameters (fused LSTM weight layout: (in_dim, 4H), gate order i|f|g|o; b = b_ih + b_hh)
# ----------------------------------------------------------------------------
def init_params(key, word_emb_dim, word_hidden, char_emb_dim, char_hidden,
                word_vocab, char_vocab, tag_vocab):
    ks = jax.random.split(key, 10)
    kw = 1.0 / jnp.sqrt(word_hidden)
    kc = 1.0 / jnp.sqrt(char_hidden)
    u = lambda k, shape, b: jax.random.uniform(k, shape, jnp.float32, -b, b)
    return {
        "word_emb": jax.random.normal(ks[0], (word_vocab, word_emb_dim), jnp.float32),
        "char_emb": jax.random.normal(ks[1], (char_vocab, char_emb_dim), jnp.float32),
        "char_wih": u(ks[2], (char_emb_dim, 4 * char_hidden), kc),
        "char_whh": u(ks[3], (char_hidden, 4 * char_hidden), kc),
        "char_b":   u(ks[4], (1, 4 * char_hidden), kc),
        "word_wih": u(ks[5], (word_emb_dim + char_hidden, 4 * word_hidden), kw),
        "word_whh": u(ks[6], (word_hidden, 4 * word_hidden), kw),
        "word_b":   u(ks[7], (1, 4 * word_hidden), kw),
        "wtag_t":   u(ks[8], (word_hidden, tag_vocab), kw),
        "btag":     u(ks[9], (1, tag_vocab), kw),
    }


# ----------------------------------------------------------------------------
# One-time packing: 128-lane gate slots, embedding+projection LUTs, bf16 MXU operands.
# Runs ONCE per parameter set (outside the per-call jitted forward).
# ----------------------------------------------------------------------------
def pack_params(params):
    G = GATE
    Hc = params["char_whh"].shape[0]
    Hw = params["word_whh"].shape[0]
    Ew = params["word_emb"].shape[1]
    V = params["wtag_t"].shape[1]

    def slot(mat, H):
        # (rows, 4H) gate-contiguous -> (rows, 4G); gate g at lanes [g*G, g*G+H), rest 0
        out = jnp.zeros((mat.shape[0], 4 * G), jnp.float32)
        for g in range(4):
            out = out.at[:, g * G:g * G + H].set(mat[:, g * H:(g + 1) * H])
        return out

    def rowpad(mat, rows_to):
        return jnp.zeros((rows_to, mat.shape[1]), mat.dtype).at[:mat.shape[0], :].set(mat)

    wihw = params["word_wih"]
    # Embedding fused with input projection (+ bias): valid because the in-kernel one-hot
    # rows sum to exactly 1.
    char_lut = slot(params["char_emb"] @ params["char_wih"] + params["char_b"], Hc)
    word_lut = slot(params["word_emb"] @ wihw[:Ew] + params["word_b"], Hw)
    whhc_p = rowpad(slot(params["char_whh"], Hc), G)
    wihwc_p = rowpad(slot(wihw[Ew:], Hw), G)
    whhw_p = rowpad(slot(params["word_whh"], Hw), G)
    wtag_p = rowpad(jnp.zeros((Hw, G), jnp.float32).at[:, :V].set(params["wtag_t"]), G)
    btag_p = jnp.full((1, G), -1e30, jnp.float32).at[:, :V].set(params["btag"])

    bf = lambda x: x.astype(jnp.bfloat16)
    return {
        "char_lut": bf(char_lut), "whhc": bf(whhc_p),
        "word_lut": bf(word_lut), "wihwc": bf(wihwc_p), "whhw": bf(whhw_p),
        "wtag": bf(wtag_p), "btag": btag_p,        # bias added post-dot, stays f32
        "tag_vocab": V,
    }


# ----------------------------------------------------------------------------
# Forward: only trivial reshapes in JAX; gathers + both LSTMs + tag head in one kernel.
# ----------------------------------------------------------------------------
@functools.partial(jax.jit, static_argnames=("tag_vocab",))
def dual_lstm_tagger_forward(packed, sentence, words_padded, word_lens, *, tag_vocab):
    N, Tc = words_padded.shape
    Tw = sentence.shape[0]
    assert N == Tw, "one char-sequence per sentence word"
    sent2 = sentence.reshape(Tw, 1).astype(jnp.int32)
    lens2 = word_lens.reshape(N, 1).astype(jnp.int32)
    out_pad = dual_tagger_pallas(
        lens2, words_padded.astype(jnp.int32), sent2,
        packed["char_lut"], packed["whhc"],
        packed["word_lut"], packed["wihwc"], packed["whhw"],
        packed["wtag"], packed["btag"],
        n_words=N, char_len=Tc, seq_len=Tw)
    return out_pad[:, :tag_vocab]                           # (Tw, V) log-probs


# ----------------------------------------------------------------------------
# Pure-JAX f32 reference (same math as the PyTorch module) for verification
# ----------------------------------------------------------------------------
def reference_forward(params, sentence, words_padded, word_lens):
    embeds = params["word_emb"][sentence]
    char_x = jnp.transpose(params["char_emb"][words_padded], (1, 0, 2))   # (Tc, N, Ec)
    Tc, N, _ = char_x.shape
    Hc = params["char_whh"].shape[0]

    h = jnp.zeros((N, Hc), jnp.float32)
    c = jnp.zeros_like(h)
    for t in range(Tc):
        gates = char_x[t] @ params["char_wih"] + h @ params["char_whh"] + params["char_b"]
        i, f, g, o = jnp.split(gates, 4, axis=1)
        i, f, g, o = jax.nn.sigmoid(i), jax.nn.sigmoid(f), jnp.tanh(g), jax.nn.sigmoid(o)
        c_new = f * c + i * g
        h_new = o * jnp.tanh(c_new)
        keep = (t < word_lens)[:, None]
        h = jnp.where(keep, h_new, h)
        c = jnp.where(keep, c_new, c)

    combined = jnp.concatenate([embeds, h], axis=1)
    Hw = params["word_whh"].shape[0]
    hw = jnp.zeros((1, Hw), jnp.float32)
    cw = jnp.zeros_like(hw)
    hs = []
    for t in range(combined.shape[0]):
        gates = (combined[t:t + 1] @ params["word_wih"]
                 + hw @ params["word_whh"] + params["word_b"])
        i, f, g, o = jnp.split(gates, 4, axis=1)
        i, f, g, o = jax.nn.sigmoid(i), jax.nn.sigmoid(f), jnp.tanh(g), jax.nn.sigmoid(o)
        cw = f * cw + i * g
        hw = o * jnp.tanh(cw)
        hs.append(hw[0])
    hs = jnp.stack(hs)
    logits = hs @ params["wtag_t"] + params["btag"]
    return jax.nn.log_softmax(logits, axis=1)


# ----------------------------------------------------------------------------
if __name__ == "__main__":
    # Hyperparameters (small, consistent with the module's constructor)
    word_embedding_dim = 16
    word_hidden_dim = 32
    char_embedding_dim = 8
    char_hidden_dim = 16
    word_vocab_size = 24
    char_vocab_size = 32
    tag_vocab_size = 10

    seq_len = 8          # number of words in the sentence
    max_char_len = 6     # max characters per word (padded; padding is length-masked)

    key = jax.random.PRNGKey(0)
    kp, ks, kw, kl = jax.random.split(key, 4)

    params = init_params(kp, word_embedding_dim, word_hidden_dim,
                         char_embedding_dim, char_hidden_dim,
                         word_vocab_size, char_vocab_size, tag_vocab_size)
    packed = pack_params(params)                             # one-time, outside hot path

    sentence = jax.random.randint(ks, (seq_len,), 0, word_vocab_size, jnp.int32)
    words_padded = jax.random.randint(kw, (seq_len, max_char_len), 0,
                                      char_vocab_size, jnp.int32)
    word_lens = jnp.array([3, 5, 2, 6, 4, 1, 6, 3], dtype=jnp.int32)  # per-word char counts

    tag_scores = dual_lstm_tagger_forward(packed, sentence, words_padded, word_lens,
                                          tag_vocab=tag_vocab_size)
    tag_scores = jax.block_until_ready(tag_scores)

    ref = reference_forward(params, sentence, words_padded, word_lens)
    assert tag_scores.shape == (seq_len, tag_vocab_size)
    max_err = float(jnp.max(jnp.abs(tag_scores - ref)))
    # Tolerance accounts for bf16 MXU operands (f32 accumulation / elementwise math).
    assert max_err < 5e-2, f"mismatch vs f32 reference: {max_err}"

    print("KERNEL_OK")
</pallas_src>

<mosaic_0001>
module attributes {stable_mosaic.version = 11 : i64} {
  func.func @dual_tagger_kernel(%arg0: memref<8x1xi32, #tpu.memory_space<vmem>>, %arg1: memref<8x6xi32, #tpu.memory_space<vmem>>, %arg2: memref<8x1xi32, #tpu.memory_space<vmem>>, %arg3: memref<32x512xbf16, #tpu.memory_space<vmem>>, %arg4: memref<128x512xbf16, #tpu.memory_space<vmem>>, %arg5: memref<24x512xbf16, #tpu.memory_space<vmem>>, %arg6: memref<128x512xbf16, #tpu.memory_space<vmem>>, %arg7: memref<128x512xbf16, #tpu.memory_space<vmem>>, %arg8: memref<128x128xbf16, #tpu.memory_space<vmem>>, %arg9: memref<1x128xf32, #tpu.memory_space<vmem>>, %arg10: memref<8x128xf32, #tpu.memory_space<vmem>>) attributes {dimension_semantics = [], scalar_prefetch = 0 : i64, scratch_operands = 0 : i64, tpu.core_type = #tpu.core_type<tc>} {
    %c0 = arith.constant 0 : index
    %c0_0 = arith.constant 0 : index
    %0 = vector.load %arg0[%c0, %c0_0] : memref<8x1xi32, #tpu.memory_space<vmem>>, vector<8x1xi32>
    %c0_1 = arith.constant 0 : index
    %c0_2 = arith.constant 0 : index
    %1 = vector.load %arg1[%c0_1, %c0_2] : memref<8x6xi32, #tpu.memory_space<vmem>>, vector<8x6xi32>
    %c0_3 = arith.constant 0 : index
    %c0_4 = arith.constant 0 : index
    %2 = vector.load %arg3[%c0_3, %c0_4] : memref<32x512xbf16, #tpu.memory_space<vmem>>, vector<32x512xbf16>
    %3 = tpu.iota {dimensions = array<i32: 1>} : vector<8x32xi32>
    %4 = vector.extract_strided_slice %1 {offsets = [0, 0], sizes = [8, 1], strides = [1, 1]} : vector<8x6xi32> to vector<8x1xi32>
    %5 = vector.broadcast %4 : vector<8x1xi32> to vector<8x32xi32>
    %6 = arith.cmpi eq, %5, %3 : vector<8x32xi32>
    %cst = arith.constant 1.000000e+00 : f32
    %cst_5 = arith.constant 0.000000e+00 : f32
    %7 = vector.broadcast %cst : f32 to vector<8x32xf32>
    %8 = vector.broadcast %cst_5 : f32 to vector<8x32xf32>
    %9 = arith.select %6, %7, %8 : vector<8x32xi1>, vector<8x32xf32>
    %10 = arith.truncf %9 : vector<8x32xf32> to vector<8x32xbf16>
    %cst_6 = arith.constant dense<0.000000e+00> : vector<8x512xf32>
    %11 = tpu.matmul %10, %2, %cst_6 {dimension_numbers = #tpu.dot_dimension_numbers<[1], [0], [0], [1], [0, 0, 1, 1], [], []>} : vector<8x32xbf16>, vector<32x512xbf16>, vector<8x512xf32> -> vector<8x512xf32>
    %12 = vector.extract_strided_slice %1 {offsets = [0, 1], sizes = [8, 1], strides = [1, 1]} : vector<8x6xi32> to vector<8x1xi32>
    %13 = vector.broadcast %12 : vector<8x1xi32> to vector<8x32xi32>
    %14 = arith.cmpi eq, %13, %3 : vector<8x32xi32>
    %cst_7 = arith.constant 1.000000e+00 : f32
    %cst_8 = arith.constant 0.000000e+00 : f32
    %15 = vector.broadcast %cst_7 : f32 to vector<8x32xf32>
    %16 = vector.broadcast %cst_8 : f32 to vector<8x32xf32>
    %17 = arith.select %14, %15, %16 : vector<8x32xi1>, vector<8x32xf32>
    %18 = arith.truncf %17 : vector<8x32xf32> to vector<8x32xbf16>
    %cst_9 = arith.constant dense<0.000000e+00> : vector<8x512xf32>
    %19 = tpu.matmul %18, %2, %cst_9 {dimension_numbers = #tpu.dot_dimension_numbers<[1], [0], [0], [1], [0, 0, 1, 1], [], []>} : vector<8x32xbf16>, vector<32x512xbf16>, vector<8x512xf32> -> vector<8x512xf32>
    %20 = vector.extract_strided_slice %1 {offsets = [0, 2], sizes = [8, 1], strides = [1, 1]} : vector<8x6xi32> to vector<8x1xi32>
    %21 = vector.broadcast %20 : vector<8x1xi32> to vector<8x32xi32>
    %22 = arith.cmpi eq, %21, %3 : vector<8x32xi32>
    %cst_10 = arith.constant 1.000000e+00 : f32
    %cst_11 = arith.constant 0.000000e+00 : f32
    %23 = vector.broadcast %cst_10 : f32 to vector<8x32xf32>
    %24 = vector.broadcast %cst_11 : f32 to vector<8x32xf32>
    %25 = arith.select %22, %23, %24 : vector<8x32xi1>, vector<8x32xf32>
    %26 = arith.truncf %25 : vector<8x32xf32> to vector<8x32xbf16>
    %cst_12 = arith.constant dense<0.000000e+00> : vector<8x512xf32>
    %27 = tpu.matmul %26, %2, %cst_12 {dimension_numbers = #tpu.dot_dimension_numbers<[1], [0], [0], [1], [0, 0, 1, 1], [], []>} : vector<8x32xbf16>, vector<32x512xbf16>, vector<8x512xf32> -> vector<8x512xf32>
    %28 = vector.extract_strided_slice %1 {offsets = [0, 3], sizes = [8, 1], strides = [1, 1]} : vector<8x6xi32> to vector<8x1xi32>
    %29 = vector.broadcast %28 : vector<8x1xi32> to vector<8x32xi32>
    %30 = arith.cmpi eq, %29, %3 : vector<8x32xi32>
    %cst_13 = arith.constant 1.000000e+00 : f32
    %cst_14 = arith.constant 0.000000e+00 : f32
    %31 = vector.broadcast %cst_13 : f32 to vector<8x32xf32>
    %32 = vector.broadcast %cst_14 : f32 to vector<8x32xf32>
    %33 = arith.select %30, %31, %32 : vector<8x32xi1>, vector<8x32xf32>
    %34 = arith.truncf %33 : vector<8x32xf32> to vector<8x32xbf16>
    %cst_15 = arith.constant dense<0.000000e+00> : vector<8x512xf32>
    %35 = tpu.matmul %34, %2, %cst_15 {dimension_numbers = #tpu.dot_dimension_numbers<[1], [0], [0], [1], [0, 0, 1, 1], [], []>} : vector<8x32xbf16>, vector<32x512xbf16>, vector<8x512xf32> -> vector<8x512xf32>
    %36 = vector.extract_strided_slice %1 {offsets = [0, 4], sizes = [8, 1], strides = [1, 1]} : vector<8x6xi32> to vector<8x1xi32>
    %37 = vector.broadcast %36 : vector<8x1xi32> to vector<8x32xi32>
    %38 = arith.cmpi eq, %37, %3 : vector<8x32xi32>
    %cst_16 = arith.constant 1.000000e+00 : f32
    %cst_17 = arith.constant 0.000000e+00 : f32
    %39 = vector.broadcast %cst_16 : f32 to vector<8x32xf32>
    %40 = vector.broadcast %cst_17 : f32 to vector<8x32xf32>
    %41 = arith.select %38, %39, %40 : vector<8x32xi1>, vector<8x32xf32>
    %42 = arith.truncf %41 : vector<8x32xf32> to vector<8x32xbf16>
    %cst_18 = arith.constant dense<0.000000e+00> : vector<8x512xf32>
    %43 = tpu.matmul %42, %2, %cst_18 {dimension_numbers = #tpu.dot_dimension_numbers<[1], [0], [0], [1], [0, 0, 1, 1], [], []>} : vector<8x32xbf16>, vector<32x512xbf16>, vector<8x512xf32> -> vector<8x512xf32>
    %44 = vector.extract_strided_slice %1 {offsets = [0, 5], sizes = [8, 1], strides = [1, 1]} : vector<8x6xi32> to vector<8x1xi32>
    %45 = vector.broadcast %44 : vector<8x1xi32> to vector<8x32xi32>
    %46 = arith.cmpi eq, %45, %3 : vector<8x32xi32>
    %cst_19 = arith.constant 1.000000e+00 : f32
    %cst_20 = arith.constant 0.000000e+00 : f32
    %47 = vector.broadcast %cst_19 : f32 to vector<8x32xf32>
    %48 = vector.broadcast %cst_20 : f32 to vector<8x32xf32>
    %49 = arith.select %46, %47, %48 : vector<8x32xi1>, vector<8x32xf32>
    %50 = arith.truncf %49 : vector<8x32xf32> to vector<8x32xbf16>
    %cst_21 = arith.constant dense<0.000000e+00> : vector<8x512xf32>
    %51 = tpu.matmul %50, %2, %cst_21 {dimension_numbers = #tpu.dot_dimension_numbers<[1], [0], [0], [1], [0, 0, 1, 1], [], []>} : vector<8x32xbf16>, vector<32x512xbf16>, vector<8x512xf32> -> vector<8x512xf32>
    %c0_22 = arith.constant 0 : index
    %c0_23 = arith.constant 0 : index
    %52 = vector.load %arg4[%c0_22, %c0_23] : memref<128x512xbf16, #tpu.memory_space<vmem>>, vector<128x512xbf16>
    %cst_24 = arith.constant 0.000000e+00 : f32
    %53 = vector.broadcast %cst_24 : f32 to vector<8x128xf32>
    %cst_25 = arith.constant 0.000000e+00 : f32
    %54 = vector.broadcast %cst_25 : f32 to vector<8x128xf32>
    %55 = arith.truncf %53 : vector<8x128xf32> to vector<8x128xbf16>
    %cst_26 = arith.constant dense<0.000000e+00> : vector<8x512xf32>
    %56 = tpu.matmul %55, %52, %cst_26 {dimension_numbers = #tpu.dot_dimension_numbers<[1], [0], [0], [1], [0, 0, 1, 1], [], []>} : vector<8x128xbf16>, vector<128x512xbf16>, vector<8x512xf32> -> vector<8x512xf32>
    %57 = arith.addf %11, %56 : vector<8x512xf32>
    %58 = vector.extract_strided_slice %57 {offsets = [0, 0], sizes = [8, 128], strides = [1, 1]} : vector<8x512xf32> to vector<8x128xf32>
    %59 = arith.negf %58 : vector<8x128xf32>
    %60 = math.exp %59 : vector<8x128xf32>
    %cst_27 = arith.constant 1.000000e+00 : f32
    %61 = vector.broadcast %cst_27 : f32 to vector<8x128xf32>
    %62 = arith.addf %61, %60 : vector<8x128xf32>
    %63 = arith.divf %61, %62 : vector<8x128xf32>
    %64 = vector.extract_strided_slice %57 {offsets = [0, 128], sizes = [8, 128], strides = [1, 1]} : vector<8x512xf32> to vector<8x128xf32>
    %65 = arith.negf %64 : vector<8x128xf32>
    %66 = math.exp %65 : vector<8x128xf32>
    %cst_28 = arith.constant 1.000000e+00 : f32
    %67 = vector.broadcast %cst_28 : f32 to vector<8x128xf32>
    %68 = arith.addf %67, %66 : vector<8x128xf32>
    %69 = arith.divf %67, %68 : vector<8x128xf32>
    %70 = vector.extract_strided_slice %57 {offsets = [0, 256], sizes = [8, 128], strides = [1, 1]} : vector<8x512xf32> to vector<8x128xf32>
    %71 = math.tanh %70 : vector<8x128xf32>
    %72 = vector.extract_strided_slice %57 {offsets = [0, 384], sizes = [8, 128], strides = [1, 1]} : vector<8x512xf32> to vector<8x128xf32>
    %73 = arith.negf %72 : vector<8x128xf32>
    %74 = math.exp %73 : vector<8x128xf32>
    %cst_29 = arith.constant 1.000000e+00 : f32
    %75 = vector.broadcast %cst_29 : f32 to vector<8x128xf32>
    %76 = arith.addf %75, %74 : vector<8x128xf32>
    %77 = arith.divf %75, %76 : vector<8x128xf32>
    %78 = arith.mulf %69, %54 : vector<8x128xf32>
    %79 = arith.mulf %63, %71 : vector<8x128xf32>
    %80 = arith.addf %78, %79 : vector<8x128xf32>
    %81 = math.tanh %80 : vector<8x128xf32>
    %82 = arith.mulf %77, %81 : vector<8x128xf32>
    %c0_i32 = arith.constant 0 : i32
    %83 = vector.broadcast %c0_i32 : i32 to vector<8x1xi32>
    %84 = arith.cmpi sgt, %0, %83 : vector<8x1xi32>
    %85 = vector.shape_cast %84 : vector<8x1xi1> to vector<8x1xi1>
    %86 = vector.broadcast %85 : vector<8x1xi1> to vector<8x128xi1>
    %87 = arith.select %86, %82, %53 : vector<8x128xi1>, vector<8x128xf32>
    %88 = vector.shape_cast %84 : vector<8x1xi1> to vector<8x1xi1>
    %89 = vector.broadcast %88 : vector<8x1xi1> to vector<8x128xi1>
    %90 = arith.select %89, %80, %54 : vector<8x128xi1>, vector<8x128xf32>
    %91 = arith.truncf %87 : vector<8x128xf32> to vector<8x128xbf16>
    %cst_30 = arith.constant dense<0.000000e+00> : vector<8x512xf32>
    %92 = tpu.matmul %91, %52, %cst_30 {dimension_numbers = #tpu.dot_dimension_numbers<[1], [0], [0], [1], [0, 0, 1, 1], [], []>} : vector<8x128xbf16>, vector<128x512xbf16>, vector<8x512xf32> -> vector<8x512xf32>
    %93 = arith.addf %19, %92 : vector<8x512xf32>
    %94 = vector.extract_strided_slice %93 {offsets = [0, 0], sizes = [8, 128], strides = [1, 1]} : vector<8x512xf32> to vector<8x128xf32>
    %95 = arith.negf %94 : vector<8x128xf32>
    %96 = math.exp %95 : vector<8x128xf32>
    %cst_31 = arith.constant 1.000000e+00 : f32
    %97 = vector.broadcast %cst_31 : f32 to vector<8x128xf32>
    %98 = arith.addf %97, %96 : vector<8x128xf32>
    %99 = arith.divf %97, %98 : vector<8x128xf32>
    %100 = vector.extract_strided_slice %93 {offsets = [0, 128], sizes = [8, 128], strides = [1, 1]} : vector<8x512xf32> to vector<8x128xf32>
    %101 = arith.negf %100 : vector<8x128xf32>
    %102 = math.exp %101 : vector<8x128xf32>
    %cst_32 = arith.constant 1.000000e+00 : f32
    %103 = vector.broadcast %cst_32 : f32 to vector<8x128xf32>
    %104 = arith.addf %103, %102 : vector<8x128xf32>
    %105 = arith.divf %103, %104 : vector<8x128xf32>
    %106 = vector.extract_strided_slice %93 {offsets = [0, 256], sizes = [8, 128], strides = [1, 1]} : vector<8x512xf32> to vector<8x128xf32>
    %107 = math.tanh %106 : vector<8x128xf32>
    %108 = vector.extract_strided_slice %93 {offsets = [0, 384], sizes = [8, 128], strides = [1, 1]} : vector<8x512xf32> to vector<8x128xf32>
    %109 = arith.negf %108 : vector<8x128xf32>
    %110 = math.exp %109 : vector<8x128xf32>
    %cst_33 = arith.constant 1.000000e+00 : f32
    %111 = vector.broadcast %cst_33 : f32 to vector<8x128xf32>
    %112 = arith.addf %111, %110 : vector<8x128xf32>
    %113 = arith.divf %111, %112 : vector<8x128xf32>
    %114 = arith.mulf %105, %90 : vector<8x128xf32>
    %115 = arith.mulf %99, %107 : vector<8x128xf32>
    %116 = arith.addf %114, %115 : vector<8x128xf32>
    %117 = math.tanh %116 : vector<8x128xf32>
    %118 = arith.mulf %113, %117 : vector<8x128xf32>
    %c1_i32 = arith.constant 1 : i32
    %119 = vector.broadcast %c1_i32 : i32 to vector<8x1xi32>
    %120 = arith.cmpi sgt, %0, %119 : vector<8x1xi32>
    %121 = vector.shape_cast %120 : vector<8x1xi1> to vector<8x1xi1>
    %122 = vector.broadcast %121 : vector<8x1xi1> to vector<8x128xi1>
    %123 = arith.select %122, %118, %87 : vector<8x128xi1>, vector<8x128xf32>
    %124 = vector.shape_cast %120 : vector<8x1xi1> to vector<8x1xi1>
    %125 = vector.broadcast %124 : vector<8x1xi1> to vector<8x128xi1>
    %126 = arith.select %125, %116, %90 : vector<8x128xi1>, vector<8x128xf32>
    %127 = arith.truncf %123 : vector<8x128xf32> to vector<8x128xbf16>
    %cst_34 = arith.constant dense<0.000000e+00> : vector<8x512xf32>
    %128 = tpu.matmul %127, %52, %cst_34 {dimension_numbers = #tpu.dot_dimension_numbers<[1], [0], [0], [1], [0, 0, 1, 1], [], []>} : vector<8x128xbf16>, vector<128x512xbf16>, vector<8x512xf32> -> vector<8x512xf32>
    %129 = arith.addf %27, %128 : vector<8x512xf32>
    %130 = vector.extract_strided_slice %129 {offsets = [0, 0], sizes = [8, 128], strides = [1, 1]} : vector<8x512xf32> to vector<8x128xf32>
    %131 = arith.negf %130 : vector<8x128xf32>
    %132 = math.exp %131 : vector<8x128xf32>
    %cst_35 = arith.constant 1.000000e+00 : f32
    %133 = vector.broadcast %cst_35 : f32 to vector<8x128xf32>
    %134 = arith.addf %133, %132 : vector<8x128xf32>
    %135 = arith.divf %133, %134 : vector<8x128xf32>
    %136 = vector.extract_strided_slice %129 {offsets = [0, 128], sizes = [8, 128], strides = [1, 1]} : vector<8x512xf32> to vector<8x128xf32>
    %137 = arith.negf %136 : vector<8x128xf32>
    %138 = math.exp %137 : vector<8x128xf32>
    %cst_36 = arith.constant 1.000000e+00 : f32
    %139 = vector.broadcast %cst_36 : f32 to vector<8x128xf32>
    %140 = arith.addf %139, %138 : vector<8x128xf32>
    %141 = arith.divf %139, %140 : vector<8x128xf32>
    %142 = vector.extract_strided_slice %129 {offsets = [0, 256], sizes = [8, 128], strides = [1, 1]} : vector<8x512xf32> to vector<8x128xf32>
    %143 = math.tanh %142 : vector<8x128xf32>
    %144 = vector.extract_strided_slice %129 {offsets = [0, 384], sizes = [8, 128], strides = [1, 1]} : vector<8x512xf32> to vector<8x128xf32>
    %145 = arith.negf %144 : vector<8x128xf32>
    %146 = math.exp %145 : vector<8x128xf32>
    %cst_37 = arith.constant 1.000000e+00 : f32
    %147 = vector.broadcast %cst_37 : f32 to vector<8x128xf32>
    %148 = arith.addf %147, %146 : vector<8x128xf32>
    %149 = arith.divf %147, %148 : vector<8x128xf32>
    %150 = arith.mulf %141, %126 : vector<8x128xf32>
    %151 = arith.mulf %135, %143 : vector<8x128xf32>
    %152 = arith.addf %150, %151 : vector<8x128xf32>
    %153 = math.tanh %152 : vector<8x128xf32>
    %154 = arith.mulf %149, %153 : vector<8x128xf32>
    %c2_i32 = arith.constant 2 : i32
    %155 = vector.broadcast %c2_i32 : i32 to vector<8x1xi32>
    %156 = arith.cmpi sgt, %0, %155 : vector<8x1xi32>
    %157 = vector.shape_cast %156 : vector<8x1xi1> to vector<8x1xi1>
    %158 = vector.broadcast %157 : vector<8x1xi1> to vector<8x128xi1>
    %159 = arith.select %158, %154, %123 : vector<8x128xi1>, vector<8x128xf32>
    %160 = vector.shape_cast %156 : vector<8x1xi1> to vector<8x1xi1>
    %161 = vector.broadcast %160 : vector<8x1xi1> to vector<8x128xi1>
    %162 = arith.select %161, %152, %126 : vector<8x128xi1>, vector<8x128xf32>
    %163 = arith.truncf %159 : vector<8x128xf32> to vector<8x128xbf16>
    %cst_38 = arith.constant dense<0.000000e+00> : vector<8x512xf32>
    %164 = tpu.matmul %163, %52, %cst_38 {dimension_numbers = #tpu.dot_dimension_numbers<[1], [0], [0], [1], [0, 0, 1, 1], [], []>} : vector<8x128xbf16>, vector<128x512xbf16>, vector<8x512xf32> -> vector<8x512xf32>
    %165 = arith.addf %35, %164 : vector<8x512xf32>
    %166 = vector.extract_strided_slice %165 {offsets = [0, 0], sizes = [8, 128], strides = [1, 1]} : vector<8x512xf32> to vector<8x128xf32>
    %167 = arith.negf %166 : vector<8x128xf32>
    %168 = math.exp %167 : vector<8x128xf32>
    %cst_39 = arith.constant 1.000000e+00 : f32
    %169 = vector.broadcast %cst_39 : f32 to vector<8x128xf32>
    %170 = arith.addf %169, %168 : vector<8x128xf32>
    %171 = arith.divf %169, %170 : vector<8x128xf32>
    %172 = vector.extract_strided_slice %165 {offsets = [0, 128], sizes = [8, 128], strides = [1, 1]} : vector<8x512xf32> to vector<8x128xf32>
    %173 = arith.negf %172 : vector<8x128xf32>
    %174 = math.exp %173 : vector<8x128xf32>
    %cst_40 = arith.constant 1.000000e+00 : f32
    %175 = vector.broadcast %cst_40 : f32 to vector<8x128xf32>
    %176 = arith.addf %175, %174 : vector<8x128xf32>
    %177 = arith.divf %175, %176 : vector<8x128xf32>
    %178 = vector.extract_strided_slice %165 {offsets = [0, 256], sizes = [8, 128], strides = [1, 1]} : vector<8x512xf32> to vector<8x128xf32>
    %179 = math.tanh %178 : vector<8x128xf32>
    %180 = vector.extract_strided_slice %165 {offsets = [0, 384], sizes = [8, 128], strides = [1, 1]} : vector<8x512xf32> to vector<8x128xf32>
    %181 = arith.negf %180 : vector<8x128xf32>
    %182 = math.exp %181 : vector<8x128xf32>
    %cst_41 = arith.constant 1.000000e+00 : f32
    %183 = vector.broadcast %cst_41 : f32 to vector<8x128xf32>
    %184 = arith.addf %183, %182 : vector<8x128xf32>
    %185 = arith.divf %183, %184 : vector<8x128xf32>
    %186 = arith.mulf %177, %162 : vector<8x128xf32>
    %187 = arith.mulf %171, %179 : vector<8x128xf32>
    %188 = arith.addf %186, %187 : vector<8x128xf32>
    %189 = math.tanh %188 : vector<8x128xf32>
    %190 = arith.mulf %185, %189 : vector<8x128xf32>
    %c3_i32 = arith.constant 3 : i32
    %191 = vector.broadcast %c3_i32 : i32 to vector<8x1xi32>
    %192 = arith.cmpi sgt, %0, %191 : vector<8x1xi32>
    %193 = vector.shape_cast %192 : vector<8x1xi1> to vector<8x1xi1>
    %194 = vector.broadcast %193 : vector<8x1xi1> to vector<8x128xi1>
    %195 = arith.select %194, %190, %159 : vector<8x128xi1>, vector<8x128xf32>
    %196 = vector.shape_cast %192 : vector<8x1xi1> to vector<8x1xi1>
    %197 = vector.broadcast %196 : vector<8x1xi1> to vector<8x128xi1>
    %198 = arith.select %197, %188, %162 : vector<8x128xi1>, vector<8x128xf32>
    %199 = arith.truncf %195 : vector<8x128xf32> to vector<8x128xbf16>
    %cst_42 = arith.constant dense<0.000000e+00> : vector<8x512xf32>
    %200 = tpu.matmul %199, %52, %cst_42 {dimension_numbers = #tpu.dot_dimension_numbers<[1], [0], [0], [1], [0, 0, 1, 1], [], []>} : vector<8x128xbf16>, vector<128x512xbf16>, vector<8x512xf32> -> vector<8x512xf32>
    %201 = arith.addf %43, %200 : vector<8x512xf32>
    %202 = vector.extract_strided_slice %201 {offsets = [0, 0], sizes = [8, 128], strides = [1, 1]} : vector<8x512xf32> to vector<8x128xf32>
    %203 = arith.negf %202 : vector<8x128xf32>
    %204 = math.exp %203 : vector<8x128xf32>
    %cst_43 = arith.constant 1.000000e+00 : f32
    %205 = vector.broadcast %cst_43 : f32 to vector<8x128xf32>
    %206 = arith.addf %205, %204 : vector<8x128xf32>
    %207 = arith.divf %205, %206 : vector<8x128xf32>
    %208 = vector.extract_strided_slice %201 {offsets = [0, 128], sizes = [8, 128], strides = [1, 1]} : vector<8x512xf32> to vector<8x128xf32>
    %209 = arith.negf %208 : vector<8x128xf32>
    %210 = math.exp %209 : vector<8x128xf32>
    %cst_44 = arith.constant 1.000000e+00 : f32
    %211 = vector.broadcast %cst_44 : f32 to vector<8x128xf32>
    %212 = arith.addf %211, %210 : vector<8x128xf32>
    %213 = arith.divf %211, %212 : vector<8x128xf32>
    %214 = vector.extract_strided_slice %201 {offsets = [0, 256], sizes = [8, 128], strides = [1, 1]} : vector<8x512xf32> to vector<8x128xf32>
    %215 = math.tanh %214 : vector<8x128xf32>
    %216 = vector.extract_strided_slice %201 {offsets = [0, 384], sizes = [8, 128], strides = [1, 1]} : vector<8x512xf32> to vector<8x128xf32>
    %217 = arith.negf %216 : vector<8x128xf32>
    %218 = math.exp %217 : vector<8x128xf32>
    %cst_45 = arith.constant 1.000000e+00 : f32
    %219 = vector.broadcast %cst_45 : f32 to vector<8x128xf32>
    %220 = arith.addf %219, %218 : vector<8x128xf32>
    %221 = arith.divf %219, %220 : vector<8x128xf32>
    %222 = arith.mulf %213, %198 : vector<8x128xf32>
    %223 = arith.mulf %207, %215 : vector<8x128xf32>
    %224 = arith.addf %222, %223 : vector<8x128xf32>
    %225 = math.tanh %224 : vector<8x128xf32>
    %226 = arith.mulf %221, %225 : vector<8x128xf32>
    %c4_i32 = arith.constant 4 : i32
    %227 = vector.broadcast %c4_i32 : i32 to vector<8x1xi32>
    %228 = arith.cmpi sgt, %0, %227 : vector<8x1xi32>
    %229 = vector.shape_cast %228 : vector<8x1xi1> to vector<8x1xi1>
    %230 = vector.broadcast %229 : vector<8x1xi1> to vector<8x128xi1>
    %231 = arith.select %230, %226, %195 : vector<8x128xi1>, vector<8x128xf32>
    %232 = vector.shape_cast %228 : vector<8x1xi1> to vector<8x1xi1>
    %233 = vector.broadcast %232 : vector<8x1xi1> to vector<8x128xi1>
    %234 = arith.select %233, %224, %198 : vector<8x128xi1>, vector<8x128xf32>
    %235 = arith.truncf %231 : vector<8x128xf32> to vector<8x128xbf16>
    %cst_46 = arith.constant dense<0.000000e+00> : vector<8x512xf32>
    %236 = tpu.matmul %235, %52, %cst_46 {dimension_numbers = #tpu.dot_dimension_numbers<[1], [0], [0], [1], [0, 0, 1, 1], [], []>} : vector<8x128xbf16>, vector<128x512xbf16>, vector<8x512xf32> -> vector<8x512xf32>
    %237 = arith.addf %51, %236 : vector<8x512xf32>
    %238 = vector.extract_strided_slice %237 {offsets = [0, 0], sizes = [8, 128], strides = [1, 1]} : vector<8x512xf32> to vector<8x128xf32>
    %239 = arith.negf %238 : vector<8x128xf32>
    %240 = math.exp %239 : vector<8x128xf32>
    %cst_47 = arith.constant 1.000000e+00 : f32
    %241 = vector.broadcast %cst_47 : f32 to vector<8x128xf32>
    %242 = arith.addf %241, %240 : vector<8x128xf32>
    %243 = arith.divf %241, %242 : vector<8x128xf32>
    %244 = vector.extract_strided_slice %237 {offsets = [0, 128], sizes = [8, 128], strides = [1, 1]} : vector<8x512xf32> to vector<8x128xf32>
    %245 = arith.negf %244 : vector<8x128xf32>
    %246 = math.exp %245 : vector<8x128xf32>
    %cst_48 = arith.constant 1.000000e+00 : f32
    %247 = vector.broadcast %cst_48 : f32 to vector<8x128xf32>
    %248 = arith.addf %247, %246 : vector<8x128xf32>
    %249 = arith.divf %247, %248 : vector<8x128xf32>
    %250 = vector.extract_strided_slice %237 {offsets = [0, 256], sizes = [8, 128], strides = [1, 1]} : vector<8x512xf32> to vector<8x128xf32>
    %251 = math.tanh %250 : vector<8x128xf32>
    %252 = vector.extract_strided_slice %237 {offsets = [0, 384], sizes = [8, 128], strides = [1, 1]} : vector<8x512xf32> to vector<8x128xf32>
    %253 = arith.negf %252 : vector<8x128xf32>
    %254 = math.exp %253 : vector<8x128xf32>
    %cst_49 = arith.constant 1.000000e+00 : f32
    %255 = vector.broadcast %cst_49 : f32 to vector<8x128xf32>
    %256 = arith.addf %255, %254 : vector<8x128xf32>
    %257 = arith.divf %255, %256 : vector<8x128xf32>
    %258 = arith.mulf %249, %234 : vector<8x128xf32>
    %259 = arith.mulf %243, %251 : vector<8x128xf32>
    %260 = arith.addf %258, %259 : vector<8x128xf32>
    %261 = math.tanh %260 : vector<8x128xf32>
    %262 = arith.mulf %257, %261 : vector<8x128xf32>
    %c5_i32 = arith.constant 5 : i32
    %263 = vector.broadcast %c5_i32 : i32 to vector<8x1xi32>
    %264 = arith.cmpi sgt, %0, %263 : vector<8x1xi32>
    %265 = vector.shape_cast %264 : vector<8x1xi1> to vector<8x1xi1>
    %266 = vector.broadcast %265 : vector<8x1xi1> to vector<8x128xi1>
    %267 = arith.select %266, %262, %231 : vector<8x128xi1>, vector<8x128xf32>
    %c0_50 = arith.constant 0 : index
    %c0_51 = arith.constant 0 : index
    %268 = vector.load %arg5[%c0_50, %c0_51] : memref<24x512xbf16, #tpu.memory_space<vmem>>, vector<24x512xbf16>
    %269 = tpu.iota {dimensions = array<i32: 1>} : vector<8x24xi32>
    %c0_52 = arith.constant 0 : index
    %c0_53 = arith.constant 0 : index
    %270 = vector.load %arg2[%c0_52, %c0_53] : memref<8x1xi32, #tpu.memory_space<vmem>>, vector<8x1xi32>
    %271 = vector.broadcast %270 : vector<8x1xi32> to vector<8x24xi32>
    %272 = arith.cmpi eq, %271, %269 : vector<8x24xi32>
    %cst_54 = arith.constant 1.000000e+00 : f32
    %cst_55 = arith.constant 0.000000e+00 : f32
    %273 = vector.broadcast %cst_54 : f32 to vector<8x24xf32>
    %274 = vector.broadcast %cst_55 : f32 to vector<8x24xf32>
    %275 = arith.select %272, %273, %274 : vector<8x24xi1>, vector<8x24xf32>
    %276 = arith.truncf %275 : vector<8x24xf32> to vector<8x24xbf16>
    %cst_56 = arith.constant dense<0.000000e+00> : vector<8x512xf32>
    %277 = tpu.matmul %276, %268, %cst_56 {dimension_numbers = #tpu.dot_dimension_numbers<[1], [0], [0], [1], [0, 0, 1, 1], [], []>} : vector<8x24xbf16>, vector<24x512xbf16>, vector<8x512xf32> -> vector<8x512xf32>
    %278 = arith.truncf %267 : vector<8x128xf32> to vector<8x128xbf16>
    %c0_57 = arith.constant 0 : index
    %c0_58 = arith.constant 0 : index
    %279 = vector.load %arg6[%c0_57, %c0_58] : memref<128x512xbf16, #tpu.memory_space<vmem>>, vector<128x512xbf16>
    %cst_59 = arith.constant dense<0.000000e+00> : vector<8x512xf32>
    %280 = tpu.matmul %278, %279, %cst_59 {dimension_numbers = #tpu.dot_dimension_numbers<[1], [0], [0], [1], [0, 0, 1, 1], [], []>} : vector<8x128xbf16>, vector<128x512xbf16>, vector<8x512xf32> -> vector<8x512xf32>
    %281 = arith.addf %277, %280 : vector<8x512xf32>
    %282 = vector.extract_strided_slice %281 {offsets = [0, 0], sizes = [1, 512], strides = [1, 1]} : vector<8x512xf32> to vector<1x512xf32>
    %283 = vector.extract_strided_slice %281 {offsets = [1, 0], sizes = [1, 512], strides = [1, 1]} : vector<8x512xf32> to vector<1x512xf32>
    %284 = vector.extract_strided_slice %281 {offsets = [2, 0], sizes = [1, 512], strides = [1, 1]} : vector<8x512xf32> to vector<1x512xf32>
    %285 = vector.extract_strided_slice %281 {offsets = [3, 0], sizes = [1, 512], strides = [1, 1]} : vector<8x512xf32> to vector<1x512xf32>
    %286 = vector.extract_strided_slice %281 {offsets = [4, 0], sizes = [1, 512], strides = [1, 1]} : vector<8x512xf32> to vector<1x512xf32>
    %287 = vector.extract_strided_slice %281 {offsets = [5, 0], sizes = [1, 512], strides = [1, 1]} : vector<8x512xf32> to vector<1x512xf32>
    %288 = vector.extract_strided_slice %281 {offsets = [6, 0], sizes = [1, 512], strides = [1, 1]} : vector<8x512xf32> to vector<1x512xf32>
    %289 = vector.extract_strided_slice %281 {offsets = [7, 0], sizes = [1, 512], strides = [1, 1]} : vector<8x512xf32> to vector<1x512xf32>
    %c0_60 = arith.constant 0 : index
    %c0_61 = arith.constant 0 : index
    %290 = vector.load %arg7[%c0_60, %c0_61] : memref<128x512xbf16, #tpu.memory_space<vmem>>, vector<128x512xbf16>
    %cst_62 = arith.constant 0.000000e+00 : f32
    %291 = vector.broadcast %cst_62 : f32 to vector<1x128xf32>
    %cst_63 = arith.constant 0.000000e+00 : f32
    %292 = vector.broadcast %cst_63 : f32 to vector<1x128xf32>
    %293 = arith.truncf %291 : vector<1x128xf32> to vector<1x128xbf16>
    %cst_64 = arith.constant dense<0.000000e+00> : vector<1x512xf32>
    %294 = tpu.matmul %293, %290, %cst_64 {dimension_numbers = #tpu.dot_dimension_numbers<[1], [0], [0], [1], [0, 0, 1, 1], [], []>} : vector<1x128xbf16>, vector<128x512xbf16>, vector<1x512xf32> -> vector<1x512xf32>
    %295 = arith.addf %282, %294 : vector<1x512xf32>
    %296 = vector.extract_strided_slice %295 {offsets = [0, 0], sizes = [1, 128], strides = [1, 1]} : vector<1x512xf32> to vector<1x128xf32>
    %297 = arith.negf %296 : vector<1x128xf32>
    %298 = math.exp %297 : vector<1x128xf32>
    %cst_65 = arith.constant 1.000000e+00 : f32
    %299 = vector.broadcast %cst_65 : f32 to vector<1x128xf32>
    %300 = arith.addf %299, %298 : vector<1x128xf32>
    %301 = arith.divf %299, %300 : vector<1x128xf32>
    %302 = vector.extract_strided_slice %295 {offsets = [0, 128], sizes = [1, 128], strides = [1, 1]} : vector<1x512xf32> to vector<1x128xf32>
    %303 = arith.negf %302 : vector<1x128xf32>
    %304 = math.exp %303 : vector<1x128xf32>
    %cst_66 = arith.constant 1.000000e+00 : f32
    %305 = vector.broadcast %cst_66 : f32 to vector<1x128xf32>
    %306 = arith.addf %305, %304 : vector<1x128xf32>
    %307 = arith.divf %305, %306 : vector<1x128xf32>
    %308 = vector.extract_strided_slice %295 {offsets = [0, 256], sizes = [1, 128], strides = [1, 1]} : vector<1x512xf32> to vector<1x128xf32>
    %309 = math.tanh %308 : vector<1x128xf32>
    %310 = vector.extract_strided_slice %295 {offsets = [0, 384], sizes = [1, 128], strides = [1, 1]} : vector<1x512xf32> to vector<1x128xf32>
    %311 = arith.negf %310 : vector<1x128xf32>
    %312 = math.exp %311 : vector<1x128xf32>
    %cst_67 = arith.constant 1.000000e+00 : f32
    %313 = vector.broadcast %cst_67 : f32 to vector<1x128xf32>
    %314 = arith.addf %313, %312 : vector<1x128xf32>
    %315 = arith.divf %313, %314 : vector<1x128xf32>
    %316 = arith.mulf %307, %292 : vector<1x128xf32>
    %317 = arith.mulf %301, %309 : vector<1x128xf32>
    %318 = arith.addf %316, %317 : vector<1x128xf32>
    %319 = math.tanh %318 : vector<1x128xf32>
    %320 = arith.mulf %315, %319 : vector<1x128xf32>
    %321 = arith.truncf %320 : vector<1x128xf32> to vector<1x128xbf16>
    %cst_68 = arith.constant dense<0.000000e+00> : vector<1x512xf32>
    %322 = tpu.matmul %321, %290, %cst_68 {dimension_numbers = #tpu.dot_dimension_numbers<[1], [0], [0], [1], [0, 0, 1, 1], [], []>} : vector<1x128xbf16>, vector<128x512xbf16>, vector<1x512xf32> -> vector<1x512xf32>
    %323 = arith.addf %283, %322 : vector<1x512xf32>
    %324 = vector.extract_strided_slice %323 {offsets = [0, 0], sizes = [1, 128], strides = [1, 1]} : vector<1x512xf32> to vector<1x128xf32>
    %325 = arith.negf %324 : vector<1x128xf32>
    %326 = math.exp %325 : vector<1x128xf32>
    %cst_69 = arith.constant 1.000000e+00 : f32
    %327 = vector.broadcast %cst_69 : f32 to vector<1x128xf32>
    %328 = arith.addf %327, %326 : vector<1x128xf32>
    %329 = arith.divf %327, %328 : vector<1x128xf32>
    %330 = vector.extract_strided_slice %323 {offsets = [0, 128], sizes = [1, 128], strides = [1, 1]} : vector<1x512xf32> to vector<1x128xf32>
    %331 = arith.negf %330 : vector<1x128xf32>
    %332 = math.exp %331 : vector<1x128xf32>
    %cst_70 = arith.constant 1.000000e+00 : f32
    %333 = vector.broadcast %cst_70 : f32 to vector<1x128xf32>
    %334 = arith.addf %333, %332 : vector<1x128xf32>
    %335 = arith.divf %333, %334 : vector<1x128xf32>
    %336 = vector.extract_strided_slice %323 {offsets = [0, 256], sizes = [1, 128], strides = [1, 1]} : vector<1x512xf32> to vector<1x128xf32>
    %337 = math.tanh %336 : vector<1x128xf32>
    %338 = vector.extract_strided_slice %323 {offsets = [0, 384], sizes = [1, 128], strides = [1, 1]} : vector<1x512xf32> to vector<1x128xf32>
    %339 = arith.negf %338 : vector<1x128xf32>
    %340 = math.exp %339 : vector<1x128xf32>
    %cst_71 = arith.constant 1.000000e+00 : f32
    %341 = vector.broadcast %cst_71 : f32 to vector<1x128xf32>
    %342 = arith.addf %341, %340 : vector<1x128xf32>
    %343 = arith.divf %341, %342 : vector<1x128xf32>
    %344 = arith.mulf %335, %318 : vector<1x128xf32>
    %345 = arith.mulf %329, %337 : vector<1x128xf32>
    %346 = arith.addf %344, %345 : vector<1x128xf32>
    %347 = math.tanh %346 : vector<1x128xf32>
    %348 = arith.mulf %343, %347 : vector<1x128xf32>
    %349 = arith.truncf %348 : vector<1x128xf32> to vector<1x128xbf16>
    %cst_72 = arith.constant dense<0.000000e+00> : vector<1x512xf32>
    %350 = tpu.matmul %349, %290, %cst_72 {dimension_numbers = #tpu.dot_dimension_numbers<[1], [0], [0], [1], [0, 0, 1, 1], [], []>} : vector<1x128xbf16>, vector<128x512xbf16>, vector<1x512xf32> -> vector<1x512xf32>
    %351 = arith.addf %284, %350 : vector<1x512xf32>
    %352 = vector.extract_strided_slice %351 {offsets = [0, 0], sizes = [1, 128], strides = [1, 1]} : vector<1x512xf32> to vector<1x128xf32>
    %353 = arith.negf %352 : vector<1x128xf32>
    %354 = math.exp %353 : vector<1x128xf32>
    %cst_73 = arith.constant 1.000000e+00 : f32
    %355 = vector.broadcast %cst_73 : f32 to vector<1x128xf32>
    %356 = arith.addf %355, %354 : vector<1x128xf32>
    %357 = arith.divf %355, %356 : vector<1x128xf32>
    %358 = vector.extract_strided_slice %351 {offsets = [0, 128], sizes = [1, 128], strides = [1, 1]} : vector<1x512xf32> to vector<1x128xf32>
    %359 = arith.negf %358 : vector<1x128xf32>
    %360 = math.exp %359 : vector<1x128xf32>
    %cst_74 = arith.constant 1.000000e+00 : f32
    %361 = vector.broadcast %cst_74 : f32 to vector<1x128xf32>
    %362 = arith.addf %361, %360 : vector<1x128xf32>
    %363 = arith.divf %361, %362 : vector<1x128xf32>
    %364 = vector.extract_strided_slice %351 {offsets = [0, 256], sizes = [1, 128], strides = [1, 1]} : vector<1x512xf32> to vector<1x128xf32>
    %365 = math.tanh %364 : vector<1x128xf32>
    %366 = vector.extract_strided_slice %351 {offsets = [0, 384], sizes = [1, 128], strides = [1, 1]} : vector<1x512xf32> to vector<1x128xf32>
    %367 = arith.negf %366 : vector<1x128xf32>
    %368 = math.exp %367 : vector<1x128xf32>
    %cst_75 = arith.constant 1.000000e+00 : f32
    %369 = vector.broadcast %cst_75 : f32 to vector<1x128xf32>
    %370 = arith.addf %369, %368 : vector<1x128xf32>
    %371 = arith.divf %369, %370 : vector<1x128xf32>
    %372 = arith.mulf %363, %346 : vector<1x128xf32>
    %373 = arith.mulf %357, %365 : vector<1x128xf32>
    %374 = arith.addf %372, %373 : vector<1x128xf32>
    %375 = math.tanh %374 : vector<1x128xf32>
    %376 = arith.mulf %371, %375 : vector<1x128xf32>
    %377 = arith.truncf %376 : vector<1x128xf32> to vector<1x128xbf16>
    %cst_76 = arith.constant dense<0.000000e+00> : vector<1x512xf32>
    %378 = tpu.matmul %377, %290, %cst_76 {dimension_numbers = #tpu.dot_dimension_numbers<[1], [0], [0], [1], [0, 0, 1, 1], [], []>} : vector<1x128xbf16>, vector<128x512xbf16>, vector<1x512xf32> -> vector<1x512xf32>
    %379 = arith.addf %285, %378 : vector<1x512xf32>
    %380 = vector.extract_strided_slice %379 {offsets = [0, 0], sizes = [1, 128], strides = [1, 1]} : vector<1x512xf32> to vector<1x128xf32>
    %381 = arith.negf %380 : vector<1x128xf32>
    %382 = math.exp %381 : vector<1x128xf32>
    %cst_77 = arith.constant 1.000000e+00 : f32
    %383 = vector.broadcast %cst_77 : f32 to vector<1x128xf32>
    %384 = arith.addf %383, %382 : vector<1x128xf32>
    %385 = arith.divf %383, %384 : vector<1x128xf32>
    %386 = vector.extract_strided_slice %379 {offsets = [0, 128], sizes = [1, 128], strides = [1, 1]} : vector<1x512xf32> to vector<1x128xf32>
    %387 = arith.negf %386 : vector<1x128xf32>
    %388 = math.exp %387 : vector<1x128xf32>
    %cst_78 = arith.constant 1.000000e+00 : f32
    %389 = vector.broadcast %cst_78 : f32 to vector<1x128xf32>
    %390 = arith.addf %389, %388 : vector<1x128xf32>
    %391 = arith.divf %389, %390 : vector<1x128xf32>
    %392 = vector.extract_strided_slice %379 {offsets = [0, 256], sizes = [1, 128], strides = [1, 1]} : vector<1x512xf32> to vector<1x128xf32>
    %393 = math.tanh %392 : vector<1x128xf32>
    %394 = vector.extract_strided_slice %379 {offsets = [0, 384], sizes = [1, 128], strides = [1, 1]} : vector<1x512xf32> to vector<1x128xf32>
    %395 = arith.negf %394 : vector<1x128xf32>
    %396 = math.exp %395 : vector<1x128xf32>
    %cst_79 = arith.constant 1.000000e+00 : f32
    %397 = vector.broadcast %cst_79 : f32 to vector<1x128xf32>
    %398 = arith.addf %397, %396 : vector<1x128xf32>
    %399 = arith.divf %397, %398 : vector<1x128xf32>
    %400 = arith.mulf %391, %374 : vector<1x128xf32>
    %401 = arith.mulf %385, %393 : vector<1x128xf32>
    %402 = arith.addf %400, %401 : vector<1x128xf32>
    %403 = math.tanh %402 : vector<1x128xf32>
    %404 = arith.mulf %399, %403 : vector<1x128xf32>
    %405 = arith.truncf %404 : vector<1x128xf32> to vector<1x128xbf16>
    %cst_80 = arith.constant dense<0.000000e+00> : vector<1x512xf32>
    %406 = tpu.matmul %405, %290, %cst_80 {dimension_numbers = #tpu.dot_dimension_numbers<[1], [0], [0], [1], [0, 0, 1, 1], [], []>} : vector<1x128xbf16>, vector<128x512xbf16>, vector<1x512xf32> -> vector<1x512xf32>
    %407 = arith.addf %286, %406 : vector<1x512xf32>
    %408 = vector.extract_strided_slice %407 {offsets = [0, 0], sizes = [1, 128], strides = [1, 1]} : vector<1x512xf32> to vector<1x128xf32>
    %409 = arith.negf %408 : vector<1x128xf32>
    %410 = math.exp %409 : vector<1x128xf32>
    %cst_81 = arith.constant 1.000000e+00 : f32
    %411 = vector.broadcast %cst_81 : f32 to vector<1x128xf32>
    %412 = arith.addf %411, %410 : vector<1x128xf32>
    %413 = arith.divf %411, %412 : vector<1x128xf32>
    %414 = vector.extract_strided_slice %407 {offsets = [0, 128], sizes = [1, 128], strides = [1, 1]} : vector<1x512xf32> to vector<1x128xf32>
    %415 = arith.negf %414 : vector<1x128xf32>
    %416 = math.exp %415 : vector<1x128xf32>
    %cst_82 = arith.constant 1.000000e+00 : f32
    %417 = vector.broadcast %cst_82 : f32 to vector<1x128xf32>
    %418 = arith.addf %417, %416 : vector<1x128xf32>
    %419 = arith.divf %417, %418 : vector<1x128xf32>
    %420 = vector.extract_strided_slice %407 {offsets = [0, 256], sizes = [1, 128], strides = [1, 1]} : vector<1x512xf32> to vector<1x128xf32>
    %421 = math.tanh %420 : vector<1x128xf32>
    %422 = vector.extract_strided_slice %407 {offsets = [0, 384], sizes = [1, 128], strides = [1, 1]} : vector<1x512xf32> to vector<1x128xf32>
    %423 = arith.negf %422 : vector<1x128xf32>
    %424 = math.exp %423 : vector<1x128xf32>
    %cst_83 = arith.constant 1.000000e+00 : f32
    %425 = vector.broadcast %cst_83 : f32 to vector<1x128xf32>
    %426 = arith.addf %425, %424 : vector<1x128xf32>
    %427 = arith.divf %425, %426 : vector<1x128xf32>
    %428 = arith.mulf %419, %402 : vector<1x128xf32>
    %429 = arith.mulf %413, %421 : vector<1x128xf32>
    %430 = arith.addf %428, %429 : vector<1x128xf32>
    %431 = math.tanh %430 : vector<1x128xf32>
    %432 = arith.mulf %427, %431 : vector<1x128xf32>
    %433 = arith.truncf %432 : vector<1x128xf32> to vector<1x128xbf16>
    %cst_84 = arith.constant dense<0.000000e+00> : vector<1x512xf32>
    %434 = tpu.matmul %433, %290, %cst_84 {dimension_numbers = #tpu.dot_dimension_numbers<[1], [0], [0], [1], [0, 0, 1, 1], [], []>} : vector<1x128xbf16>, vector<128x512xbf16>, vector<1x512xf32> -> vector<1x512xf32>
    %435 = arith.addf %287, %434 : vector<1x512xf32>
    %436 = vector.extract_strided_slice %435 {offsets = [0, 0], sizes = [1, 128], strides = [1, 1]} : vector<1x512xf32> to vector<1x128xf32>
    %437 = arith.negf %436 : vector<1x128xf32>
    %438 = math.exp %437 : vector<1x128xf32>
    %cst_85 = arith.constant 1.000000e+00 : f32
    %439 = vector.broadcast %cst_85 : f32 to vector<1x128xf32>
    %440 = arith.addf %439, %438 : vector<1x128xf32>
    %441 = arith.divf %439, %440 : vector<1x128xf32>
    %442 = vector.extract_strided_slice %435 {offsets = [0, 128], sizes = [1, 128], strides = [1, 1]} : vector<1x512xf32> to vector<1x128xf32>
    %443 = arith.negf %442 : vector<1x128xf32>
    %444 = math.exp %443 : vector<1x128xf32>
    %cst_86 = arith.constant 1.000000e+00 : f32
    %445 = vector.broadcast %cst_86 : f32 to vector<1x128xf32>
    %446 = arith.addf %445, %444 : vector<1x128xf32>
    %447 = arith.divf %445, %446 : vector<1x128xf32>
    %448 = vector.extract_strided_slice %435 {offsets = [0, 256], sizes = [1, 128], strides = [1, 1]} : vector<1x512xf32> to vector<1x128xf32>
    %449 = math.tanh %448 : vector<1x128xf32>
    %450 = vector.extract_strided_slice %435 {offsets = [0, 384], sizes = [1, 128], strides = [1, 1]} : vector<1x512xf32> to vector<1x128xf32>
    %451 = arith.negf %450 : vector<1x128xf32>
    %452 = math.exp %451 : vector<1x128xf32>
    %cst_87 = arith.constant 1.000000e+00 : f32
    %453 = vector.broadcast %cst_87 : f32 to vector<1x128xf32>
    %454 = arith.addf %453, %452 : vector<1x128xf32>
    %455 = arith.divf %453, %454 : vector<1x128xf32>
    %456 = arith.mulf %447, %430 : vector<1x128xf32>
    %457 = arith.mulf %441, %449 : vector<1x128xf32>
    %458 = arith.addf %456, %457 : vector<1x128xf32>
    %459 = math.tanh %458 : vector<1x128xf32>
    %460 = arith.mulf %455, %459 : vector<1x128xf32>
    %461 = arith.truncf %460 : vector<1x128xf32> to vector<1x128xbf16>
    %cst_88 = arith.constant dense<0.000000e+00> : vector<1x512xf32>
    %462 = tpu.matmul %461, %290, %cst_88 {dimension_numbers = #tpu.dot_dimension_numbers<[1], [0], [0], [1], [0, 0, 1, 1], [], []>} : vector<1x128xbf16>, vector<128x512xbf16>, vector<1x512xf32> -> vector<1x512xf32>
    %463 = arith.addf %288, %462 : vector<1x512xf32>
    %464 = vector.extract_strided_slice %463 {offsets = [0, 0], sizes = [1, 128], strides = [1, 1]} : vector<1x512xf32> to vector<1x128xf32>
    %465 = arith.negf %464 : vector<1x128xf32>
    %466 = math.exp %465 : vector<1x128xf32>
    %cst_89 = arith.constant 1.000000e+00 : f32
    %467 = vector.broadcast %cst_89 : f32 to vector<1x128xf32>
    %468 = arith.addf %467, %466 : vector<1x128xf32>
    %469 = arith.divf %467, %468 : vector<1x128xf32>
    %470 = vector.extract_strided_slice %463 {offsets = [0, 128], sizes = [1, 128], strides = [1, 1]} : vector<1x512xf32> to vector<1x128xf32>
    %471 = arith.negf %470 : vector<1x128xf32>
    %472 = math.exp %471 : vector<1x128xf32>
    %cst_90 = arith.constant 1.000000e+00 : f32
    %473 = vector.broadcast %cst_90 : f32 to vector<1x128xf32>
    %474 = arith.addf %473, %472 : vector<1x128xf32>
    %475 = arith.divf %473, %474 : vector<1x128xf32>
    %476 = vector.extract_strided_slice %463 {offsets = [0, 256], sizes = [1, 128], strides = [1, 1]} : vector<1x512xf32> to vector<1x128xf32>
    %477 = math.tanh %476 : vector<1x128xf32>
    %478 = vector.extract_strided_slice %463 {offsets = [0, 384], sizes = [1, 128], strides = [1, 1]} : vector<1x512xf32> to vector<1x128xf32>
    %479 = arith.negf %478 : vector<1x128xf32>
    %480 = math.exp %479 : vector<1x128xf32>
    %cst_91 = arith.constant 1.000000e+00 : f32
    %481 = vector.broadcast %cst_91 : f32 to vector<1x128xf32>
    %482 = arith.addf %481, %480 : vector<1x128xf32>
    %483 = arith.divf %481, %482 : vector<1x128xf32>
    %484 = arith.mulf %475, %458 : vector<1x128xf32>
    %485 = arith.mulf %469, %477 : vector<1x128xf32>
    %486 = arith.addf %484, %485 : vector<1x128xf32>
    %487 = math.tanh %486 : vector<1x128xf32>
    %488 = arith.mulf %483, %487 : vector<1x128xf32>
    %489 = arith.truncf %488 : vector<1x128xf32> to vector<1x128xbf16>
    %cst_92 = arith.constant dense<0.000000e+00> : vector<1x512xf32>
    %490 = tpu.matmul %489, %290, %cst_92 {dimension_numbers = #tpu.dot_dimension_numbers<[1], [0], [0], [1], [0, 0, 1, 1], [], []>} : vector<1x128xbf16>, vector<128x512xbf16>, vector<1x512xf32> -> vector<1x512xf32>
    %491 = arith.addf %289, %490 : vector<1x512xf32>
    %492 = vector.extract_strided_slice %491 {offsets = [0, 0], sizes = [1, 128], strides = [1, 1]} : vector<1x512xf32> to vector<1x128xf32>
    %493 = arith.negf %492 : vector<1x128xf32>
    %494 = math.exp %493 : vector<1x128xf32>
    %cst_93 = arith.constant 1.000000e+00 : f32
    %495 = vector.broadcast %cst_93 : f32 to vector<1x128xf32>
    %496 = arith.addf %495, %494 : vector<1x128xf32>
    %497 = arith.divf %495, %496 : vector<1x128xf32>
    %498 = vector.extract_strided_slice %491 {offsets = [0, 128], sizes = [1, 128], strides = [1, 1]} : vector<1x512xf32> to vector<1x128xf32>
    %499 = arith.negf %498 : vector<1x128xf32>
    %500 = math.exp %499 : vector<1x128xf32>
    %cst_94 = arith.constant 1.000000e+00 : f32
    %501 = vector.broadcast %cst_94 : f32 to vector<1x128xf32>
    %502 = arith.addf %501, %500 : vector<1x128xf32>
    %503 = arith.divf %501, %502 : vector<1x128xf32>
    %504 = vector.extract_strided_slice %491 {offsets = [0, 256], sizes = [1, 128], strides = [1, 1]} : vector<1x512xf32> to vector<1x128xf32>
    %505 = math.tanh %504 : vector<1x128xf32>
    %506 = vector.extract_strided_slice %491 {offsets = [0, 384], sizes = [1, 128], strides = [1, 1]} : vector<1x512xf32> to vector<1x128xf32>
    %507 = arith.negf %506 : vector<1x128xf32>
    %508 = math.exp %507 : vector<1x128xf32>
    %cst_95 = arith.constant 1.000000e+00 : f32
    %509 = vector.broadcast %cst_95 : f32 to vector<1x128xf32>
    %510 = arith.addf %509, %508 : vector<1x128xf32>
    %511 = arith.divf %509, %510 : vector<1x128xf32>
    %512 = arith.mulf %503, %486 : vector<1x128xf32>
    %513 = arith.mulf %497, %505 : vector<1x128xf32>
    %514 = arith.addf %512, %513 : vector<1x128xf32>
    %515 = math.tanh %514 : vector<1x128xf32>
    %516 = arith.mulf %511, %515 : vector<1x128xf32>
    %517 = tpu.concatenate %320, %348, %376, %404, %432, %460, %488, %516 in 0 : vector<1x128xf32>, vector<1x128xf32>, vector<1x128xf32>, vector<1x128xf32>, vector<1x128xf32>, vector<1x128xf32>, vector<1x128xf32>, vector<1x128xf32> -> vector<8x128xf32>
    %518 = arith.truncf %517 : vector<8x128xf32> to vector<8x128xbf16>
    %c0_96 = arith.constant 0 : index
    %c0_97 = arith.constant 0 : index
    %519 = vector.load %arg8[%c0_96, %c0_97] : memref<128x128xbf16, #tpu.memory_space<vmem>>, vector<128x128xbf16>
    %cst_98 = arith.constant dense<0.000000e+00> : vector<8x128xf32>
    %520 = tpu.matmul %518, %519, %cst_98 {dimension_numbers = #tpu.dot_dimension_numbers<[1], [0], [0], [1], [0, 0, 1, 1], [], []>} : vector<8x128xbf16>, vector<128x128xbf16>, vector<8x128xf32> -> vector<8x128xf32>
    %c0_99 = arith.constant 0 : index
    %c0_100 = arith.constant 0 : index
    %521 = vector.load %arg9[%c0_99, %c0_100] : memref<1x128xf32, #tpu.memory_space<vmem>>, vector<1x128xf32>
    %522 = vector.broadcast %521 : vector<1x128xf32> to vector<8x128xf32>
    %523 = arith.addf %520, %522 : vector<8x128xf32>
    %cst_101 = arith.constant dense<0xFF800000> : vector<8xf32>
    %524 = vector.multi_reduction <maximumf>, %523, %cst_101 [1] : vector<8x128xf32> to vector<8xf32>
    %525 = vector.shape_cast %524 : vector<8xf32> to vector<8x1xf32>
    %526 = vector.broadcast %525 : vector<8x1xf32> to vector<8x128xf32>
    %527 = arith.subf %523, %526 : vector<8x128xf32>
    %528 = math.exp %527 : vector<8x128xf32>
    %cst_102 = arith.constant dense<0.000000e+00> : vector<8xf32>
    %529 = vector.multi_reduction <add>, %528, %cst_102 [1] : vector<8x128xf32> to vector<8xf32>
    %530 = vector.shape_cast %529 : vector<8xf32> to vector<8x1xf32>
    %531 = math.log %530 : vector<8x1xf32>
    %532 = arith.addf %525, %531 : vector<8x1xf32>
    %533 = vector.broadcast %532 : vector<8x1xf32> to vector<8x128xf32>
    %534 = arith.subf %523, %533 : vector<8x128xf32>
    %c0_103 = arith.constant 0 : index
    %c0_104 = arith.constant 0 : index
    %535 = vector.load %arg10[%c0_103, %c0_104] : memref<8x128xf32, #tpu.memory_space<vmem>>, vector<8x128xf32>
    tpu.vector_store %arg10[%c0_103, %c0_104], %534 {strides = array<i32>} : memref<8x128xf32, #tpu.memory_space<vmem>>, vector<8x128xf32>,
    return
  }
}

</mosaic_0001>

<bundles_post_ra>
// kernel: dual_lstm_tagger_forward.1
= control target key start
LH: loop header
LB: loop body
LE: loop exit
PB: predicated region body
PF: predicated region fallthrough
CT: control target
= control target key end

     0   :  { %15 = vsyncpa [#allocation3], 0  ;;  %s5383_s0 = inlined_call_operand.vmem [shape: s32[8,1], index: 0, kind: input, shape index: {}]   ;;  %s5384_s1 = inlined_call_operand.vmem [shape: s32[8,6], index: 1, kind: input, shape index: {}]   ;;  %s5385_s2 = inlined_call_operand.vmem [shape: s32[8,1], index: 2, kind: input, shape index: {}]   ;;  %s5386_s3 = inlined_call_operand.hbm [shape: bf16[32,512], index: 3, kind: input, shape index: {}]   ;;  %s5387_s4 = inlined_call_operand.hbm [shape: bf16[128,512], index: 4, kind: input, shape index: {}]   ;;  %s5388_s5 = inlined_call_operand.hbm [shape: bf16[24,512], index: 5, kind: input, shape index: {}]   ;;  %s5389_s6 = inlined_call_operand.hbm [shape: bf16[128,512], index: 6, kind: input, shape index: {}]   ;;  %s5390_s7 = inlined_call_operand.hbm [shape: bf16[128,512], index: 7, kind: input, shape index: {}]   ;;  %s5391_s8 = inlined_call_operand.hbm [shape: bf16[128,128], index: 8, kind: input, shape index: {}]   ;;  %s5392_s9 = inlined_call_operand.vmem [shape: f32[1,128], index: 9, kind: input, shape index: {}]   ;;  %s5393_s10 = inlined_call_operand.hbm [shape: f32[8,128], index: 10, kind: output, shape index: {}]  }
   0x1   :  { %16 = vsyncpa [#allocation6], 0 }
   0x2   :  { %17 = vsyncpa [#allocation9], 0 }
   0x3   :  { %18 = vsyncpa [#allocation12], 0 }
   0x4   :  { %19 = vsyncpa [#allocation4], 0  ;;  %s4309_s13 = smov [#allocation5]   ;;  %s4310_s15 = smov [#allocation8]  }
   0x5   :  { %s43_s14 = sshll.u32 %s4309_s13, 4  ;;  %s67_s16 = sshll.u32 %s4310_s15, 4  ;;  %s44_s14 = int_to_ptr.vmem [resolvable:$true] %s43_s14  ;;  %s4383_s16 = int_to_ptr.vmem [resolvable:$true] %s67_s16 }
   0x6   :  { %s4145_s19 = scalar_lea.hbm %s5387_s4, 4096 }
   0x7   :  { %p4146_p0 = scmp.ne.s32.totalorder %s5387_s4, %s4145_s19  ;;  %p4149_p1 = scmp.lt.u32.totalorder %s4145_s19, %s5387_s4 }
   0x9   :  { %p4151_p2 = pnand %p4149_p1, %p4146_p0 }
   0xb   :  { %4154 = shalt.err (!%p4151_p2)
}
   0xc   :  { %s4155_s24 = scalar_lea.vmem %s44_s14, 4096  ;;  %p4160_p4 = scmp.lt.s32.totalorder %s44_s14, %s44_s14 }
   0xd   :  { %p4156_p3 = scmp.ne.s32.totalorder %s44_s14, %s4155_s24  ;;  %p4161_p5 = scmp.lt.s32.totalorder %s4155_s24, %s4155_s24 }
   0xf   :  { %p4162_p6 = por %p4161_p5, %p4160_p4 }
  0x11   :  { %p4163_p7 = pnand %p4162_p6, %p4156_p3 }
  0x13   :  { %4166 = shalt.err (!%p4163_p7)
}
  0x14   :  { %s4311_s25 = smov 256   ;;  %s4312_s26 = smov 16  }
  0x15   :  { %49 = dma.hbm_to_vmem [thread:$0]  %s5387_s4, 4096, %s44_s14, [#allocation6], %s4311_s25, %s4311_s25, %s4312_s26  }
  0x16   :  { %s4167_s11 = scalar_lea.hbm %s5389_s6, 4096 }
  0x17   :  { %p4168_p8 = scmp.ne.s32.totalorder %s5389_s6, %s4167_s11  ;;  %p4171_p9 = scmp.lt.u32.totalorder %s4167_s11, %s5389_s6 }
  0x19   :  { %p4173_p10 = pnand %p4171_p9, %p4168_p8 }
  0x1b   :  { %4176 = shalt.err (!%p4173_p10)
}
  0x1c   :  { %s4177_s18 = scalar_lea.vmem %s4383_s16, 4096  ;;  %p4182_p12 = scmp.lt.s32.totalorder %s4383_s16, %s4383_s16 }
  0x1d   :  { %p4178_p11 = scmp.ne.s32.totalorder %s4383_s16, %s4177_s18  ;;  %p4183_p13 = scmp.lt.s32.totalorder %s4177_s18, %s4177_s18 }
  0x1f   :  { %p4184_p0 = por %p4183_p13, %p4182_p12 }
  0x21   :  { %p4185_p1 = pnand %p4184_p0, %p4178_p11 }
  0x23   :  { %4188 = shalt.err (!%p4185_p1)
}
  0x24   :  { %73 = dma.hbm_to_vmem [thread:$0]  %s5389_s6, 4096, %s4383_s16, [#allocation9], %s4311_s25, %s4311_s25, %s4312_s26  }
  0x25   :  { %s4313_s19 = smov [#allocation2]   ;;  %s4314_s21 = smov [#allocation7]  }
  0x26   :  { %s31_s20 = sshll.u32 %s4313_s19, 4  ;;  %s55_s22 = sshll.u32 %s4314_s21, 4  ;;  %s32_s20 = int_to_ptr.vmem [resolvable:$true] %s31_s20  ;;  %s4420_s22 = int_to_ptr.vmem [resolvable:$true] %s55_s22 }
  0x27   :  { %s4189_s27 = scalar_lea.hbm %s5386_s3, 1024 }
  0x28   :  { %p4190_p2 = scmp.ne.s32.totalorder %s5386_s3, %s4189_s27  ;;  %p4193_p3 = scmp.lt.u32.totalorder %s4189_s27, %s5386_s3 }
  0x2a   :  { %p4195_p4 = pnand %p4193_p3, %p4190_p2 }
  0x2c   :  { %4198 = shalt.err (!%p4195_p4)
}
  0x2d   :  { %s4199_s6 = scalar_lea.vmem %s32_s20, 1024  ;;  %p4204_p6 = scmp.lt.s32.totalorder %s32_s20, %s32_s20 }
  0x2e   :  { %p4200_p5 = scmp.ne.s32.totalorder %s32_s20, %s4199_s6  ;;  %p4205_p7 = scmp.lt.s32.totalorder %s4199_s6, %s4199_s6 }
  0x30   :  { %p4206_p8 = por %p4205_p7, %p4204_p6 }
  0x32   :  { %p4207_p9 = pnand %p4206_p8, %p4200_p5 }
  0x34   :  { %4210 = shalt.err (!%p4207_p9)
}
  0x35   :  { %37 = dma.hbm_to_vmem [thread:$0]  %s5386_s3, 1024, %s32_s20, [#allocation3], %s4311_s25, %s4311_s25, %s4312_s26  }
  0x36   :  { %s4211_s17 = scalar_lea.hbm %s5388_s5, 768 }
  0x37   :  { %p4212_p10 = scmp.ne.s32.totalorder %s5388_s5, %s4211_s17  ;;  %p4215_p11 = scmp.lt.u32.totalorder %s4211_s17, %s5388_s5 }
  0x39   :  { %p4217_p12 = pnand %p4215_p11, %p4212_p10 }
  0x3b   :  { %4220 = shalt.err (!%p4217_p12)
}
  0x3c   :  { %s4221_s21 = scalar_lea.vmem %s4420_s22, 768  ;;  %p4226_p0 = scmp.lt.s32.totalorder %s4420_s22, %s4420_s22 }
  0x3d   :  { %p4222_p13 = scmp.ne.s32.totalorder %s4420_s22, %s4221_s21  ;;  %p4227_p1 = scmp.lt.s32.totalorder %s4221_s21, %s4221_s21 }
  0x3f   :  { %p4228_p2 = por %p4227_p1, %p4226_p0 }
  0x41   :  { %p4229_p3 = pnand %p4228_p2, %p4222_p13 }
  0x43   :  { %4232 = shalt.err (!%p4229_p3)
}
  0x44   :  { %61 = dma.hbm_to_vmem [thread:$0]  %s5388_s5, 768, %s4420_s22, [#allocation6], %s4311_s25, %s4311_s25, %s4312_s26  }
  0x45   :  { %s4315_s23 = smov [#allocation10]   ;;  %s4316_s27 = smov [#allocation11]  }
  0x46   :  { %s79_s24 = sshll.u32 %s4315_s23, 4  ;;  %s91_s28 = sshll.u32 %s4316_s27, 4  ;;  %s80_s24 = int_to_ptr.vmem [resolvable:$true] %s79_s24  ;;  %s4457_s28 = int_to_ptr.vmem [resolvable:$true] %s91_s28 }
  0x47   :  { %s4233_s11 = scalar_lea.hbm %s5390_s7, 4096 }
  0x48   :  { %p4234_p4 = scmp.ne.s32.totalorder %s5390_s7, %s4233_s11  ;;  %p4237_p5 = scmp.lt.u32.totalorder %s4233_s11, %s5390_s7 }
  0x4a   :  { %p4239_p6 = pnand %p4237_p5, %p4234_p4 }
  0x4c   :  { %4242 = shalt.err (!%p4239_p6)
}
  0x4d   :  { %s4243_s5 = scalar_lea.vmem %s80_s24, 4096  ;;  %p4248_p8 = scmp.lt.s32.totalorder %s80_s24, %s80_s24 }
  0x4e   :  { %p4244_p7 = scmp.ne.s32.totalorder %s80_s24, %s4243_s5  ;;  %p4249_p9 = scmp.lt.s32.totalorder %s4243_s5, %s4243_s5 }
  0x50   :  { %p4250_p10 = por %p4249_p9, %p4248_p8 }
  0x52   :  { %p4251_p11 = pnand %p4250_p10, %p4244_p7 }
  0x54   :  { %4254 = shalt.err (!%p4251_p11)
}
  0x55   :  { %85 = dma.hbm_to_vmem [thread:$0]  %s5390_s7, 4096, %s80_s24, [#allocation9], %s4311_s25, %s4311_s25, %s4312_s26  }
  0x56   :  { %s4255_s4 = scalar_lea.hbm %s5391_s8, 1024 }
  0x57   :  { %p4256_p12 = scmp.ne.s32.totalorder %s5391_s8, %s4255_s4  ;;  %p4259_p13 = scmp.lt.u32.totalorder %s4255_s4, %s5391_s8 }
  0x59   :  { %p4261_p0 = pnand %p4259_p13, %p4256_p12 }
  0x5b   :  { %4264 = shalt.err (!%p4261_p0)
}
  0x5c   :  { %s4265_s20 = scalar_lea.vmem %s4457_s28, 1024  ;;  %p4270_p2 = scmp.lt.s32.totalorder %s4457_s28, %s4457_s28 }
  0x5d   :  { %p4266_p1 = scmp.ne.s32.totalorder %s4457_s28, %s4265_s20  ;;  %p4271_p3 = scmp.lt.s32.totalorder %s4265_s20, %s4265_s20 }
  0x5f   :  { %p4272_p4 = por %p4271_p3, %p4270_p2 }
  0x61   :  { %p4273_p5 = pnand %p4272_p4, %p4266_p1 }
  0x63   :  { %4276 = shalt.err (!%p4273_p5)
}
  0x64   :  { %s4317_s7 = smov 64   ;;  %s4318_s25 = smov 4  }
  0x65   :  { %97 = dma.hbm_to_vmem [thread:$0]  %s5391_s8, 1024, %s4457_s28, [#allocation12], %s4317_s7, %s4317_s7, %s4318_s25  }
  0x66   :  { %4299 = dma.done.wait [#allocation3], 1024  }
  0x67   :  { %4300 = vsyncadd [#allocation3], 4294966272 }
  0x68   :  { %4301 = dma.done.wait [#allocation6], 4864  }
  0x69   :  { %4302 = vsyncadd [#allocation6], 4294962432 }
  0x6a   :  { %4303 = dma.done.wait [#allocation9], 8192  }
  0x6b   :  { %4304 = vsyncadd [#allocation9], 4294959104 }
  0x6c   :  { %4305 = dma.done.wait [#allocation12], 1024  }
  0x6d   :  { %4306 = vsyncadd [#allocation12], 4294966272  ;;  %v5396_v0 = vmov 0   ;;  %v4497_v1 = vld [vmem:[%s5384_s1] sm:$0xff]  ;;  %v4506_v3 = vld [vmem:[#allocation5 + $0xc] ss:$16 sps:$4 sm:$0xff]   ;;  %v129_v42 = vlaneseq }
  0x6e   :  { %3662 = vset.pattern.permute.xlu0 %v5396_v0  ;;  %432 = vmatprep.mubr.bf16.mxu1 %v5396_v0  ;;  %5400 = vst [vmem:[#allocation19_spill] sm:$0xff] %v4497_v1  ;;  %v4502_v2 = vld [vmem:[%s5383_s0] sm:$0xff]  ;;  %v4508_v4 = vld [vmem:[#allocation5 + $0x8] ss:$16 sps:$4 sm:$0xff]   ;;  %v4511_v6 = vld [vmem:[#allocation5 + $0x2c] ss:$16 sps:$4 sm:$0xff]  }
  0x6f   :  { %391 = vmatprep.mubr.bf16.mxu0 %v5396_v0  ;;  %5401 = vst [vmem:[#allocation20_spill] sm:$0xff] %v4502_v2  ;;  %132 = vperm.xlu0 %3662, %v4497_v1   ;;  %vm591_vm0 = vcmp.gt.s32.totalorder %v4502_v2, 0  ;;  %v4514_v7 = vld [vmem:[#allocation5 + $0x28] ss:$16 sps:$4 sm:$0xff]   ;;  %v4517_v8 = vld [vmem:[#allocation5 + $0x4] ss:$16 sps:$4 sm:$0xff]  }
  0x70   :  { %v592_v5 = vsel %vm591_vm0, 1, %v5396_v0  ;;  %400 = vmatprep.subr.bf16.mxu1 %v4506_v3  ;;  %v4519_v9 = vld [vmem:[#allocation5] ss:$16 sps:$4 sm:$0xff]   ;;  %v4522_v10 = vld [vmem:[#allocation5 + $0x4c] ss:$16 sps:$4 sm:$0xff]   ;;  %359 = vmatprep.subr.bf16.mxu0 %v4517_v8  ;;  %v4320_v20 = vmov 1  }
  0x71   :  { %401 = vmatpush1.bf16.msra.mxu1 %v4508_v4  ;;  %v4525_v11 = vld [vmem:[#allocation5 + $0x24] ss:$16 sps:$4 sm:$0xff]   ;;  %360 = vmatpush1.bf16.msra.mxu0 %v4519_v9  ;;  %v4528_v12 = vld [vmem:[#allocation5 + $0x20] ss:$16 sps:$4 sm:$0xff]   ;;  %v4531_v13 = vld [vmem:[#allocation5 + $0x48] ss:$16 sps:$4 sm:$0xff]  }
  0x72   :  { %402 = vmatprep.subr.bf16.mxu1 %v4511_v6  ;;  %361 = vmatprep.subr.bf16.mxu0 %v4525_v11  ;;  %v4535_v14 = vld [vmem:[#allocation5 + $0x6c] ss:$16 sps:$4 sm:$0xff]   ;;  %v4537_v15 = vld [vmem:[#allocation5 + $0x44] ss:$16 sps:$4 sm:$0xff]   ;;  %v4540_v16 = vld [vmem:[#allocation5 + $0x40] ss:$16 sps:$4 sm:$0xff]  }
  0x73   :  { %594 = vperm.xlu0 %3662, %v592_v5   ;;  %v4543_v17 = vld [vmem:[#allocation5 + $0x68] ss:$16 sps:$4 sm:$0xff]   ;;  %v4546_v18 = vld [vmem:[#allocation5 + $0x64] ss:$16 sps:$4 sm:$0xff]   ;;  %v4549_v19 = vld [vmem:[#allocation5 + $0x8c] ss:$16 sps:$4 sm:$0xff]   ;;  %3663 = vset.pattern.permute.xlu1 %v4320_v20 }
  0x74   :  { %v4552_v21 = vld [vmem:[#allocation5 + $0x60] ss:$16 sps:$4 sm:$0xff]   ;;  %138 = vperm.xlu1 %3663, %v4497_v1   ;;  %v4556_v22 = vld [vmem:[#allocation5 + $0x88] ss:$16 sps:$4 sm:$0xff]   ;;  %v4559_v23 = vld [vmem:[#allocation5 + $0x84] ss:$16 sps:$4 sm:$0xff]  }
  0x75   :  { %403 = vmatpush1.bf16.msra.mxu1 %v4514_v7  ;;  %362 = vmatpush1.bf16.msra.mxu0 %v4528_v12  ;;  %v4562_v24 = vld [vmem:[#allocation5 + $0xac] ss:$16 sps:$4 sm:$0xff]   ;;  %v4565_v25 = vld [vmem:[#allocation5 + $0x80] ss:$16 sps:$4 sm:$0xff]   ;;  %v4569_v26 = vld [vmem:[#allocation5 + $0xa8] ss:$16 sps:$4 sm:$0xff]  }
  0x76   :  { %404 = vmatprep.subr.bf16.mxu1 %v4522_v10  ;;  %363 = vmatprep.subr.bf16.mxu0 %v4537_v15  ;;  %v4572_v27 = vld [vmem:[#allocation5 + $0xa4] ss:$16 sps:$4 sm:$0xff]   ;;  %v4575_v28 = vld [vmem:[#allocation5 + $0xcc] ss:$16 sps:$4 sm:$0xff]   ;;  %v4578_v29 = vld [vmem:[#allocation5 + $0xa0] ss:$16 sps:$4 sm:$0xff]  }
  0x77   :  { %v4581_v30 = vld [vmem:[#allocation5 + $0xc8] ss:$16 sps:$4 sm:$0xff]   ;;  %v4584_v31 = vld [vmem:[#allocation5 + $0xc4] ss:$16 sps:$4 sm:$0xff]   ;;  %v4587_v32 = vld [vmem:[#allocation5 + $0xec] ss:$16 sps:$4 sm:$0xff]  }
  0x78   :  { %3664 = vset.pattern.permute.xlu1 %v5396_v0  ;;  %v4589_v33 = vld [vmem:[#allocation5 + $0xe8] ss:$16 sps:$4 sm:$0xff]   ;;  %v4591_v34 = vld [vmem:[#allocation5 + $0xc0] ss:$16 sps:$4 sm:$0xff]   ;;  %v4594_v35 = vld [vmem:[#allocation2 + $0x4] ss:$16 sps:$4 sm:$0xff]  }
  0x79   :  { %405 = vmatpush1.bf16.msra.mxu1 %v4531_v13  ;;  %364 = vmatpush1.bf16.msra.mxu0 %v4540_v16  ;;  %v4596_v36 = vld [vmem:[#allocation5 + $0xe4] ss:$16 sps:$4 sm:$0xff]   ;;  %v4601_v37 = vld [vmem:[#allocation5 + $0xe0] ss:$16 sps:$4 sm:$0xff]   ;;  %v4615_v41 = vld [vmem:[#allocation2 + $0xc] ss:$16 sps:$4 sm:$0xff]  }
  0x7a   :  { %406 = vmatprep.subr.bf16.mxu1 %v4535_v14  ;;  %365 = vmatprep.subr.bf16.mxu0 %v4546_v18  ;;  %v4603_v38 = vld [vmem:[#allocation2] ss:$16 sps:$4 sm:$0xff]   ;;  %v4606_v39 = vld [vmem:[#allocation2 + $0x24] ss:$16 sps:$4 sm:$0xff]   ;;  %v4641_v43 = vand.u32 127, %v129_v42  ;;  %v5394_v45 = vmov 0.0  }
  0x7b   :  { %v4611_v40 = vld [vmem:[#allocation2 + $0x20] ss:$16 sps:$4 sm:$0xff]   ;;  %vm481_vm2 = vcmask 261120   ;;  %v4645_v47 = vld [vmem:[#allocation2 + $0x8] ss:$16 sps:$4 sm:$0xff]   ;;  %vm791_vm3 = vcmp.gt.s32.totalorder %v4502_v2, 1 }
  0x7c   :  { %v4647_v49 = vld [vmem:[#allocation2 + $0x2c] ss:$16 sps:$4 sm:$0xff]   ;;  %v4651_v50 = vld [vmem:[#allocation2 + $0x28] ss:$16 sps:$4 sm:$0xff]   ;;  %vm991_vm4 = vcmp.gt.s32.totalorder %v4502_v2, 2  ;;  %v792_v55 = vsel %vm791_vm3, 1, %v5396_v0 }
  0x7d   :  { %407 = vmatpush1.bf16.msra.mxu1 %v4543_v17  ;;  %366 = vmatpush1.bf16.msra.mxu0 %v4552_v21  ;;  %v4322_v56 = vmov 2   ;;  %v992_v57 = vsel %vm991_vm4, 1, %v5396_v0  ;;  %vm1920_vm4 = vcmask 1043456  }
  0x7e   :  { %408 = vmatprep.subr.bf16.mxu1 %v4549_v19  ;;  %367 = vmatprep.subr.bf16.mxu0 %v4559_v23 }
  0x7f   :  { %3665 = vset.pattern.permute.xlu0 %v4322_v56  ;;  %794 = vperm.xlu1 %3664, %v792_v55  }
  0x80   :  { %144 = vperm.xlu0 %3665, %v4497_v1  }
  0x81   :  { %409 = vmatpush1.bf16.msra.mxu1 %v4556_v22  ;;  %368 = vmatpush1.bf16.msra.mxu0 %v4565_v25 }
  0x82   :  { %410 = vmatprep.subr.bf16.mxu1 %v4562_v24  ;;  %369 = vmatprep.subr.bf16.mxu0 %v4572_v27 }
  0x83   :  { %994 = vperm.xlu1 %3664, %v992_v57  }
  0x84   :  { %3667 = vset.pattern.permute.xlu0 %v5396_v0 }
  0x85   :  { %411 = vmatpush1.bf16.msra.mxu1 %v4569_v26  ;;  %370 = vmatpush1.bf16.msra.mxu0 %v4578_v29 }
  0x86   :  { %412 = vmatprep.subr.bf16.mxu1 %v4575_v28  ;;  %371 = vmatprep.subr.bf16.mxu0 %v4584_v31 }
  0x89   :  { %413 = vmatpush1.bf16.msra.mxu1 %v4581_v30  ;;  %372 = vmatpush1.bf16.msra.mxu0 %v4591_v34 }
  0x8a   :  { %414 = vmatprep.subr.bf16.mxu1 %v4587_v32  ;;  %373 = vmatprep.subr.bf16.mxu0 %v4596_v36 }
  0x8d   :  { %415 = vmatpush1.bf16.msra.mxu1 %v4589_v33  ;;  %374 = vmatpush1.bf16.msra.mxu0 %v4601_v37 }
  0x8e   :  { %485 = vmatprep.subr.bf16.mxu1 %v4594_v35  ;;  %600 = vmatprep.subr.bf16.mxu0 %v4517_v8 }
  0x90   :  { %433 = vmatmul.mubr.bf16.vlgmr.msra.gmra.mrb[0].mxu1 %v5396_v0  ;;  %392 = vmatmul.mubr.bf16.vlgmr.msra.gmra.mrb[0].mxu0 %v5396_v0 }
  0x91   :  { %486 = vmatpush1.bf16.msra.mxu1 %v4603_v38  ;;  %517 = vmatprep.mubr.bf16.mxu1 %v5396_v0 }
  0x92   :  { %487 = vmatprep.subr.bf16.mxu1 %v4606_v39  ;;  %601 = vmatpush1.bf16.msra.mxu0 %v4519_v9 }
  0x93   :  { %632 = vmatprep.mubr.bf16.mxu0 %v5396_v0  ;;  %602 = vmatprep.subr.bf16.mxu0 %v4525_v11 }
  0x95   :  { %488 = vmatpush1.bf16.msra.mxu1 %v4611_v40 }
  0x96   :  { %526 = vmatprep.subr.bf16.mxu1 %v4615_v41  ;;  %603 = vmatpush1.bf16.msra.mxu0 %v4528_v12 }
  0x97   :  { %604 = vmatprep.subr.bf16.mxu0 %v4537_v15 }
  0x9a   :  { %605 = vmatpush1.bf16.msra.mxu0 %v4540_v16 }
  0x9b   :  { %606 = vmatprep.subr.bf16.mxu0 %v4546_v18 }
  0x9e   :  { %607 = vmatpush1.bf16.msra.mxu0 %v4552_v21 }
  0x9f   :  { %608 = vmatprep.subr.bf16.mxu0 %v4559_v23 }
  0xa2   :  { %609 = vmatpush1.bf16.msra.mxu0 %v4565_v25 }
  0xa3   :  { %610 = vmatprep.subr.bf16.mxu0 %v4572_v27 }
  0xa6   :  { %611 = vmatpush1.bf16.msra.mxu0 %v4578_v29 }
  0xa7   :  { %612 = vmatprep.subr.bf16.mxu0 %v4584_v31 }
  0xaa   :  { %613 = vmatpush1.bf16.msra.mxu0 %v4591_v34 }
  0xab   :  { %614 = vmatprep.subr.bf16.mxu0 %v4596_v36 }
  0xae   :  { %615 = vmatpush1.bf16.msra.mxu0 %v4601_v37 }
  0xaf   :  { %800 = vmatprep.subr.bf16.mxu0 %v4517_v8 }
  0xee   :  { %v133_v44 = vpop.permute.xlu0 %132 }
  0xef   :  { %vm134_vm1 = vcmp.eq.s32.totalorder %v133_v44, %v4641_v43 }
  0xf0   :  { %v135_v46 = vsel %vm134_vm1, 1.0, %v5394_v45 }
  0xf1   :  { %v136_v48 = vpack.c.bf16 %v135_v46, %v135_v46 }
  0xf3   :  { %3417 = vmatmul.mubr.msk.bf16.vlgmr.msra.gmra.mrb[4].mxu1 %vm481_vm2, %v136_v48 }
  0xf4   :  { %527 = vmatpush1.bf16.msra.mxu1 %v4645_v47  ;;  %558 = vmatprep.mubr.bf16.mxu1 %v5396_v0 }
  0xf5   :  { %528 = vmatprep.subr.bf16.mxu1 %v4647_v49 }
  0xf8   :  { %529 = vmatpush1.bf16.msra.mxu1 %v4651_v50 }
  0xf9   :  { %641 = vmatprep.subr.bf16.mxu1 %v4506_v3 }
  0xfb   :  { %3418 = vmatmul.mubr.msk.bf16.vlgmr.msra.gmra.mrb[0].mxu1 %vm481_vm2, %v136_v48 }
  0xfc   :  { %642 = vmatpush1.bf16.msra.mxu1 %v4508_v4  ;;  %673 = vmatprep.mubr.bf16.mxu1 %v5396_v0 }
  0xfd   :  { %643 = vmatprep.subr.bf16.mxu1 %v4511_v6 }
 0x100   :  { %644 = vmatpush1.bf16.msra.mxu1 %v4514_v7 }
 0x101   :  { %645 = vmatprep.subr.bf16.mxu1 %v4522_v10 }
 0x104   :  { %646 = vmatpush1.bf16.msra.mxu1 %v4531_v13 }
 0x105   :  { %647 = vmatprep.subr.bf16.mxu1 %v4535_v14 }
 0x108   :  { %648 = vmatpush1.bf16.msra.mxu1 %v4543_v17 }
 0x109   :  { %649 = vmatprep.subr.bf16.mxu1 %v4549_v19 }
 0x10c   :  { %650 = vmatpush1.bf16.msra.mxu1 %v4556_v22 }
 0x10d   :  { %651 = vmatprep.subr.bf16.mxu1 %v4562_v24 }
 0x110   :  { %652 = vmatpush1.bf16.msra.mxu1 %v4569_v26 }
 0x111   :  { %653 = vmatprep.subr.bf16.mxu1 %v4575_v28 }
 0x114   :  { %654 = vmatpush1.bf16.msra.mxu1 %v4581_v30 }
 0x115   :  { %655 = vmatprep.subr.bf16.mxu1 %v4587_v32 }
 0x118   :  { %656 = vmatpush1.bf16.msra.mxu1 %v4589_v33 }
 0x119   :  { %685 = vmatprep.subr.bf16.mxu1 %v4594_v35 }
 0x163   :  { %v393_v51 = vpop.f32.mrb[0].mxu0 }
 0x164   :  { %v395_v52 = vpop.f32.mrb[1].mxu0 }
 0x165   :  { %v397_v53 = vpop.f32.mrb[2].mxu0 }
 0x166   :  { %v398_v54 = vpop.f32.mrb[3].mxu0 }
 0x1c6   :  { %v519_v58 = vpop.f32.mrb[4].mxu1 }
 0x1c7   :  { %v520_v59 = vadd.f32 %v519_v58, %v393_v51  ;;  %v521_v60 = vpop.f32.mrb[5].mxu1 }
 0x1c8   :  { %v522_v61 = vadd.f32 %v521_v60, %v395_v52  ;;  %v523_v62 = vpop.f32.mrb[6].mxu1 }
 0x1c9   :  { %v3419_v63 = vmul.f32 -1.442695, %v520_v59  ;;  %v524_v5 = vpop.f32.mrb[7].mxu1 }
 0x1ca   :  { %v3420_v20 = vmul.f32 -1.442695, %v522_v61  ;;  %v4684_v5 = vpop.permute.xlu0 %594 }
 0x1cb   :  { %3846 = vpow2.f32 %v3419_v63  ;;  %vm596_vm5 = vcmp.eq.s32.totalorder %v4684_v5, 1  ;;  %v5402_v5 = vmov 0  }
 0x1cc   :  { %3848 = vpow2.f32 %v3420_v20  ;;  %vm3422_vm7 = vmpackc.low %vm596_vm5, %vm596_vm5 }
 0x1ce   :  { %v560_v42 = vpop.f32.mrb[0].mxu1 }
 0x1cf   :  { %v562_v44 = vpop.f32.mrb[1].mxu1 }
 0x1d0   :  { %v564_v46 = vpop.f32.mrb[2].mxu1  ;;  %v3421_v53 = vmul.f32 -1.442695, %v562_v44 }
 0x1d1   :  { %v565_v48 = vpop.f32.mrb[3].mxu1  ;;  %v139_v46 = vpop.permute.xlu1 %138 }
 0x1d2   :  { %3850 = vpow2.f32 %v3421_v53  ;;  %vm140_vm6 = vcmp.eq.s32.totalorder %v139_v46, %v4641_v43 }
 0x1d3   :  { %3852 = vtanh.f32 %v560_v42  ;;  %v141_v53 = vsel %vm140_vm6, 1.0, %v5394_v45  ;;  %vm1916_vm6 = vcmask 195584  }
 0x1d5   :  { %v3847_v54 = vpop.eup %3846 }
 0x1d6   :  { %v3849_v55 = vpop.eup %3848  ;;  %v570_v56 = vadd.f32 1.0, %v3847_v54  ;;  %v142_v54 = vpack.c.bf16 %v141_v53, %v141_v53 }
 0x1d7   :  { %v576_v57 = vadd.f32 1.0, %v3849_v55  ;;  %v4323_v55 = vmov 3  }
 0x1d8   :  { %3854 = vrcp.f32 %v570_v56  ;;  %3666 = vset.pattern.permute.xlu1 %v4323_v55 }
 0x1d9   :  { %3856 = vrcp.f32 %v576_v57  ;;  %150 = vperm.xlu1 %3666, %v4497_v1  }
 0x1dc   :  { %v3851_v51 = vpop.eup %3850 }
 0x1dd   :  { %v3853_v52 = vpop.eup %3852  ;;  %v583_v61 = vadd.f32 1.0, %v3851_v51 }
 0x1df   :  { %3858 = vrcp.f32 %v583_v61 }
 0x1e2   :  { %v3855_v58 = vpop.eup %3854 }
 0x1e3   :  { %v3857_v59 = vpop.eup %3856  ;;  %v587_v60 = vmul.f32 %v3855_v58, %v3853_v52 }
 0x1e4   :  { %v586_v62 = vmul.f32 0.0, %v3857_v59 }
 0x1e6   :  { %v4681_v63 = vadd.f32 %v587_v60, %v586_v62 }
 0x1e8   :  { %3860 = vtanh.f32 %v4681_v63 }
 0x1e9   :  { %v3859_v20 = vpop.eup %3858 }
 0x1f2   :  { %v3861_v44 = vpop.eup %3860 }
 0x1f3   :  { %v4687_v42 = vmul.f32 %v3861_v44, %v3859_v20 }
 0x1f5   :  { %v3423_v48 = vpack.c.bf16 %v4687_v42, %v4687_v42 }
 0x1f7   :  { %3424 = vmatmul.mubr.msk.bf16.vlgmr.msra.gmra.mrb[4].mxu0 %vm3422_vm7, %v3423_v48  ;;  %3427 = vmatmul.mubr.msk.bf16.vlgmr.msra.gmra.mrb[8].mxu1 %vm3422_vm7, %v3423_v48  ;;  %vm3222_vm7 = vcmask 1040384  }
 0x1f8   :  { %686 = vmatpush1.bf16.msra.mxu1 %v4603_v38  ;;  %717 = vmatprep.mubr.bf16.mxu1 %v5396_v0 }
 0x1f9   :  { %687 = vmatprep.subr.bf16.mxu1 %v4606_v39  ;;  %801 = vmatpush1.bf16.msra.mxu0 %v4519_v9 }
 0x1fa   :  { %802 = vmatprep.subr.bf16.mxu0 %v4525_v11  ;;  %832 = vmatprep.mubr.bf16.mxu0 %v5396_v0 }
 0x1fc   :  { %688 = vmatpush1.bf16.msra.mxu1 %v4611_v40 }
 0x1fd   :  { %726 = vmatprep.subr.bf16.mxu1 %v4615_v41  ;;  %803 = vmatpush1.bf16.msra.mxu0 %v4528_v12 }
 0x1fe   :  { %804 = vmatprep.subr.bf16.mxu0 %v4537_v15 }
 0x1ff   :  { %3428 = vmatmul.mubr.msk.bf16.vlgmr.msra.gmra.mrb[12].mxu1 %vm481_vm2, %v142_v54 }
 0x200   :  { %727 = vmatpush1.bf16.msra.mxu1 %v4645_v47  ;;  %758 = vmatprep.mubr.bf16.mxu1 %v5396_v0 }
 0x201   :  { %728 = vmatprep.subr.bf16.mxu1 %v4647_v49  ;;  %805 = vmatpush1.bf16.msra.mxu0 %v4540_v16 }
 0x202   :  { %806 = vmatprep.subr.bf16.mxu0 %v4546_v18 }
 0x204   :  { %729 = vmatpush1.bf16.msra.mxu1 %v4651_v50 }
 0x205   :  { %841 = vmatprep.subr.bf16.mxu1 %v4506_v3  ;;  %807 = vmatpush1.bf16.msra.mxu0 %v4552_v21 }
 0x206   :  { %808 = vmatprep.subr.bf16.mxu0 %v4559_v23 }
 0x207   :  { %3429 = vmatmul.mubr.msk.bf16.vlgmr.msra.gmra.mrb[8].mxu1 %vm481_vm2, %v142_v54 }
 0x208   :  { %842 = vmatpush1.bf16.msra.mxu1 %v4508_v4  ;;  %873 = vmatprep.mubr.bf16.mxu1 %v5396_v0 }
 0x209   :  { %843 = vmatprep.subr.bf16.mxu1 %v4511_v6  ;;  %809 = vmatpush1.bf16.msra.mxu0 %v4565_v25 }
 0x20a   :  { %810 = vmatprep.subr.bf16.mxu0 %v4572_v27 }
 0x20c   :  { %844 = vmatpush1.bf16.msra.mxu1 %v4514_v7 }
 0x20d   :  { %845 = vmatprep.subr.bf16.mxu1 %v4522_v10  ;;  %811 = vmatpush1.bf16.msra.mxu0 %v4578_v29 }
 0x20e   :  { %812 = vmatprep.subr.bf16.mxu0 %v4584_v31 }
 0x210   :  { %846 = vmatpush1.bf16.msra.mxu1 %v4531_v13 }
 0x211   :  { %847 = vmatprep.subr.bf16.mxu1 %v4535_v14  ;;  %813 = vmatpush1.bf16.msra.mxu0 %v4591_v34 }
 0x212   :  { %814 = vmatprep.subr.bf16.mxu0 %v4596_v36 }
 0x214   :  { %848 = vmatpush1.bf16.msra.mxu1 %v4543_v17 }
 0x215   :  { %849 = vmatprep.subr.bf16.mxu1 %v4549_v19  ;;  %815 = vmatpush1.bf16.msra.mxu0 %v4601_v37 }
 0x216   :  { %885 = vmatprep.subr.bf16.mxu0 %v4594_v35 }
 0x218   :  { %850 = vmatpush1.bf16.msra.mxu1 %v4556_v22 }
 0x219   :  { %851 = vmatprep.subr.bf16.mxu1 %v4562_v24 }
 0x21c   :  { %852 = vmatpush1.bf16.msra.mxu1 %v4569_v26 }
 0x21d   :  { %853 = vmatprep.subr.bf16.mxu1 %v4575_v28 }
 0x220   :  { %854 = vmatpush1.bf16.msra.mxu1 %v4581_v30 }
 0x221   :  { %855 = vmatprep.subr.bf16.mxu1 %v4587_v32 }
 0x224   :  { %856 = vmatpush1.bf16.msra.mxu1 %v4589_v33 }
 0x225   :  { %926 = vmatprep.subr.bf16.mxu1 %v4615_v41 }
 0x2ca   :  { %v634_v56 = vpop.f32.mrb[4].mxu0 }
 0x2cb   :  { %v636_v57 = vpop.f32.mrb[5].mxu0 }
 0x2cc   :  { %v638_v51 = vpop.f32.mrb[6].mxu0 }
 0x2cd   :  { %v639_v52 = vpop.f32.mrb[7].mxu0 }
 0x2d2   :  { %v719_v58 = vpop.f32.mrb[12].mxu1 }
 0x2d3   :  { %v720_v59 = vadd.f32 %v719_v58, %v634_v56  ;;  %v721_v60 = vpop.f32.mrb[13].mxu1  ;;  %v795_v58 = vpop.permute.xlu1 %794 }
 0x2d4   :  { %v722_v61 = vadd.f32 %v721_v60, %v636_v57  ;;  %v723_v62 = vpop.f32.mrb[14].mxu1  ;;  %vm796_vm8 = vcmp.eq.s32.totalorder %v795_v58, 1 }
 0x2d5   :  { %v3430_v20 = vmul.f32 -1.442695, %v720_v59  ;;  %v724_v44 = vpop.f32.mrb[15].mxu1 }
 0x2d6   :  { %v3431_v46 = vmul.f32 -1.442695, %v722_v61  ;;  %v598_v61 = vsel %vm596_vm5, %v4681_v63, 0.0 }
 0x2d7   :  { %3862 = vpow2.f32 %v3430_v20 }
 0x2d8   :  { %3864 = vpow2.f32 %v3431_v46  ;;  %v597_v46 = vsel %vm596_vm5, %v4687_v42, 0.0  ;;  %v5403_v42 = vmov 0.0  }
 0x2da   :  { %v760_v48 = vpop.f32.mrb[8].mxu1 }
 0x2db   :  { %v762_v53 = vpop.f32.mrb[9].mxu1 }
 0x2dc   :  { %v764_v54 = vpop.f32.mrb[10].mxu1  ;;  %v3432_v45 = vmul.f32 -1.442695, %v762_v53  ;;  %v145_v53 = vpop.permute.xlu0 %144 }
 0x2dd   :  { %v765_v55 = vpop.f32.mrb[11].mxu1  ;;  %vm146_vm9 = vcmp.eq.s32.totalorder %v145_v53, %v4641_v43 }
 0x2de   :  { %3866 = vpow2.f32 %v3432_v45  ;;  %v147_v54 = vsel %vm146_vm9, 1.0, %v5403_v42  ;;  %vm3226_vm9 = vcmask 1042432  }
 0x2df   :  { %3868 = vtanh.f32 %v760_v48  ;;  %v148_v55 = vpack.c.bf16 %v147_v54, %v147_v54 }
 0x2e1   :  { %v3863_v0 = vpop.eup %3862 }
 0x2e2   :  { %v3865_v1 = vpop.eup %3864  ;;  %v770_v2 = vadd.f32 1.0, %v3863_v0 }
 0x2e3   :  { %v776_v51 = vadd.f32 1.0, %v3865_v1 }
 0x2e4   :  { %3870 = vrcp.f32 %v770_v2 }
 0x2e5   :  { %3872 = vrcp.f32 %v776_v51 }
 0x2e8   :  { %v3867_v56 = vpop.eup %3866 }
 0x2e9   :  { %v3869_v57 = vpop.eup %3868  ;;  %v783_v60 = vadd.f32 1.0, %v3867_v56 }
 0x2eb   :  { %3874 = vrcp.f32 %v783_v60 }
 0x2ee   :  { %v3871_v52 = vpop.eup %3870 }
 0x2ef   :  { %v3873_v59 = vpop.eup %3872  ;;  %v787_v62 = vmul.f32 %v3871_v52, %v3869_v57 }
 0x2f0   :  { %v786_v20 = vmul.f32 %v3873_v59, %v598_v61 }
 0x2f2   :  { %v788_v44 = vadd.f32 %v787_v62, %v786_v20 }
 0x2f4   :  { %3876 = vtanh.f32 %v788_v44  ;;  %v4746_v0 = vsel %vm796_vm8, %v788_v44, %v598_v61 }
 0x2f5   :  { %v3875_v1 = vpop.eup %3874 }
 0x2fe   :  { %v3877_v2 = vpop.eup %3876 }
 0x2ff   :  { %v790_v45 = vmul.f32 %v3877_v2, %v3875_v1 }
 0x301   :  { %v4751_v48 = vsel %vm796_vm8, %v790_v45, %v597_v46  ;;  %vm3224_vm8 = vcmask 1041408  }
 0x302   :  { %v799_v63 = vpack.c.bf16 %v4751_v48, %v4751_v48 }
 0x304   :  { %833 = vmatmul.mubr.bf16.vlgmr.msra.gmra.mrb[8].mxu0 %v799_v63  ;;  %874 = vmatmul.mubr.bf16.vlgmr.msra.gmra.mrb[16].mxu1 %v799_v63  ;;  %v995_v63 = vpop.permute.xlu1 %994 }
 0x305   :  { %886 = vmatpush1.bf16.msra.mxu0 %v4603_v38  ;;  %927 = vmatpush1.bf16.msra.mxu1 %v4645_v47  ;;  %vm996_vm11 = vcmp.eq.s32.totalorder %v995_v63, 1 }
 0x306   :  { %887 = vmatprep.subr.bf16.mxu0 %v4606_v39  ;;  %928 = vmatprep.subr.bf16.mxu1 %v4647_v49 }
 0x307   :  { %917 = vmatprep.mubr.bf16.mxu0 %v5402_v5  ;;  %958 = vmatprep.mubr.bf16.mxu1 %v5402_v5 }
 0x309   :  { %888 = vmatpush1.bf16.msra.mxu0 %v4611_v40  ;;  %929 = vmatpush1.bf16.msra.mxu1 %v4651_v50 }
 0x30a   :  { %1000 = vmatprep.subr.bf16.mxu0 %v4517_v8  ;;  %1041 = vmatprep.subr.bf16.mxu1 %v4506_v3  ;;  %v5404_v3 = vld [vmem:[#allocation20_spill] sm:$0xff] }
 0x30b   :  { %vm1191_vm10 = vcmp.gt.s32.totalorder %v5404_v3, 3 }
 0x310   :  { %3433 = vmatmul.mubr.msk.bf16.vlgmr.msra.gmra.mrb[8].mxu0 %vm481_vm2, %v148_v55  ;;  %3434 = vmatmul.mubr.msk.bf16.vlgmr.msra.gmra.mrb[16].mxu1 %vm481_vm2, %v148_v55 }
 0x311   :  { %1001 = vmatpush1.bf16.msra.mxu0 %v4519_v9  ;;  %1042 = vmatpush1.bf16.msra.mxu1 %v4508_v4  ;;  %v1192_v4 = vsel %vm1191_vm10, 1, %v5402_v5  ;;  %vm3229_vm10 = vcmask 1044480  }
 0x312   :  { %1002 = vmatprep.subr.bf16.mxu0 %v4525_v11  ;;  %1043 = vmatprep.subr.bf16.mxu1 %v4511_v6  ;;  %v4324_v6 = vmov 4  }
 0x313   :  { %1032 = vmatprep.mubr.bf16.mxu0 %v5402_v5  ;;  %1073 = vmatprep.mubr.bf16.mxu1 %v5402_v5 }
 0x314   :  { %3668 = vset.pattern.permute.xlu1 %v4324_v6  ;;  %1194 = vperm.xlu0 %3667, %v1192_v4  }
 0x315   :  { %1003 = vmatpush1.bf16.msra.mxu0 %v4528_v12  ;;  %1044 = vmatpush1.bf16.msra.mxu1 %v4514_v7  ;;  %v5405_v7 = vld [vmem:[#allocation19_spill] sm:$0xff] }
 0x316   :  { %1004 = vmatprep.subr.bf16.mxu0 %v4537_v15  ;;  %1045 = vmatprep.subr.bf16.mxu1 %v4522_v10 }
 0x317   :  { %156 = vperm.xlu1 %3668, %v5405_v7  }
 0x319   :  { %1005 = vmatpush1.bf16.msra.mxu0 %v4540_v16  ;;  %1046 = vmatpush1.bf16.msra.mxu1 %v4531_v13 }
 0x31a   :  { %1006 = vmatprep.subr.bf16.mxu0 %v4546_v18  ;;  %1047 = vmatprep.subr.bf16.mxu1 %v4535_v14 }
 0x31b   :  { %3669 = vset.pattern.permute.xlu1 %v5402_v5 }
 0x31d   :  { %1007 = vmatpush1.bf16.msra.mxu0 %v4552_v21  ;;  %1048 = vmatpush1.bf16.msra.mxu1 %v4543_v17 }
 0x31e   :  { %1008 = vmatprep.subr.bf16.mxu0 %v4559_v23  ;;  %1049 = vmatprep.subr.bf16.mxu1 %v4549_v19 }
 0x321   :  { %1009 = vmatpush1.bf16.msra.mxu0 %v4565_v25  ;;  %1050 = vmatpush1.bf16.msra.mxu1 %v4556_v22 }
 0x322   :  { %1010 = vmatprep.subr.bf16.mxu0 %v4572_v27  ;;  %1051 = vmatprep.subr.bf16.mxu1 %v4562_v24 }
 0x325   :  { %1011 = vmatpush1.bf16.msra.mxu0 %v4578_v29  ;;  %1052 = vmatpush1.bf16.msra.mxu1 %v4569_v26 }
 0x326   :  { %1012 = vmatprep.subr.bf16.mxu0 %v4584_v31  ;;  %1053 = vmatprep.subr.bf16.mxu1 %v4575_v28 }
 0x329   :  { %1013 = vmatpush1.bf16.msra.mxu0 %v4591_v34  ;;  %1054 = vmatpush1.bf16.msra.mxu1 %v4581_v30 }
 0x32a   :  { %1014 = vmatprep.subr.bf16.mxu0 %v4596_v36  ;;  %1055 = vmatprep.subr.bf16.mxu1 %v4587_v32 }
 0x32d   :  { %1015 = vmatpush1.bf16.msra.mxu0 %v4601_v37  ;;  %1056 = vmatpush1.bf16.msra.mxu1 %v4589_v33 }
 0x32e   :  { %1085 = vmatprep.subr.bf16.mxu0 %v4594_v35  ;;  %1126 = vmatprep.subr.bf16.mxu1 %v4615_v41 }
 0x3e3   :  { %v919_v8 = vpop.f32.mrb[8].mxu0  ;;  %v960_v9 = vpop.f32.mrb[16].mxu1 }
 0x3e4   :  { %v3435_v10 = vmul.f32 -1.442695, %v919_v8  ;;  %v921_v12 = vpop.f32.mrb[9].mxu0  ;;  %v962_v13 = vpop.f32.mrb[17].mxu1 }
 0x3e5   :  { %v3436_v14 = vmul.f32 -1.442695, %v921_v12  ;;  %v923_v51 = vpop.f32.mrb[10].mxu0  ;;  %v964_v56 = vpop.f32.mrb[18].mxu1  ;;  %v3437_v58 = vmul.f32 -1.442695, %v962_v13 }
 0x3e6   :  { %3878 = vpow2.f32 %v3435_v10  ;;  %v924_v57 = vpop.f32.mrb[11].mxu0  ;;  %v965_v52 = vpop.f32.mrb[19].mxu1  ;;  %v4829_v10 = vld [vmem:[#allocation5 + $0xc] ss:$16 sps:$4 sm:$0xff]   ;;  %v4834_v13 = vld [vmem:[#allocation5] ss:$16 sps:$4 sm:$0xff]  }
 0x3e7   :  { %3880 = vpow2.f32 %v3436_v14  ;;  %v4837_v14 = vld [vmem:[#allocation5 + $0x8] ss:$16 sps:$4 sm:$0xff]   ;;  %v4841_v51 = vld [vmem:[#allocation5 + $0x2c] ss:$16 sps:$4 sm:$0xff]   ;;  %v4846_v56 = vld [vmem:[#allocation5 + $0x20] ss:$16 sps:$4 sm:$0xff]  }
 0x3e8   :  { %3882 = vpow2.f32 %v3437_v58  ;;  %v4849_v57 = vld [vmem:[#allocation5 + $0x28] ss:$16 sps:$4 sm:$0xff]   ;;  %v4853_v52 = vld [vmem:[#allocation5 + $0x4c] ss:$16 sps:$4 sm:$0xff]  }
 0x3e9   :  { %3884 = vtanh.f32 %v960_v9  ;;  %v151_v9 = vpop.permute.xlu1 %150  ;;  %v4861_v58 = vld [vmem:[#allocation5 + $0x6c] ss:$16 sps:$4 sm:$0xff]  }
 0x3ea   :  { %vm152_vm12 = vcmp.eq.s32.totalorder %v151_v9, %v4641_v43  ;;  %v4092_v9 = vld [vmem:[#allocation5 + $0x84] ss:$16 sps:$4 sm:$0xff]  }
 0x3f0   :  { %v3879_v59 = vpop.eup %3878 }
 0x3f1   :  { %v3881_v60 = vpop.eup %3880  ;;  %v970_v61 = vadd.f32 1.0, %v3879_v59 }
 0x3f2   :  { %v976_v62 = vadd.f32 1.0, %v3881_v60  ;;  %v3883_v20 = vpop.eup %3882  ;;  %v1195_v60 = vpop.permute.xlu0 %1194 }
 0x3f3   :  { %3886 = vrcp.f32 %v970_v61  ;;  %v3885_v44 = vpop.eup %3884  ;;  %v983_v46 = vadd.f32 1.0, %v3883_v20  ;;  %vm1196_vm15 = vcmp.eq.s32.totalorder %v1195_v60, 1 }
 0x3f4   :  { %3888 = vrcp.f32 %v976_v62 }
 0x3f5   :  { %3890 = vrcp.f32 %v983_v46 }
 0x3fd   :  { %v3887_v1 = vpop.eup %3886 }
 0x3fe   :  { %v3889_v2 = vpop.eup %3888  ;;  %v987_v45 = vmul.f32 %v3887_v1, %v3885_v44 }
 0x3ff   :  { %v986_v53 = vmul.f32 %v3889_v2, %v4746_v0  ;;  %v3891_v3 = vpop.eup %3890 }
 0x401   :  { %v988_v54 = vadd.f32 %v987_v45, %v986_v53 }
 0x403   :  { %3892 = vtanh.f32 %v988_v54  ;;  %v4809_v55 = vsel %vm996_vm11, %v988_v54, %v4746_v0  ;;  %v153_v0 = vsel %vm152_vm12, 1.0, %v5403_v42  ;;  %vm4326_vm12 = vmmov 0  }
 0x404   :  { %v154_v12 = vpack.c.bf16 %v153_v0, %v153_v0  ;;  %v4093_v0 = vld [vmem:[#allocation5 + $0x8c] ss:$16 sps:$4 sm:$0xff]  }
 0x40d   :  { %v3893_v4 = vpop.eup %3892 }
 0x40e   :  { %v990_v6 = vmul.f32 %v3893_v4, %v3891_v3  ;;  %v157_v3 = vpop.permute.xlu1 %156  ;;  %v4088_v4 = vld [vmem:[#allocation5 + $0x40] ss:$16 sps:$4 sm:$0xff]  }
 0x40f   :  { %vm158_vm0 = vcmp.eq.s32.totalorder %v157_v3, %v4641_v43 }
 0x410   :  { %v4812_v7 = vsel %vm996_vm11, %v990_v6, %v4751_v48  ;;  %v4826_v48 = vld [vmem:[#allocation5 + $0x4] ss:$16 sps:$4 sm:$0xff]   ;;  %vm3231_vm11 = vcmask 1045504  }
 0x411   :  { %v999_v8 = vpack.c.bf16 %v4812_v7, %v4812_v7  ;;  %v4089_v6 = vld [vmem:[#allocation5 + $0x64] ss:$16 sps:$4 sm:$0xff]  }
 0x413   :  { %1033 = vmatmul.mubr.bf16.vlgmr.msra.gmra.mrb[12].mxu0 %v999_v8  ;;  %1074 = vmatmul.mubr.bf16.vlgmr.msra.gmra.mrb[20].mxu1 %v999_v8  ;;  %v4091_v8 = vld [vmem:[#allocation5 + $0x68] ss:$16 sps:$4 sm:$0xff]  }
 0x414   :  { %1086 = vmatpush1.bf16.msra.mxu0 %v4603_v38  ;;  %1127 = vmatpush1.bf16.msra.mxu1 %v4645_v47 }
 0x415   :  { %1087 = vmatprep.subr.bf16.mxu0 %v4606_v39  ;;  %1128 = vmatprep.subr.bf16.mxu1 %v4647_v49 }
 0x416   :  { %1117 = vmatprep.mubr.bf16.mxu0 %v5402_v5  ;;  %1158 = vmatprep.mubr.bf16.mxu1 %v5402_v5 }
 0x418   :  { %1088 = vmatpush1.bf16.msra.mxu0 %v4611_v40  ;;  %1129 = vmatpush1.bf16.msra.mxu1 %v4651_v50 }
 0x419   :  { %1200 = vmatprep.subr.bf16.mxu0 %v4826_v48  ;;  %1241 = vmatprep.subr.bf16.mxu1 %v4829_v10 }
 0x41f   :  { %3438 = vmatmul.mubr.msk.bf16.vlgmr.msra.gmra.mrb[12].mxu0 %vm481_vm2, %v154_v12  ;;  %3439 = vmatmul.mubr.msk.bf16.vlgmr.msra.gmra.mrb[20].mxu1 %vm481_vm2, %v154_v12  ;;  %v4096_v12 = vld [vmem:[#allocation5 + $0xa4] ss:$16 sps:$4 sm:$0xff]  }
 0x420   :  { %1201 = vmatpush1.bf16.msra.mxu0 %v4834_v13  ;;  %1242 = vmatpush1.bf16.msra.mxu1 %v4837_v14 }
 0x421   :  { %1202 = vmatprep.subr.bf16.mxu0 %v4525_v11  ;;  %1243 = vmatprep.subr.bf16.mxu1 %v4841_v51  ;;  %v4857_v11 = vld [vmem:[#allocation5 + $0x48] ss:$16 sps:$4 sm:$0xff]  }
 0x422   :  { %1232 = vmatprep.mubr.bf16.mxu0 %v5402_v5  ;;  %1273 = vmatprep.mubr.bf16.mxu1 %v5402_v5 }
 0x424   :  { %1203 = vmatpush1.bf16.msra.mxu0 %v4846_v56  ;;  %1244 = vmatpush1.bf16.msra.mxu1 %v4849_v57 }
 0x425   :  { %1204 = vmatprep.subr.bf16.mxu0 %v4537_v15  ;;  %1245 = vmatprep.subr.bf16.mxu1 %v4853_v52  ;;  %v4084_v15 = vld [vmem:[%s5383_s0] sm:$0xff] }
 0x426   :  { %vm1391_vm13 = vcmp.gt.s32.totalorder %v4084_v15, 4  ;;  %vm1591_vm14 = vcmp.gt.s32.totalorder %v4084_v15, 5  ;;  %v4105_v15 = vld [vmem:[#allocation5 + $0xec] ss:$16 sps:$4 sm:$0xff]  }
 0x428   :  { %1205 = vmatpush1.bf16.msra.mxu0 %v4540_v16  ;;  %1246 = vmatpush1.bf16.msra.mxu1 %v4857_v11  ;;  %v1392_v16 = vsel %vm1391_vm13, 1, %v5402_v5  ;;  %vm3233_vm13 = vcmask 1046528  }
 0x429   :  { %1206 = vmatprep.subr.bf16.mxu0 %v4546_v18  ;;  %1247 = vmatprep.subr.bf16.mxu1 %v4861_v58  ;;  %v4085_v18 = vld [vmem:[%s5384_s1] sm:$0xff] }
 0x42a   :  { %1394 = vperm.xlu1 %3669, %v1392_v16   ;;  %v4106_v16 = vld [vmem:[#allocation5 + $0xe0] ss:$16 sps:$4 sm:$0xff]  }
 0x42c   :  { %1207 = vmatpush1.bf16.msra.mxu0 %v4552_v21  ;;  %1248 = vmatpush1.bf16.msra.mxu1 %v4543_v17  ;;  %v4325_v17 = vmov 5   ;;  %v1604_v21 = vld [vmem:[%s5385_s2] sm:$0xff]  ;;  %s4327_s2 = smov [#allocation13]  }
 0x42d   :  { %1208 = vmatprep.subr.bf16.mxu0 %v4559_v23  ;;  %1249 = vmatprep.subr.bf16.mxu1 %v4549_v19  ;;  %v1592_v19 = vsel %vm1591_vm14, 1, %v5402_v5  ;;  %s3365_s13 = sshll.u32 %s4327_s2, 4  ;;  %s3366_s13 = int_to_ptr.vmem [resolvable:$true] %s3365_s13 }
 0x42e   :  { %3670 = vset.pattern.permute.xlu0 %v4325_v17  ;;  %1594 = vperm.xlu1 %3669, %v1592_v19   ;;  %v4107_v17 = vld [vmem:[#allocation5 + $0xe8] ss:$16 sps:$4 sm:$0xff]   ;;  %v4109_v19 = vld [vmem:[#allocation2 + $0xc] ss:$16 sps:$4 sm:$0xff]   ;;  %p4282_p7 = scmp.lt.s32.totalorder %s3366_s13, %s3366_s13 }
 0x42f   :  { %162 = vperm.xlu0 %3670, %v4085_v18   ;;  %v4108_v18 = vld [vmem:[#allocation2 + $0x4] ss:$16 sps:$4 sm:$0xff]  }
 0x430   :  { %1209 = vmatpush1.bf16.msra.mxu0 %v4565_v25  ;;  %1250 = vmatpush1.bf16.msra.mxu1 %v4556_v22 }
 0x431   :  { %1210 = vmatprep.subr.bf16.mxu0 %v4572_v27  ;;  %1251 = vmatprep.subr.bf16.mxu1 %v4562_v24 }
 0x432   :  { %1606 = vperm.xlu1 %3669, %v1604_v21  }
 0x433   :  { %3671 = vset.pattern.permute.xlu0 %v5402_v5 }
 0x434   :  { %1211 = vmatpush1.bf16.msra.mxu0 %v4578_v29  ;;  %1252 = vmatpush1.bf16.msra.mxu1 %v4569_v26 }
 0x435   :  { %1212 = vmatprep.subr.bf16.mxu0 %v4584_v31  ;;  %1253 = vmatprep.subr.bf16.mxu1 %v4575_v28 }
 0x438   :  { %1213 = vmatpush1.bf16.msra.mxu0 %v4591_v34  ;;  %1254 = vmatpush1.bf16.msra.mxu1 %v4581_v30 }
 0x439   :  { %1214 = vmatprep.subr.bf16.mxu0 %v4596_v36  ;;  %1255 = vmatprep.subr.bf16.mxu1 %v4587_v32 }
 0x43c   :  { %1215 = vmatpush1.bf16.msra.mxu0 %v4601_v37  ;;  %1256 = vmatpush1.bf16.msra.mxu1 %v4589_v33 }
 0x43d   :  { %1285 = vmatprep.subr.bf16.mxu0 %v4594_v35  ;;  %1326 = vmatprep.subr.bf16.mxu1 %v4615_v41 }
 0x4f2   :  { %v1119_v22 = vpop.f32.mrb[12].mxu0  ;;  %v1160_v23 = vpop.f32.mrb[20].mxu1 }
 0x4f3   :  { %v3440_v24 = vmul.f32 -1.442695, %v1119_v22  ;;  %v1121_v25 = vpop.f32.mrb[13].mxu0  ;;  %v1162_v26 = vpop.f32.mrb[21].mxu1 }
 0x4f4   :  { %v3441_v27 = vmul.f32 -1.442695, %v1121_v25  ;;  %v1123_v28 = vpop.f32.mrb[14].mxu0  ;;  %v1164_v29 = vpop.f32.mrb[22].mxu1  ;;  %v3442_v32 = vmul.f32 -1.442695, %v1162_v26 }
 0x4f5   :  { %3894 = vpow2.f32 %v3440_v24  ;;  %v1124_v30 = vpop.f32.mrb[15].mxu0  ;;  %v1165_v31 = vpop.f32.mrb[23].mxu1 }
 0x4f6   :  { %3896 = vpow2.f32 %v3441_v27 }
 0x4f7   :  { %3898 = vpow2.f32 %v3442_v32 }
 0x4f8   :  { %3900 = vtanh.f32 %v1160_v23 }
 0x4ff   :  { %v3895_v33 = vpop.eup %3894 }
 0x500   :  { %v3897_v34 = vpop.eup %3896  ;;  %v1170_v35 = vadd.f32 1.0, %v3895_v33 }
 0x501   :  { %v1176_v36 = vadd.f32 1.0, %v3897_v34  ;;  %v3899_v37 = vpop.eup %3898 }
 0x502   :  { %3902 = vrcp.f32 %v1170_v35  ;;  %v3901_v41 = vpop.eup %3900  ;;  %v1183_v62 = vadd.f32 1.0, %v3899_v37 }
 0x503   :  { %3904 = vrcp.f32 %v1176_v36 }
 0x504   :  { %3906 = vrcp.f32 %v1183_v62 }
 0x50c   :  { %v3903_v59 = vpop.eup %3902 }
 0x50d   :  { %v3905_v61 = vpop.eup %3904  ;;  %v1187_v20 = vmul.f32 %v3903_v59, %v3901_v41  ;;  %v1395_v59 = vpop.permute.xlu1 %1394 }
 0x50e   :  { %v1186_v44 = vmul.f32 %v3905_v61, %v4809_v55  ;;  %v3907_v45 = vpop.eup %3906  ;;  %vm1396_vm1 = vcmp.eq.s32.totalorder %v1395_v59, 1 }
 0x510   :  { %v1188_v1 = vadd.f32 %v1187_v20, %v1186_v44 }
 0x512   :  { %3908 = vtanh.f32 %v1188_v1  ;;  %v4898_v2 = vsel %vm1196_vm15, %v1188_v1, %v4809_v55  ;;  %v159_v55 = vsel %vm158_vm0, 1.0, %v5403_v42 }
 0x51c   :  { %v3909_v46 = vpop.eup %3908 }
 0x51d   :  { %v1190_v63 = vmul.f32 %v3909_v46, %v3907_v45 }
 0x51f   :  { %v4901_v53 = vsel %vm1196_vm15, %v1190_v63, %v4812_v7  ;;  %v4090_v7 = vld [vmem:[#allocation5 + $0x60] ss:$16 sps:$4 sm:$0xff]  }
 0x520   :  { %v1199_v54 = vpack.c.bf16 %v4901_v53, %v4901_v53 }
 0x522   :  { %1233 = vmatmul.mubr.bf16.vlgmr.msra.gmra.mrb[16].mxu0 %v1199_v54  ;;  %1274 = vmatmul.mubr.bf16.vlgmr.msra.gmra.mrb[24].mxu1 %v1199_v54 }
 0x523   :  { %1286 = vmatpush1.bf16.msra.mxu0 %v4603_v38  ;;  %1327 = vmatpush1.bf16.msra.mxu1 %v4645_v47  ;;  %v160_v38 = vpack.c.bf16 %v159_v55, %v159_v55  ;;  %v163_v55 = vpop.permute.xlu0 %162 }
 0x524   :  { %1287 = vmatprep.subr.bf16.mxu0 %v4606_v39  ;;  %1328 = vmatprep.subr.bf16.mxu1 %v4647_v49  ;;  %v4086_v39 = vld [vmem:[#allocation5 + $0x24] ss:$16 sps:$4 sm:$0xff]   ;;  %vm164_vm3 = vcmp.eq.s32.totalorder %v163_v55, %v4641_v43 }
 0x525   :  { %1317 = vmatprep.mubr.bf16.mxu0 %v5402_v5  ;;  %1358 = vmatprep.mubr.bf16.mxu1 %v5402_v5 }
 0x527   :  { %1288 = vmatpush1.bf16.msra.mxu0 %v4611_v40  ;;  %1329 = vmatpush1.bf16.msra.mxu1 %v4651_v50  ;;  %v4087_v40 = vld [vmem:[#allocation5 + $0x44] ss:$16 sps:$4 sm:$0xff]  }
 0x528   :  { %1400 = vmatprep.subr.bf16.mxu0 %v4826_v48  ;;  %1441 = vmatprep.subr.bf16.mxu1 %v4829_v10  ;;  %v4094_v48 = vld [vmem:[#allocation5 + $0x80] ss:$16 sps:$4 sm:$0xff]   ;;  %v4095_v10 = vld [vmem:[#allocation5 + $0x88] ss:$16 sps:$4 sm:$0xff]  }
 0x52e   :  { %3443 = vmatmul.mubr.msk.bf16.vlgmr.msra.gmra.mrb[16].mxu0 %vm481_vm2, %v160_v38  ;;  %3444 = vmatmul.mubr.msk.bf16.vlgmr.msra.gmra.mrb[24].mxu1 %vm481_vm2, %v160_v38  ;;  %v4110_v38 = vld [vmem:[#allocation2] ss:$16 sps:$4 sm:$0xff]  }
 0x52f   :  { %1401 = vmatpush1.bf16.msra.mxu0 %v4834_v13  ;;  %1442 = vmatpush1.bf16.msra.mxu1 %v4837_v14  ;;  %v4097_v13 = vld [vmem:[#allocation5 + $0xac] ss:$16 sps:$4 sm:$0xff]   ;;  %v4098_v14 = vld [vmem:[#allocation5 + $0xa0] ss:$16 sps:$4 sm:$0xff]  }
 0x530   :  { %1402 = vmatprep.subr.bf16.mxu0 %v4086_v39  ;;  %1443 = vmatprep.subr.bf16.mxu1 %v4841_v51  ;;  %v4099_v51 = vld [vmem:[#allocation5 + $0xa8] ss:$16 sps:$4 sm:$0xff]   ;;  %v4111_v39 = vld [vmem:[#allocation2 + $0x24] ss:$16 sps:$4 sm:$0xff]  }
 0x531   :  { %1432 = vmatprep.mubr.bf16.mxu0 %v5402_v5  ;;  %1473 = vmatprep.mubr.bf16.mxu1 %v5402_v5 }
 0x533   :  { %1403 = vmatpush1.bf16.msra.mxu0 %v4846_v56  ;;  %1444 = vmatpush1.bf16.msra.mxu1 %v4849_v57  ;;  %v4100_v56 = vld [vmem:[#allocation5 + $0xc4] ss:$16 sps:$4 sm:$0xff]   ;;  %v4101_v57 = vld [vmem:[#allocation5 + $0xcc] ss:$16 sps:$4 sm:$0xff]  }
 0x534   :  { %1404 = vmatprep.subr.bf16.mxu0 %v4087_v40  ;;  %1445 = vmatprep.subr.bf16.mxu1 %v4853_v52  ;;  %v4102_v52 = vld [vmem:[#allocation5 + $0xc0] ss:$16 sps:$4 sm:$0xff]  }
 0x537   :  { %1405 = vmatpush1.bf16.msra.mxu0 %v4088_v4  ;;  %1446 = vmatpush1.bf16.msra.mxu1 %v4857_v11  ;;  %v4103_v11 = vld [vmem:[#allocation5 + $0xc8] ss:$16 sps:$4 sm:$0xff]   ;;  %v3732_v4 = vld [vmem:[#allocation8] ss:$16 sps:$4 sm:$0xff]  }
 0x538   :  { %1406 = vmatprep.subr.bf16.mxu0 %v4089_v6  ;;  %1447 = vmatprep.subr.bf16.mxu1 %v4861_v58  ;;  %v4104_v58 = vld [vmem:[#allocation5 + $0xe4] ss:$16 sps:$4 sm:$0xff]   ;;  %v3735_v6 = vld [vmem:[#allocation8 + $0x8] ss:$16 sps:$4 sm:$0xff]  }
 0x53b   :  { %1407 = vmatpush1.bf16.msra.mxu0 %v4090_v7  ;;  %1448 = vmatpush1.bf16.msra.mxu1 %v4091_v8  ;;  %v3740_v7 = vld [vmem:[#allocation8 + $0x24] ss:$16 sps:$4 sm:$0xff]   ;;  %v3743_v8 = vld [vmem:[#allocation8 + $0x2c] ss:$16 sps:$4 sm:$0xff]  }
 0x53c   :  { %1408 = vmatprep.subr.bf16.mxu0 %v4092_v9  ;;  %1449 = vmatprep.subr.bf16.mxu1 %v4093_v0  ;;  %v3741_v9 = vld [vmem:[#allocation8 + $0x28] ss:$16 sps:$4 sm:$0xff]   ;;  %v3746_v0 = vld [vmem:[#allocation8 + $0x44] ss:$16 sps:$4 sm:$0xff]  }
 0x53f   :  { %1409 = vmatpush1.bf16.msra.mxu0 %v4094_v48  ;;  %1450 = vmatpush1.bf16.msra.mxu1 %v4095_v10  ;;  %v3749_v48 = vld [vmem:[#allocation8 + $0x4c] ss:$16 sps:$4 sm:$0xff]   ;;  %v3744_v10 = vld [vmem:[#allocation8 + $0x40] ss:$16 sps:$4 sm:$0xff]  }
 0x540   :  { %1410 = vmatprep.subr.bf16.mxu0 %v4096_v12  ;;  %1451 = vmatprep.subr.bf16.mxu1 %v4097_v13  ;;  %v3747_v12 = vld [vmem:[#allocation8 + $0x48] ss:$16 sps:$4 sm:$0xff]   ;;  %v3752_v13 = vld [vmem:[#allocation8 + $0x64] ss:$16 sps:$4 sm:$0xff]  }
 0x543   :  { %1411 = vmatpush1.bf16.msra.mxu0 %v4098_v14  ;;  %1452 = vmatpush1.bf16.msra.mxu1 %v4099_v51  ;;  %v3755_v14 = vld [vmem:[#allocation8 + $0x6c] ss:$16 sps:$4 sm:$0xff]   ;;  %v3750_v51 = vld [vmem:[#allocation8 + $0x60] ss:$16 sps:$4 sm:$0xff]  }
 0x544   :  { %1412 = vmatprep.subr.bf16.mxu0 %v4100_v56  ;;  %1453 = vmatprep.subr.bf16.mxu1 %v4101_v57  ;;  %v3753_v56 = vld [vmem:[#allocation8 + $0x68] ss:$16 sps:$4 sm:$0xff]   ;;  %v3758_v57 = vld [vmem:[#allocation8 + $0x84] ss:$16 sps:$4 sm:$0xff]  }
 0x547   :  { %1413 = vmatpush1.bf16.msra.mxu0 %v4102_v52  ;;  %1454 = vmatpush1.bf16.msra.mxu1 %v4103_v11  ;;  %v3761_v52 = vld [vmem:[#allocation8 + $0x8c] ss:$16 sps:$4 sm:$0xff]   ;;  %v3756_v11 = vld [vmem:[#allocation8 + $0x80] ss:$16 sps:$4 sm:$0xff]  }
 0x548   :  { %1414 = vmatprep.subr.bf16.mxu0 %v4104_v58  ;;  %1455 = vmatprep.subr.bf16.mxu1 %v4105_v15  ;;  %v3759_v58 = vld [vmem:[#allocation8 + $0x88] ss:$16 sps:$4 sm:$0xff]   ;;  %v3764_v15 = vld [vmem:[#allocation8 + $0xa4] ss:$16 sps:$4 sm:$0xff]  }
 0x54b   :  { %1415 = vmatpush1.bf16.msra.mxu0 %v4106_v16  ;;  %1456 = vmatpush1.bf16.msra.mxu1 %v4107_v17  ;;  %v3767_v16 = vld [vmem:[#allocation8 + $0xac] ss:$16 sps:$4 sm:$0xff]   ;;  %v3762_v17 = vld [vmem:[#allocation8 + $0xa0] ss:$16 sps:$4 sm:$0xff]  }
 0x54c   :  { %1485 = vmatprep.subr.bf16.mxu0 %v4108_v18  ;;  %1526 = vmatprep.subr.bf16.mxu1 %v4109_v19  ;;  %v3765_v18 = vld [vmem:[#allocation8 + $0xa8] ss:$16 sps:$4 sm:$0xff]   ;;  %v3770_v19 = vld [vmem:[#allocation8 + $0xc4] ss:$16 sps:$4 sm:$0xff]  }
 0x601   :  { %v1319_v21 = vpop.f32.mrb[16].mxu0  ;;  %v1360_v22 = vpop.f32.mrb[24].mxu1 }
 0x602   :  { %v3445_v23 = vmul.f32 -1.442695, %v1319_v21  ;;  %v1321_v24 = vpop.f32.mrb[17].mxu0  ;;  %v1362_v25 = vpop.f32.mrb[25].mxu1  ;;  %v3773_v21 = vld [vmem:[#allocation8 + $0xcc] ss:$16 sps:$4 sm:$0xff]  }
 0x603   :  { %v3446_v26 = vmul.f32 -1.442695, %v1321_v24  ;;  %v1323_v27 = vpop.f32.mrb[18].mxu0  ;;  %v1364_v28 = vpop.f32.mrb[26].mxu1  ;;  %v3447_v31 = vmul.f32 -1.442695, %v1362_v25 }
 0x604   :  { %3910 = vpow2.f32 %v3445_v23  ;;  %v1324_v29 = vpop.f32.mrb[19].mxu0  ;;  %v1365_v30 = vpop.f32.mrb[27].mxu1  ;;  %v3771_v23 = vld [vmem:[#allocation8 + $0xc8] ss:$16 sps:$4 sm:$0xff]   ;;  %v3776_v24 = vld [vmem:[#allocation8 + $0xe4] ss:$16 sps:$4 sm:$0xff]  }
 0x605   :  { %3912 = vpow2.f32 %v3446_v26  ;;  %v3779_v25 = vld [vmem:[#allocation8 + $0xec] ss:$16 sps:$4 sm:$0xff]   ;;  %v3774_v26 = vld [vmem:[#allocation8 + $0xe0] ss:$16 sps:$4 sm:$0xff]   ;;  %v3777_v27 = vld [vmem:[#allocation8 + $0xe8] ss:$16 sps:$4 sm:$0xff]  }
 0x606   :  { %3914 = vpow2.f32 %v3447_v31  ;;  %v3782_v28 = vld [vmem:[#allocation7 + $0x4] ss:$16 sps:$4 sm:$0xff]   ;;  %v3785_v29 = vld [vmem:[#allocation7 + $0xc] ss:$16 sps:$4 sm:$0xff]  }
 0x607   :  { %3916 = vtanh.f32 %v1360_v22  ;;  %v3768_v22 = vld [vmem:[#allocation8 + $0xc0] ss:$16 sps:$4 sm:$0xff]  }
 0x60e   :  { %v3911_v32 = vpop.eup %3910 }
 0x60f   :  { %v3913_v33 = vpop.eup %3912  ;;  %v1370_v34 = vadd.f32 1.0, %v3911_v32 }
 0x610   :  { %v1376_v35 = vadd.f32 1.0, %v3913_v33  ;;  %v3915_v36 = vpop.eup %3914 }
 0x611   :  { %3918 = vrcp.f32 %v1370_v34  ;;  %v3917_v37 = vpop.eup %3916  ;;  %v1383_v61 = vadd.f32 1.0, %v3915_v36 }
 0x612   :  { %3920 = vrcp.f32 %v1376_v35 }
 0x613   :  { %3922 = vrcp.f32 %v1383_v61 }
 0x61b   :  { %v3919_v41 = vpop.eup %3918 }
 0x61c   :  { %v3921_v60 = vpop.eup %3920  ;;  %v1387_v62 = vmul.f32 %v3919_v41, %v3917_v37 }
 0x61d   :  { %v1386_v20 = vmul.f32 %v3921_v60, %v4898_v2  ;;  %v3923_v45 = vpop.eup %3922 }
 0x61f   :  { %v1388_v44 = vadd.f32 %v1387_v62, %v1386_v20 }
 0x621   :  { %3924 = vtanh.f32 %v1388_v44  ;;  %v4931_v1 = vsel %vm1396_vm1, %v1388_v44, %v4898_v2  ;;  %v4112_v2 = vld [vmem:[#allocation2 + $0x20] ss:$16 sps:$4 sm:$0xff]  }
 0x62b   :  { %v3925_v46 = vpop.eup %3924 }
 0x62c   :  { %v1390_v63 = vmul.f32 %v3925_v46, %v3923_v45 }
 0x62e   :  { %v4934_v54 = vsel %vm1396_vm1, %v1390_v63, %v4901_v53  ;;  %v165_v53 = vsel %vm164_vm3, 1.0, %v5403_v42 }
 0x62f   :  { %v1399_v3 = vpack.c.bf16 %v4934_v54, %v4934_v54  ;;  %v166_v40 = vpack.c.bf16 %v165_v53, %v165_v53 }
 0x631   :  { %1433 = vmatmul.mubr.bf16.vlgmr.msra.gmra.mrb[20].mxu0 %v1399_v3  ;;  %1474 = vmatmul.mubr.bf16.vlgmr.msra.gmra.mrb[28].mxu1 %v1399_v3 }
 0x632   :  { %1486 = vmatpush1.bf16.msra.mxu0 %v4110_v38  ;;  %1527 = vmatpush1.bf16.msra.mxu1 %v4645_v47  ;;  %v3734_v47 = vld [vmem:[#allocation8 + $0x4] ss:$16 sps:$4 sm:$0xff]  }
 0x633   :  { %1487 = vmatprep.subr.bf16.mxu0 %v4111_v39  ;;  %1528 = vmatprep.subr.bf16.mxu1 %v4647_v49  ;;  %v3737_v49 = vld [vmem:[#allocation8 + $0xc] ss:$16 sps:$4 sm:$0xff]  }
 0x634   :  { %1517 = vmatprep.mubr.bf16.mxu0 %v5402_v5  ;;  %1558 = vmatprep.mubr.bf16.mxu1 %v5402_v5 }
 0x636   :  { %1488 = vmatpush1.bf16.msra.mxu0 %v4112_v2  ;;  %1529 = vmatpush1.bf16.msra.mxu1 %v4651_v50  ;;  %v3738_v50 = vld [vmem:[#allocation8 + $0x20] ss:$16 sps:$4 sm:$0xff]  }
 0x637   :  { %1804 = vmatprep.subr.bf16.mxu0 %v3734_v47  ;;  %1845 = vmatprep.subr.bf16.mxu1 %v3737_v49  ;;  %v1602_v47 = vld [vmem:[#allocation7 + $0x20] sm:$0xff]  ;;  %v1595_v49 = vpop.permute.xlu1 %1594 }
 0x63d   :  { %3448 = vmatmul.mubr.msk.bf16.vlgmr.msra.gmra.mrb[20].mxu0 %vm481_vm2, %v166_v40  ;;  %3449 = vmatmul.mubr.msk.bf16.vlgmr.msra.gmra.mrb[28].mxu1 %vm481_vm2, %v166_v40  ;;  %vm1596_vm2 = vcmp.eq.s32.totalorder %v1595_v49, 1 }
 0x63e   :  { %1836 = vmatprep.mubr.bf16.mxu0 %v5402_v5  ;;  %1877 = vmatprep.mubr.bf16.mxu1 %v5402_v5 }
 0x63f   :  { %1805 = vmatpush1.bf16.msra.mxu0 %v3732_v4  ;;  %1846 = vmatpush1.bf16.msra.mxu1 %v3735_v6  ;;  %v1603_v6 = vld [vmem:[#allocation7 + $0x28] sm:$0xff] }
 0x640   :  { %1806 = vmatprep.subr.bf16.mxu0 %v3740_v7  ;;  %1847 = vmatprep.subr.bf16.mxu1 %v3743_v8  ;;  %v3780_v7 = vld [vmem:[#allocation7] ss:$16 sps:$4 sm:$0xff]  }
 0x643   :  { %1807 = vmatpush1.bf16.msra.mxu0 %v3738_v50  ;;  %1848 = vmatpush1.bf16.msra.mxu1 %v3741_v9  ;;  %v3783_v50 = vld [vmem:[#allocation7 + $0x8] ss:$16 sps:$4 sm:$0xff]   ;;  %v3490_v9 = vcombine.high %v1602_v47, %v1602_v47 }
 0x644   :  { %1808 = vmatprep.subr.bf16.mxu0 %v3746_v0  ;;  %1849 = vmatprep.subr.bf16.mxu1 %v3749_v48  ;;  %v3489_v48 = vcombine.low %v1602_v47, %v1602_v47 }
 0x647   :  { %1809 = vmatpush1.bf16.msra.mxu0 %v3744_v10  ;;  %1850 = vmatpush1.bf16.msra.mxu1 %v3747_v12  ;;  %v3492_v10 = vcombine.high %v1603_v6, %v1603_v6  ;;  %v3491_v12 = vcombine.low %v1603_v6, %v1603_v6 }
 0x648   :  { %1810 = vmatprep.subr.bf16.mxu0 %v3752_v13  ;;  %1851 = vmatprep.subr.bf16.mxu1 %v3755_v14  ;;  %v1922_v13 = vsel %vm1920_vm4, %v3489_v48, 0  ;;  %v4955_v14 = vld [vmem:[#allocation10 + $0x4] ss:$16 sps:$4 sm:$0xff]  }
 0x64b   :  { %1811 = vmatpush1.bf16.msra.mxu0 %v3750_v51  ;;  %1852 = vmatpush1.bf16.msra.mxu1 %v3753_v56  ;;  %v4957_v51 = vld [vmem:[#allocation10 + $0xc] ss:$16 sps:$4 sm:$0xff]  }
 0x64c   :  { %1812 = vmatprep.subr.bf16.mxu0 %v3758_v57  ;;  %1853 = vmatprep.subr.bf16.mxu1 %v3761_v52  ;;  %v4965_v57 = vld [vmem:[#allocation10] ss:$16 sps:$4 sm:$0xff]   ;;  %v4967_v52 = vld [vmem:[#allocation10 + $0x8] ss:$16 sps:$4 sm:$0xff]  }
 0x64f   :  { %1813 = vmatpush1.bf16.msra.mxu0 %v3756_v11  ;;  %1854 = vmatpush1.bf16.msra.mxu1 %v3759_v58  ;;  %v4969_v58 = vld [vmem:[#allocation10 + $0x24] ss:$16 sps:$4 sm:$0xff]  }
 0x650   :  { %1814 = vmatprep.subr.bf16.mxu0 %v3764_v15  ;;  %1855 = vmatprep.subr.bf16.mxu1 %v3767_v16  ;;  %v4971_v15 = vld [vmem:[#allocation10 + $0x2c] ss:$16 sps:$4 sm:$0xff]   ;;  %v4977_v16 = vld [vmem:[#allocation10 + $0x28] ss:$16 sps:$4 sm:$0xff]  }
 0x653   :  { %1815 = vmatpush1.bf16.msra.mxu0 %v3762_v17  ;;  %1856 = vmatpush1.bf16.msra.mxu1 %v3765_v18  ;;  %v4981_v17 = vld [vmem:[#allocation10 + $0x44] ss:$16 sps:$4 sm:$0xff]   ;;  %v4983_v18 = vld [vmem:[#allocation10 + $0x4c] ss:$16 sps:$4 sm:$0xff]  }
 0x654   :  { %1816 = vmatprep.subr.bf16.mxu0 %v3770_v19  ;;  %1857 = vmatprep.subr.bf16.mxu1 %v3773_v21  ;;  %v4989_v19 = vld [vmem:[#allocation10 + $0x40] ss:$16 sps:$4 sm:$0xff]   ;;  %v4991_v21 = vld [vmem:[#allocation10 + $0x48] ss:$16 sps:$4 sm:$0xff]  }
 0x657   :  { %1817 = vmatpush1.bf16.msra.mxu0 %v3768_v22  ;;  %1858 = vmatpush1.bf16.msra.mxu1 %v3771_v23  ;;  %v4995_v22 = vld [vmem:[#allocation10 + $0x64] ss:$16 sps:$4 sm:$0xff]   ;;  %v4997_v23 = vld [vmem:[#allocation10 + $0x6c] ss:$16 sps:$4 sm:$0xff]  }
 0x658   :  { %1818 = vmatprep.subr.bf16.mxu0 %v3776_v24  ;;  %1859 = vmatprep.subr.bf16.mxu1 %v3779_v25  ;;  %v5001_v24 = vld [vmem:[#allocation10 + $0x60] ss:$16 sps:$4 sm:$0xff]   ;;  %v5003_v25 = vld [vmem:[#allocation10 + $0x68] ss:$16 sps:$4 sm:$0xff]  }
 0x65b   :  { %1819 = vmatpush1.bf16.msra.mxu0 %v3774_v26  ;;  %1860 = vmatpush1.bf16.msra.mxu1 %v3777_v27  ;;  %v5007_v26 = vld [vmem:[#allocation10 + $0x84] ss:$16 sps:$4 sm:$0xff]   ;;  %v5009_v27 = vld [vmem:[#allocation10 + $0x8c] ss:$16 sps:$4 sm:$0xff]  }
 0x65c   :  { %1933 = vmatprep.subr.bf16.mxu0 %v3782_v28  ;;  %1974 = vmatprep.subr.bf16.mxu1 %v3785_v29  ;;  %v5013_v28 = vld [vmem:[#allocation10 + $0x80] ss:$16 sps:$4 sm:$0xff]   ;;  %v5015_v29 = vld [vmem:[#allocation10 + $0x88] ss:$16 sps:$4 sm:$0xff]  }
 0x710   :  { %v1519_v30 = vpop.f32.mrb[20].mxu0  ;;  %v1560_v31 = vpop.f32.mrb[28].mxu1 }
 0x711   :  { %v3450_v32 = vmul.f32 -1.442695, %v1519_v30  ;;  %v1521_v33 = vpop.f32.mrb[21].mxu0  ;;  %v1562_v34 = vpop.f32.mrb[29].mxu1  ;;  %v5019_v30 = vld [vmem:[#allocation10 + $0xa4] ss:$16 sps:$4 sm:$0xff]  }
 0x712   :  { %v3451_v35 = vmul.f32 -1.442695, %v1521_v33  ;;  %v1523_v36 = vpop.f32.mrb[22].mxu0  ;;  %v1564_v37 = vpop.f32.mrb[30].mxu1  ;;  %v3452_v60 = vmul.f32 -1.442695, %v1562_v34 }
 0x713   :  { %3926 = vpow2.f32 %v3450_v32  ;;  %v1524_v41 = vpop.f32.mrb[23].mxu0  ;;  %v1565_v59 = vpop.f32.mrb[31].mxu1  ;;  %v5025_v32 = vld [vmem:[#allocation10 + $0xa0] ss:$16 sps:$4 sm:$0xff]   ;;  %v5027_v33 = vld [vmem:[#allocation10 + $0xa8] ss:$16 sps:$4 sm:$0xff]  }
 0x714   :  { %3928 = vpow2.f32 %v3451_v35  ;;  %v5031_v34 = vld [vmem:[#allocation10 + $0xc4] ss:$16 sps:$4 sm:$0xff]   ;;  %v5033_v35 = vld [vmem:[#allocation10 + $0xcc] ss:$16 sps:$4 sm:$0xff]   ;;  %v5037_v36 = vld [vmem:[#allocation10 + $0xc0] ss:$16 sps:$4 sm:$0xff]  }
 0x715   :  { %3930 = vpow2.f32 %v3452_v60  ;;  %v5039_v37 = vld [vmem:[#allocation10 + $0xc8] ss:$16 sps:$4 sm:$0xff]   ;;  %v5043_v41 = vld [vmem:[#allocation10 + $0xe4] ss:$16 sps:$4 sm:$0xff]   ;;  %v5045_v59 = vld [vmem:[#allocation10 + $0xec] ss:$16 sps:$4 sm:$0xff]  }
 0x716   :  { %3932 = vtanh.f32 %v1560_v31  ;;  %v5021_v31 = vld [vmem:[#allocation10 + $0xac] ss:$16 sps:$4 sm:$0xff]   ;;  %v5049_v60 = vld [vmem:[#allocation10 + $0xe0] ss:$16 sps:$4 sm:$0xff]  }
 0x71d   :  { %v3927_v61 = vpop.eup %3926 }
 0x71e   :  { %v3929_v62 = vpop.eup %3928  ;;  %v1570_v20 = vadd.f32 1.0, %v3927_v61  ;;  %v5051_v61 = vld [vmem:[#allocation10 + $0xe8] ss:$16 sps:$4 sm:$0xff]  }
 0x71f   :  { %v1576_v44 = vadd.f32 1.0, %v3929_v62  ;;  %v3931_v45 = vpop.eup %3930 }
 0x720   :  { %3934 = vrcp.f32 %v1570_v20  ;;  %v3933_v46 = vpop.eup %3932  ;;  %v1583_v38 = vadd.f32 1.0, %v3931_v45 }
 0x721   :  { %3936 = vrcp.f32 %v1576_v44 }
 0x722   :  { %3938 = vrcp.f32 %v1583_v38 }
 0x72a   :  { %v3935_v63 = vpop.eup %3934 }
 0x72b   :  { %v3937_v3 = vpop.eup %3936  ;;  %v1587_v55 = vmul.f32 %v3935_v63, %v3933_v46 }
 0x72c   :  { %v1586_v39 = vmul.f32 %v3937_v3, %v4931_v1  ;;  %v3939_v53 = vpop.eup %3938  ;;  %v1607_v1 = vpop.permute.xlu1 %1606 }
 0x72d   :  { %vm1608_vm5 = vcmp.eq.s32.totalorder %v1607_v1, %v4641_v43  ;;  %v4975_v43 = vld [vmem:[#allocation10 + $0x20] ss:$16 sps:$4 sm:$0xff]  }
 0x72e   :  { %v1588_v2 = vadd.f32 %v1587_v55, %v1586_v39  ;;  %v1609_v56 = vsel %vm1608_vm5, 1.0, %v5403_v42 }
 0x72f   :  { %v1610_v11 = vpack.c.bf16 %v1609_v56, %v1609_v56 }
 0x730   :  { %3940 = vtanh.f32 %v1588_v2 }
 0x73a   :  { %v3941_v40 = vpop.eup %3940 }
 0x73b   :  { %v1590_v4 = vmul.f32 %v3941_v40, %v3939_v53 }
 0x73d   :  { %v1597_v8 = vsel %vm1596_vm2, %v1590_v4, %v4934_v54  ;;  %v1928_v54 = vsel %vm1920_vm4, %v3491_v12, 0 }
 0x73e   :  { %v1611_v0 = vpack.c.bf16 %v1597_v8, %v1597_v8 }
 0x740   :  { %1837 = vmatmul.mubr.bf16.vlgmr.msra.gmra.mrb[24].mxu0 %v1611_v0  ;;  %1878 = vmatmul.mubr.bf16.vlgmr.msra.gmra.mrb[32].mxu1 %v1611_v0 }
 0x741   :  { %1934 = vmatpush1.bf16.msra.mxu0 %v3780_v7  ;;  %1975 = vmatpush1.bf16.msra.mxu1 %v3783_v50 }
 0x742   :  { %3493 = vmatprep.subr.msk.bf16.mxu0 %vm1920_vm4, %v3490_v9  ;;  %3495 = vmatprep.subr.msk.bf16.mxu1 %vm1920_vm4, %v3492_v10 }
 0x743   :  { %1965 = vmatprep.mubr.bf16.mxu0 %v5402_v5  ;;  %2006 = vmatprep.mubr.bf16.mxu1 %v5402_v5 }
 0x745   :  { %1936 = vmatpush1.bf16.msra.mxu0 %v1922_v13  ;;  %1977 = vmatpush1.bf16.msra.mxu1 %v1928_v54 }
 0x746   :  { %2207 = vmatprep.subr.bf16.mxu0 %v4955_v14  ;;  %2248 = vmatprep.subr.bf16.mxu1 %v4957_v51 }
 0x74c   :  { %3494 = vmatmul.mubr.msk.bf16.vlgmr.msra.gmra.mrb[24].mxu0 %vm1916_vm6, %v1610_v11  ;;  %3496 = vmatmul.mubr.msk.bf16.vlgmr.msra.gmra.mrb[32].mxu1 %vm1916_vm6, %v1610_v11 }
 0x74d   :  { %2208 = vmatpush1.bf16.msra.mxu0 %v4965_v57  ;;  %2249 = vmatpush1.bf16.msra.mxu1 %v4967_v52 }
 0x74e   :  { %2209 = vmatprep.subr.bf16.mxu0 %v4969_v58  ;;  %2250 = vmatprep.subr.bf16.mxu1 %v4971_v15 }
 0x74f   :  { %2239 = vmatprep.mubr.bf16.mxu0 %v5402_v5  ;;  %2280 = vmatprep.mubr.bf16.mxu1 %v5402_v5 }
 0x751   :  { %2210 = vmatpush1.bf16.msra.mxu0 %v4975_v43  ;;  %2251 = vmatpush1.bf16.msra.mxu1 %v4977_v16 }
 0x752   :  { %2211 = vmatprep.subr.bf16.mxu0 %v4981_v17  ;;  %2252 = vmatprep.subr.bf16.mxu1 %v4983_v18 }
 0x755   :  { %2212 = vmatpush1.bf16.msra.mxu0 %v4989_v19  ;;  %2253 = vmatpush1.bf16.msra.mxu1 %v4991_v21 }
 0x756   :  { %2213 = vmatprep.subr.bf16.mxu0 %v4995_v22  ;;  %2254 = vmatprep.subr.bf16.mxu1 %v4997_v23 }
 0x759   :  { %2214 = vmatpush1.bf16.msra.mxu0 %v5001_v24  ;;  %2255 = vmatpush1.bf16.msra.mxu1 %v5003_v25 }
 0x75a   :  { %2215 = vmatprep.subr.bf16.mxu0 %v5007_v26  ;;  %2256 = vmatprep.subr.bf16.mxu1 %v5009_v27 }
 0x75d   :  { %2216 = vmatpush1.bf16.msra.mxu0 %v5013_v28  ;;  %2257 = vmatpush1.bf16.msra.mxu1 %v5015_v29 }
 0x75e   :  { %2217 = vmatprep.subr.bf16.mxu0 %v5019_v30  ;;  %2258 = vmatprep.subr.bf16.mxu1 %v5021_v31 }
 0x761   :  { %2218 = vmatpush1.bf16.msra.mxu0 %v5025_v32  ;;  %2259 = vmatpush1.bf16.msra.mxu1 %v5027_v33 }
 0x762   :  { %2219 = vmatprep.subr.bf16.mxu0 %v5031_v34  ;;  %2260 = vmatprep.subr.bf16.mxu1 %v5033_v35 }
 0x765   :  { %2220 = vmatpush1.bf16.msra.mxu0 %v5037_v36  ;;  %2261 = vmatpush1.bf16.msra.mxu1 %v5039_v37 }
 0x766   :  { %2221 = vmatprep.subr.bf16.mxu0 %v5043_v41  ;;  %2262 = vmatprep.subr.bf16.mxu1 %v5045_v59 }
 0x769   :  { %2222 = vmatpush1.bf16.msra.mxu0 %v5049_v60  ;;  %2263 = vmatpush1.bf16.msra.mxu1 %v5051_v61 }
 0x76a   :  { %2318 = vmatprep.subr.bf16.mxu0 %v4955_v14  ;;  %2359 = vmatprep.subr.bf16.mxu1 %v4957_v51 }
 0x76c   :  { %2240 = vmatmul.mubr.bf16.vlgmr.msra.gmra.mrb[28].mxu0 %v5402_v5  ;;  %2281 = vmatmul.mubr.bf16.vlgmr.msra.gmra.mrb[36].mxu1 %v5402_v5 }
 0x76d   :  { %2319 = vmatpush1.bf16.msra.mxu0 %v4965_v57  ;;  %2360 = vmatpush1.bf16.msra.mxu1 %v4967_v52 }
 0x76e   :  { %2320 = vmatprep.subr.bf16.mxu0 %v4969_v58  ;;  %2361 = vmatprep.subr.bf16.mxu1 %v4971_v15 }
 0x76f   :  { %2350 = vmatprep.mubr.bf16.mxu0 %v5402_v5  ;;  %2391 = vmatprep.mubr.bf16.mxu1 %v5402_v5 }
 0x771   :  { %2321 = vmatpush1.bf16.msra.mxu0 %v4975_v43  ;;  %2362 = vmatpush1.bf16.msra.mxu1 %v4977_v16 }
 0x772   :  { %2322 = vmatprep.subr.bf16.mxu0 %v4981_v17  ;;  %2363 = vmatprep.subr.bf16.mxu1 %v4983_v18 }
 0x775   :  { %2323 = vmatpush1.bf16.msra.mxu0 %v4989_v19  ;;  %2364 = vmatpush1.bf16.msra.mxu1 %v4991_v21 }
 0x776   :  { %2324 = vmatprep.subr.bf16.mxu0 %v4995_v22  ;;  %2365 = vmatprep.subr.bf16.mxu1 %v4997_v23 }
 0x779   :  { %2325 = vmatpush1.bf16.msra.mxu0 %v5001_v24  ;;  %2366 = vmatpush1.bf16.msra.mxu1 %v5003_v25 }
 0x77a   :  { %2326 = vmatprep.subr.bf16.mxu0 %v5007_v26  ;;  %2367 = vmatprep.subr.bf16.mxu1 %v5009_v27 }
 0x77d   :  { %2327 = vmatpush1.bf16.msra.mxu0 %v5013_v28  ;;  %2368 = vmatpush1.bf16.msra.mxu1 %v5015_v29 }
 0x77e   :  { %2328 = vmatprep.subr.bf16.mxu0 %v5019_v30  ;;  %2369 = vmatprep.subr.bf16.mxu1 %v5021_v31 }
 0x781   :  { %2329 = vmatpush1.bf16.msra.mxu0 %v5025_v32  ;;  %2370 = vmatpush1.bf16.msra.mxu1 %v5027_v33 }
 0x782   :  { %2330 = vmatprep.subr.bf16.mxu0 %v5031_v34  ;;  %2371 = vmatprep.subr.bf16.mxu1 %v5033_v35 }
 0x785   :  { %2331 = vmatpush1.bf16.msra.mxu0 %v5037_v36  ;;  %2372 = vmatpush1.bf16.msra.mxu1 %v5039_v37 }
 0x786   :  { %2332 = vmatprep.subr.bf16.mxu0 %v5043_v41  ;;  %2373 = vmatprep.subr.bf16.mxu1 %v5045_v59 }
 0x789   :  { %2333 = vmatpush1.bf16.msra.mxu0 %v5049_v60  ;;  %2374 = vmatpush1.bf16.msra.mxu1 %v5051_v61 }
 0x78a   :  { %2448 = vmatprep.subr.bf16.mxu0 %v4955_v14  ;;  %2489 = vmatprep.subr.bf16.mxu1 %v4957_v51 }
 0x81f   :  { %v5095_v62 = vpop.f32.mrb[24].mxu0  ;;  %v5097_v20 = vpop.f32.mrb[32].mxu1 }
 0x820   :  { %v5099_v44 = vpop.f32.mrb[25].mxu0  ;;  %v5101_v45 = vpop.f32.mrb[33].mxu1 }
 0x821   :  { %v1971_v46 = vpop.f32.mrb[26].mxu0  ;;  %v2012_v63 = vpop.f32.mrb[34].mxu1 }
 0x822   :  { %v1972_v3 = vpop.f32.mrb[27].mxu0  ;;  %v2013_v55 = vpop.f32.mrb[35].mxu1 }
 0x83f   :  { %v2241_v38 = vpop.f32.mrb[28].mxu0  ;;  %v2282_v39 = vpop.f32.mrb[36].mxu1 }
 0x840   :  { %v2289_v2 = vadd.f32 %v2241_v38, %v5095_v62  ;;  %v2291_v53 = vadd.f32 %v2282_v39, %v5097_v20  ;;  %v2243_v40 = vpop.f32.mrb[29].mxu0  ;;  %v2284_v47 = vpop.f32.mrb[37].mxu1 }
 0x841   :  { %v2290_v49 = vadd.f32 %v2243_v40, %v5099_v44  ;;  %v2292_v4 = vadd.f32 %v2284_v47, %v5101_v45  ;;  %v2245_v6 = vpop.f32.mrb[30].mxu0  ;;  %v2286_v7 = vpop.f32.mrb[38].mxu1 }
 0x842   :  { %v3529_v8 = vmul.f32 -1.442695, %v2289_v2  ;;  %v2246_v50 = vpop.f32.mrb[31].mxu0  ;;  %v2287_v9 = vpop.f32.mrb[39].mxu1 }
 0x843   :  { %v3530_v0 = vmul.f32 -1.442695, %v2290_v49  ;;  %v3531_v48 = vmul.f32 -1.442695, %v2292_v4 }
 0x844   :  { %3942 = vpow2.f32 %v3529_v8 }
 0x845   :  { %3944 = vpow2.f32 %v3530_v0 }
 0x846   :  { %3946 = vpow2.f32 %v3531_v48 }
 0x847   :  { %3948 = vtanh.f32 %v2291_v53 }
 0x84e   :  { %v3943_v10 = vpop.eup %3942 }
 0x84f   :  { %v3945_v12 = vpop.eup %3944  ;;  %v2296_v1 = vadd.f32 1.0, %v3943_v10 }
 0x850   :  { %v2302_v13 = vadd.f32 1.0, %v3945_v12  ;;  %v3947_v54 = vpop.eup %3946 }
 0x851   :  { %3950 = vrcp.f32 %v2296_v1  ;;  %v3949_v56 = vpop.eup %3948  ;;  %v2309_v3 = vadd.f32 1.0, %v3947_v54 }
 0x852   :  { %3952 = vrcp.f32 %v2302_v13 }
 0x853   :  { %3954 = vrcp.f32 %v2309_v3 }
 0x85b   :  { %v3951_v11 = vpop.eup %3950 }
 0x85c   :  { %v3953_v46 = vpop.eup %3952  ;;  %v2313_v63 = vmul.f32 %v3951_v11, %v3949_v56 }
 0x85d   :  { %v2312_v55 = vmul.f32 0.0, %v3953_v46  ;;  %v3955_v39 = vpop.eup %3954 }
 0x85f   :  { %v5107_v38 = vadd.f32 %v2313_v63, %v2312_v55 }
 0x861   :  { %3956 = vtanh.f32 %v5107_v38 }
 0x86b   :  { %v3957_v2 = vpop.eup %3956 }
 0x86c   :  { %v5110_v40 = vmul.f32 %v3957_v2, %v3955_v39 }
 0x86e   :  { %v2317_v53 = vpack.c.bf16 %v5110_v40, %v5110_v40 }
 0x870   :  { %2351 = vmatmul.mubr.bf16.vlgmr.msra.gmra.mrb[32].mxu0 %v2317_v53  ;;  %2392 = vmatmul.mubr.bf16.vlgmr.msra.gmra.mrb[40].mxu1 %v2317_v53 }
 0x871   :  { %2449 = vmatpush1.bf16.msra.mxu0 %v4965_v57  ;;  %2490 = vmatpush1.bf16.msra.mxu1 %v4967_v52 }
 0x872   :  { %2450 = vmatprep.subr.bf16.mxu0 %v4969_v58  ;;  %2491 = vmatprep.subr.bf16.mxu1 %v4971_v15 }
 0x873   :  { %2480 = vmatprep.mubr.bf16.mxu0 %v5402_v5  ;;  %2521 = vmatprep.mubr.bf16.mxu1 %v5402_v5 }
 0x875   :  { %2451 = vmatpush1.bf16.msra.mxu0 %v4975_v43  ;;  %2492 = vmatpush1.bf16.msra.mxu1 %v4977_v16 }
 0x876   :  { %2452 = vmatprep.subr.bf16.mxu0 %v4981_v17  ;;  %2493 = vmatprep.subr.bf16.mxu1 %v4983_v18 }
 0x879   :  { %2453 = vmatpush1.bf16.msra.mxu0 %v4989_v19  ;;  %2494 = vmatpush1.bf16.msra.mxu1 %v4991_v21 }
 0x87a   :  { %2454 = vmatprep.subr.bf16.mxu0 %v4995_v22  ;;  %2495 = vmatprep.subr.bf16.mxu1 %v4997_v23 }
 0x87d   :  { %2455 = vmatpush1.bf16.msra.mxu0 %v5001_v24  ;;  %2496 = vmatpush1.bf16.msra.mxu1 %v5003_v25 }
 0x87e   :  { %2456 = vmatprep.subr.bf16.mxu0 %v5007_v26  ;;  %2497 = vmatprep.subr.bf16.mxu1 %v5009_v27 }
 0x881   :  { %2457 = vmatpush1.bf16.msra.mxu0 %v5013_v28  ;;  %2498 = vmatpush1.bf16.msra.mxu1 %v5015_v29 }
 0x882   :  { %2458 = vmatprep.subr.bf16.mxu0 %v5019_v30  ;;  %2499 = vmatprep.subr.bf16.mxu1 %v5021_v31 }
 0x885   :  { %2459 = vmatpush1.bf16.msra.mxu0 %v5025_v32  ;;  %2500 = vmatpush1.bf16.msra.mxu1 %v5027_v33 }
 0x886   :  { %2460 = vmatprep.subr.bf16.mxu0 %v5031_v34  ;;  %2501 = vmatprep.subr.bf16.mxu1 %v5033_v35 }
 0x889   :  { %2461 = vmatpush1.bf16.msra.mxu0 %v5037_v36  ;;  %2502 = vmatpush1.bf16.msra.mxu1 %v5039_v37 }
 0x88a   :  { %2462 = vmatprep.subr.bf16.mxu0 %v5043_v41  ;;  %2503 = vmatprep.subr.bf16.mxu1 %v5045_v59 }
 0x88d   :  { %2463 = vmatpush1.bf16.msra.mxu0 %v5049_v60  ;;  %2504 = vmatpush1.bf16.msra.mxu1 %v5051_v61 }
 0x88e   :  { %2577 = vmatprep.subr.bf16.mxu0 %v4955_v14  ;;  %2618 = vmatprep.subr.bf16.mxu1 %v4957_v51 }
 0x943   :  { %v2352_v47 = vpop.f32.mrb[32].mxu0  ;;  %v2393_v49 = vpop.f32.mrb[40].mxu1 }
 0x944   :  { %v2404_v4 = vrot.slane %v2352_v47, 7  ;;  %v2406_v6 = vrot.slane %v2393_v49, 7  ;;  %v2354_v7 = vpop.f32.mrb[33].mxu0  ;;  %v2395_v8 = vpop.f32.mrb[41].mxu1 }
 0x945   :  { %v2405_v50 = vrot.slane %v2354_v7, 7  ;;  %v2407_v9 = vrot.slane %v2395_v8, 7  ;;  %v2356_v0 = vpop.f32.mrb[34].mxu0  ;;  %v2397_v48 = vpop.f32.mrb[42].mxu1 }
 0x946   :  { %v2412_v10 = vadd.f32 %v2404_v4, %v5095_v62  ;;  %v2414_v12 = vadd.f32 %v2406_v6, %v5097_v20  ;;  %v2357_v1 = vpop.f32.mrb[35].mxu0  ;;  %v2398_v13 = vpop.f32.mrb[43].mxu1  ;;  %v2436_v4 = vrot.slane %v5107_v38, 7 }
 0x947   :  { %v2413_v54 = vadd.f32 %v2405_v50, %v5099_v44  ;;  %v2415_v56 = vadd.f32 %v2407_v9, %v5101_v45 }
 0x948   :  { %v3532_v11 = vmul.f32 -1.442695, %v2412_v10 }
 0x949   :  { %v3533_v46 = vmul.f32 -1.442695, %v2413_v54  ;;  %v3534_v63 = vmul.f32 -1.442695, %v2415_v56 }
 0x94a   :  { %3958 = vpow2.f32 %v3532_v11 }
 0x94b   :  { %3960 = vpow2.f32 %v3533_v46 }
 0x94c   :  { %3962 = vpow2.f32 %v3534_v63 }
 0x94d   :  { %3964 = vtanh.f32 %v2414_v12 }
 0x954   :  { %v3959_v3 = vpop.eup %3958 }
 0x955   :  { %v3961_v55 = vpop.eup %3960  ;;  %v2419_v39 = vadd.f32 1.0, %v3959_v3 }
 0x956   :  { %v2425_v2 = vadd.f32 1.0, %v3961_v55  ;;  %v3963_v53 = vpop.eup %3962 }
 0x957   :  { %3966 = vrcp.f32 %v2419_v39  ;;  %v3965_v47 = vpop.eup %3964  ;;  %v2432_v8 = vadd.f32 1.0, %v3963_v53 }
 0x958   :  { %3968 = vrcp.f32 %v2425_v2 }
 0x959   :  { %3970 = vrcp.f32 %v2432_v8 }
 0x961   :  { %v3967_v49 = vpop.eup %3966 }
 0x962   :  { %v3969_v6 = vpop.eup %3968  ;;  %v2439_v7 = vmul.f32 %v3967_v49, %v3965_v47 }
 0x963   :  { %v2438_v50 = vmul.f32 %v3969_v6, %v2436_v4  ;;  %v3971_v0 = vpop.eup %3970 }
 0x965   :  { %v5153_v9 = vadd.f32 %v2439_v7, %v2438_v50 }
 0x967   :  { %3972 = vtanh.f32 %v5153_v9 }
 0x971   :  { %v3973_v48 = vpop.eup %3972 }
 0x972   :  { %v5156_v10 = vmul.f32 %v3973_v48, %v3971_v0 }
 0x974   :  { %v2443_v12 = vpack.c.bf16 %v5156_v10, %v5156_v10 }
 0x976   :  { %v2445_v1 = vshrl.u32 %v2443_v12, 16 }
 0x978   :  { %2481 = vmatmul.mubr.bf16.vlgmr.msra.gmra.mrb[36].mxu0 %v2445_v1  ;;  %2522 = vmatmul.mubr.bf16.vlgmr.msra.gmra.mrb[44].mxu1 %v2445_v1 }
 0x979   :  { %2578 = vmatpush1.bf16.msra.mxu0 %v4965_v57  ;;  %2619 = vmatpush1.bf16.msra.mxu1 %v4967_v52 }
 0x97a   :  { %2579 = vmatprep.subr.bf16.mxu0 %v4969_v58  ;;  %2620 = vmatprep.subr.bf16.mxu1 %v4971_v15 }
 0x97b   :  { %2609 = vmatprep.mubr.bf16.mxu0 %v5402_v5  ;;  %2650 = vmatprep.mubr.bf16.mxu1 %v5402_v5 }
 0x97d   :  { %2580 = vmatpush1.bf16.msra.mxu0 %v4975_v43  ;;  %2621 = vmatpush1.bf16.msra.mxu1 %v4977_v16 }
 0x97e   :  { %2581 = vmatprep.subr.bf16.mxu0 %v4981_v17  ;;  %2622 = vmatprep.subr.bf16.mxu1 %v4983_v18 }
 0x981   :  { %2582 = vmatpush1.bf16.msra.mxu0 %v4989_v19  ;;  %2623 = vmatpush1.bf16.msra.mxu1 %v4991_v21 }
 0x982   :  { %2583 = vmatprep.subr.bf16.mxu0 %v4995_v22  ;;  %2624 = vmatprep.subr.bf16.mxu1 %v4997_v23 }
 0x985   :  { %2584 = vmatpush1.bf16.msra.mxu0 %v5001_v24  ;;  %2625 = vmatpush1.bf16.msra.mxu1 %v5003_v25 }
 0x986   :  { %2585 = vmatprep.subr.bf16.mxu0 %v5007_v26  ;;  %2626 = vmatprep.subr.bf16.mxu1 %v5009_v27 }
 0x989   :  { %2586 = vmatpush1.bf16.msra.mxu0 %v5013_v28  ;;  %2627 = vmatpush1.bf16.msra.mxu1 %v5015_v29 }
 0x98a   :  { %2587 = vmatprep.subr.bf16.mxu0 %v5019_v30  ;;  %2628 = vmatprep.subr.bf16.mxu1 %v5021_v31 }
 0x98d   :  { %2588 = vmatpush1.bf16.msra.mxu0 %v5025_v32  ;;  %2629 = vmatpush1.bf16.msra.mxu1 %v5027_v33 }
 0x98e   :  { %2589 = vmatprep.subr.bf16.mxu0 %v5031_v34  ;;  %2630 = vmatprep.subr.bf16.mxu1 %v5033_v35 }
 0x991   :  { %2590 = vmatpush1.bf16.msra.mxu0 %v5037_v36  ;;  %2631 = vmatpush1.bf16.msra.mxu1 %v5039_v37 }
 0x992   :  { %2591 = vmatprep.subr.bf16.mxu0 %v5043_v41  ;;  %2632 = vmatprep.subr.bf16.mxu1 %v5045_v59 }
 0x995   :  { %2592 = vmatpush1.bf16.msra.mxu0 %v5049_v60  ;;  %2633 = vmatpush1.bf16.msra.mxu1 %v5051_v61 }
 0x996   :  { %2708 = vmatprep.subr.bf16.mxu0 %v4955_v14  ;;  %2749 = vmatprep.subr.bf16.mxu1 %v4957_v51 }
 0xa4b   :  { %v2482_v38 = vpop.f32.mrb[36].mxu0  ;;  %v2523_v13 = vpop.f32.mrb[44].mxu1 }
 0xa4c   :  { %v2534_v54 = vrot.slane %v2482_v38, 6  ;;  %v2536_v56 = vrot.slane %v2523_v13, 6  ;;  %v2484_v11 = vpop.f32.mrb[37].mxu0  ;;  %v2525_v46 = vpop.f32.mrb[45].mxu1 }
 0xa4d   :  { %v2535_v63 = vrot.slane %v2484_v11, 6  ;;  %v2537_v3 = vrot.slane %v2525_v46, 6  ;;  %v2486_v55 = vpop.f32.mrb[38].mxu0  ;;  %v2527_v39 = vpop.f32.mrb[46].mxu1 }
 0xa4e   :  { %v2542_v2 = vadd.f32 %v2534_v54, %v5095_v62  ;;  %v2544_v53 = vadd.f32 %v2536_v56, %v5097_v20  ;;  %v2487_v47 = vpop.f32.mrb[39].mxu0  ;;  %v2528_v49 = vpop.f32.mrb[47].mxu1  ;;  %v2566_v56 = vrot.slane %v5153_v9, 7 }
 0xa4f   :  { %v2543_v4 = vadd.f32 %v2535_v63, %v5099_v44  ;;  %v2545_v6 = vadd.f32 %v2537_v3, %v5101_v45  ;;  %v3223_v47 = vsel %vm3222_vm7, %v5110_v40, %v5156_v10 }
 0xa50   :  { %v3535_v7 = vmul.f32 -1.442695, %v2542_v2 }
 0xa51   :  { %v3536_v8 = vmul.f32 -1.442695, %v2543_v4  ;;  %v3537_v50 = vmul.f32 -1.442695, %v2545_v6 }
 0xa52   :  { %3974 = vpow2.f32 %v3535_v7 }
 0xa53   :  { %3976 = vpow2.f32 %v3536_v8 }
 0xa54   :  { %3978 = vpow2.f32 %v3537_v50 }
 0xa55   :  { %3980 = vtanh.f32 %v2544_v53 }
 0xa5c   :  { %v3975_v0 = vpop.eup %3974 }
 0xa5d   :  { %v3977_v48 = vpop.eup %3976  ;;  %v2549_v12 = vadd.f32 1.0, %v3975_v0 }
 0xa5e   :  { %v2555_v1 = vadd.f32 1.0, %v3977_v48  ;;  %v3979_v38 = vpop.eup %3978 }
 0xa5f   :  { %3982 = vrcp.f32 %v2549_v12  ;;  %v3981_v13 = vpop.eup %3980  ;;  %v2562_v63 = vadd.f32 1.0, %v3979_v38 }
 0xa60   :  { %3984 = vrcp.f32 %v2555_v1 }
 0xa61   :  { %3986 = vrcp.f32 %v2562_v63 }
 0xa69   :  { %v3983_v54 = vpop.eup %3982 }
 0xa6a   :  { %v3985_v11 = vpop.eup %3984  ;;  %v2569_v46 = vmul.f32 %v3983_v54, %v3981_v13 }
 0xa6b   :  { %v2568_v3 = vmul.f32 %v3985_v11, %v2566_v56  ;;  %v3987_v39 = vpop.eup %3986 }
 0xa6d   :  { %v5199_v55 = vadd.f32 %v2569_v46, %v2568_v3 }
 0xa6f   :  { %3988 = vtanh.f32 %v5199_v55 }
 0xa79   :  { %v3989_v2 = vpop.eup %3988 }
 0xa7a   :  { %v2572_v53 = vmul.f32 %v3989_v2, %v3987_v39 }
 0xa7c   :  { %v2573_v49 = vpack.c.bf16 %v2572_v53, %v2572_v53  ;;  %v5204_v4 = vsel %vm3224_vm8, %v3223_v47, %v2572_v53 }
 0xa7e   :  { %v2575_v9 = vrot.slane %v2573_v49, 1 }
 0xa80   :  { %2610 = vmatmul.mubr.bf16.vlgmr.msra.gmra.mrb[40].mxu0 %v2575_v9  ;;  %2651 = vmatmul.mubr.bf16.vlgmr.msra.gmra.mrb[48].mxu1 %v2575_v9 }
 0xa81   :  { %2709 = vmatpush1.bf16.msra.mxu0 %v4965_v57  ;;  %2750 = vmatpush1.bf16.msra.mxu1 %v4967_v52 }
 0xa82   :  { %2710 = vmatprep.subr.bf16.mxu0 %v4969_v58  ;;  %2751 = vmatprep.subr.bf16.mxu1 %v4971_v15 }
 0xa83   :  { %2740 = vmatprep.mubr.bf16.mxu0 %v5402_v5  ;;  %2781 = vmatprep.mubr.bf16.mxu1 %v5402_v5 }
 0xa85   :  { %2711 = vmatpush1.bf16.msra.mxu0 %v4975_v43  ;;  %2752 = vmatpush1.bf16.msra.mxu1 %v4977_v16 }
 0xa86   :  { %2712 = vmatprep.subr.bf16.mxu0 %v4981_v17  ;;  %2753 = vmatprep.subr.bf16.mxu1 %v4983_v18 }
 0xa89   :  { %2713 = vmatpush1.bf16.msra.mxu0 %v4989_v19  ;;  %2754 = vmatpush1.bf16.msra.mxu1 %v4991_v21 }
 0xa8a   :  { %2714 = vmatprep.subr.bf16.mxu0 %v4995_v22  ;;  %2755 = vmatprep.subr.bf16.mxu1 %v4997_v23 }
 0xa8d   :  { %2715 = vmatpush1.bf16.msra.mxu0 %v5001_v24  ;;  %2756 = vmatpush1.bf16.msra.mxu1 %v5003_v25 }
 0xa8e   :  { %2716 = vmatprep.subr.bf16.mxu0 %v5007_v26  ;;  %2757 = vmatprep.subr.bf16.mxu1 %v5009_v27 }
 0xa91   :  { %2717 = vmatpush1.bf16.msra.mxu0 %v5013_v28  ;;  %2758 = vmatpush1.bf16.msra.mxu1 %v5015_v29 }
 0xa92   :  { %2718 = vmatprep.subr.bf16.mxu0 %v5019_v30  ;;  %2759 = vmatprep.subr.bf16.mxu1 %v5021_v31 }
 0xa95   :  { %2719 = vmatpush1.bf16.msra.mxu0 %v5025_v32  ;;  %2760 = vmatpush1.bf16.msra.mxu1 %v5027_v33 }
 0xa96   :  { %2720 = vmatprep.subr.bf16.mxu0 %v5031_v34  ;;  %2761 = vmatprep.subr.bf16.mxu1 %v5033_v35 }
 0xa99   :  { %2721 = vmatpush1.bf16.msra.mxu0 %v5037_v36  ;;  %2762 = vmatpush1.bf16.msra.mxu1 %v5039_v37 }
 0xa9a   :  { %2722 = vmatprep.subr.bf16.mxu0 %v5043_v41  ;;  %2763 = vmatprep.subr.bf16.mxu1 %v5045_v59 }
 0xa9d   :  { %2723 = vmatpush1.bf16.msra.mxu0 %v5049_v60  ;;  %2764 = vmatpush1.bf16.msra.mxu1 %v5051_v61 }
 0xa9e   :  { %2837 = vmatprep.subr.bf16.mxu0 %v4955_v14  ;;  %2878 = vmatprep.subr.bf16.mxu1 %v4957_v51 }
 0xb53   :  { %v2611_v40 = vpop.f32.mrb[40].mxu0  ;;  %v2652_v10 = vpop.f32.mrb[48].mxu1 }
 0xb54   :  { %v2663_v6 = vrot.slane %v2611_v40, 5  ;;  %v2665_v7 = vrot.slane %v2652_v10, 5  ;;  %v2613_v8 = vpop.f32.mrb[41].mxu0  ;;  %v2654_v50 = vpop.f32.mrb[49].mxu1 }
 0xb55   :  { %v2664_v0 = vrot.slane %v2613_v8, 5  ;;  %v2666_v48 = vrot.slane %v2654_v50, 5  ;;  %v2615_v12 = vpop.f32.mrb[42].mxu0  ;;  %v2656_v1 = vpop.f32.mrb[50].mxu1 }
 0xb56   :  { %v2671_v38 = vadd.f32 %v2663_v6, %v5095_v62  ;;  %v2673_v13 = vadd.f32 %v2665_v7, %v5097_v20  ;;  %v2616_v54 = vpop.f32.mrb[43].mxu0  ;;  %v2657_v56 = vpop.f32.mrb[51].mxu1  ;;  %v2695_v6 = vrot.slane %v5199_v55, 7 }
 0xb57   :  { %v2672_v11 = vadd.f32 %v2664_v0, %v5099_v44  ;;  %v2674_v46 = vadd.f32 %v2666_v48, %v5101_v45 }
 0xb58   :  { %v3538_v63 = vmul.f32 -1.442695, %v2671_v38 }
 0xb59   :  { %v3539_v3 = vmul.f32 -1.442695, %v2672_v11  ;;  %v3540_v39 = vmul.f32 -1.442695, %v2674_v46 }
 0xb5a   :  { %3990 = vpow2.f32 %v3538_v63 }
 0xb5b   :  { %3992 = vpow2.f32 %v3539_v3 }
 0xb5c   :  { %3994 = vpow2.f32 %v3540_v39 }
 0xb5d   :  { %3996 = vtanh.f32 %v2673_v13 }
 0xb64   :  { %v3991_v2 = vpop.eup %3990 }
 0xb65   :  { %v3993_v53 = vpop.eup %3992  ;;  %v2678_v47 = vadd.f32 1.0, %v3991_v2 }
 0xb66   :  { %v2684_v49 = vadd.f32 1.0, %v3993_v53  ;;  %v3995_v9 = vpop.eup %3994 }
 0xb67   :  { %3998 = vrcp.f32 %v2678_v47  ;;  %v3997_v40 = vpop.eup %3996  ;;  %v2691_v50 = vadd.f32 1.0, %v3995_v9 }
 0xb68   :  { %4000 = vrcp.f32 %v2684_v49 }
 0xb69   :  { %4002 = vrcp.f32 %v2691_v50 }
 0xb71   :  { %v3999_v10 = vpop.eup %3998 }
 0xb72   :  { %v4001_v7 = vpop.eup %4000  ;;  %v2698_v8 = vmul.f32 %v3999_v10, %v3997_v40 }
 0xb73   :  { %v2697_v0 = vmul.f32 %v4001_v7, %v2695_v6  ;;  %v4003_v12 = vpop.eup %4002 }
 0xb75   :  { %v5245_v48 = vadd.f32 %v2698_v8, %v2697_v0 }
 0xb77   :  { %4004 = vtanh.f32 %v5245_v48 }
 0xb81   :  { %v4005_v1 = vpop.eup %4004 }
 0xb82   :  { %v2701_v38 = vmul.f32 %v4005_v1, %v4003_v12 }
 0xb84   :  { %v2702_v13 = vpack.c.bf16 %v2701_v38, %v2701_v38  ;;  %v5249_v54 = vsel %vm3226_vm9, %v5204_v4, %v2701_v38 }
 0xb86   :  { %v2704_v56 = vshrl.u32 %v2702_v13, 16 }
 0xb88   :  { %v2706_v11 = vrot.slane %v2704_v56, 1 }
 0xb8a   :  { %2741 = vmatmul.mubr.bf16.vlgmr.msra.gmra.mrb[44].mxu0 %v2706_v11  ;;  %2782 = vmatmul.mubr.bf16.vlgmr.msra.gmra.mrb[52].mxu1 %v2706_v11 }
 0xb8b   :  { %2838 = vmatpush1.bf16.msra.mxu0 %v4965_v57  ;;  %2879 = vmatpush1.bf16.msra.mxu1 %v4967_v52 }
 0xb8c   :  { %2839 = vmatprep.subr.bf16.mxu0 %v4969_v58  ;;  %2880 = vmatprep.subr.bf16.mxu1 %v4971_v15 }
 0xb8d   :  { %2869 = vmatprep.mubr.bf16.mxu0 %v5402_v5  ;;  %2910 = vmatprep.mubr.bf16.mxu1 %v5402_v5 }
 0xb8f   :  { %2840 = vmatpush1.bf16.msra.mxu0 %v4975_v43  ;;  %2881 = vmatpush1.bf16.msra.mxu1 %v4977_v16 }
 0xb90   :  { %2841 = vmatprep.subr.bf16.mxu0 %v4981_v17  ;;  %2882 = vmatprep.subr.bf16.mxu1 %v4983_v18 }
 0xb93   :  { %2842 = vmatpush1.bf16.msra.mxu0 %v4989_v19  ;;  %2883 = vmatpush1.bf16.msra.mxu1 %v4991_v21 }
 0xb94   :  { %2843 = vmatprep.subr.bf16.mxu0 %v4995_v22  ;;  %2884 = vmatprep.subr.bf16.mxu1 %v4997_v23 }
 0xb97   :  { %2844 = vmatpush1.bf16.msra.mxu0 %v5001_v24  ;;  %2885 = vmatpush1.bf16.msra.mxu1 %v5003_v25 }
 0xb98   :  { %2845 = vmatprep.subr.bf16.mxu0 %v5007_v26  ;;  %2886 = vmatprep.subr.bf16.mxu1 %v5009_v27 }
 0xb9b   :  { %2846 = vmatpush1.bf16.msra.mxu0 %v5013_v28  ;;  %2887 = vmatpush1.bf16.msra.mxu1 %v5015_v29 }
 0xb9c   :  { %2847 = vmatprep.subr.bf16.mxu0 %v5019_v30  ;;  %2888 = vmatprep.subr.bf16.mxu1 %v5021_v31 }
 0xb9f   :  { %2848 = vmatpush1.bf16.msra.mxu0 %v5025_v32  ;;  %2889 = vmatpush1.bf16.msra.mxu1 %v5027_v33 }
 0xba0   :  { %2849 = vmatprep.subr.bf16.mxu0 %v5031_v34  ;;  %2890 = vmatprep.subr.bf16.mxu1 %v5033_v35 }
 0xba3   :  { %2850 = vmatpush1.bf16.msra.mxu0 %v5037_v36  ;;  %2891 = vmatpush1.bf16.msra.mxu1 %v5039_v37 }
 0xba4   :  { %2851 = vmatprep.subr.bf16.mxu0 %v5043_v41  ;;  %2892 = vmatprep.subr.bf16.mxu1 %v5045_v59 }
 0xba7   :  { %2852 = vmatpush1.bf16.msra.mxu0 %v5049_v60  ;;  %2893 = vmatpush1.bf16.msra.mxu1 %v5051_v61 }
 0xba8   :  { %2968 = vmatprep.subr.bf16.mxu0 %v4955_v14  ;;  %3009 = vmatprep.subr.bf16.mxu1 %v4957_v51 }
 0xc5d   :  { %v2742_v55 = vpop.f32.mrb[44].mxu0  ;;  %v2783_v4 = vpop.f32.mrb[52].mxu1 }
 0xc5e   :  { %v2794_v46 = vrot.slane %v2742_v55, 4  ;;  %v2796_v63 = vrot.slane %v2783_v4, 4  ;;  %v2744_v3 = vpop.f32.mrb[45].mxu0  ;;  %v2785_v39 = vpop.f32.mrb[53].mxu1  ;;  %v2826_v55 = vrot.slane %v5245_v48, 7 }
 0xc5f   :  { %v2795_v2 = vrot.slane %v2744_v3, 4  ;;  %v2797_v53 = vrot.slane %v2785_v39, 4  ;;  %v2746_v47 = vpop.f32.mrb[46].mxu0  ;;  %v2787_v49 = vpop.f32.mrb[54].mxu1 }
 0xc60   :  { %v2802_v9 = vadd.f32 %v2794_v46, %v5095_v62  ;;  %v2804_v40 = vadd.f32 %v2796_v63, %v5097_v20  ;;  %v2747_v10 = vpop.f32.mrb[47].mxu0  ;;  %v2788_v6 = vpop.f32.mrb[55].mxu1 }
 0xc61   :  { %v2803_v14 = vadd.f32 %v2795_v2, %v5099_v44  ;;  %v2805_v51 = vadd.f32 %v2797_v53, %v5101_v45 }
 0xc62   :  { %v3541_v7 = vmul.f32 -1.442695, %v2802_v9 }
 0xc63   :  { %v3542_v8 = vmul.f32 -1.442695, %v2803_v14  ;;  %v3543_v50 = vmul.f32 -1.442695, %v2805_v51 }
 0xc64   :  { %4006 = vpow2.f32 %v3541_v7 }
 0xc65   :  { %4008 = vpow2.f32 %v3542_v8 }
 0xc66   :  { %4010 = vpow2.f32 %v3543_v50 }
 0xc67   :  { %4012 = vtanh.f32 %v2804_v40 }
 0xc6e   :  { %v4007_v0 = vpop.eup %4006 }
 0xc6f   :  { %v4009_v12 = vpop.eup %4008  ;;  %v2809_v1 = vadd.f32 1.0, %v4007_v0 }
 0xc70   :  { %v2815_v38 = vadd.f32 1.0, %v4009_v12  ;;  %v4011_v13 = vpop.eup %4010 }
 0xc71   :  { %4014 = vrcp.f32 %v2809_v1  ;;  %v4013_v56 = vpop.eup %4012  ;;  %v2822_v63 = vadd.f32 1.0, %v4011_v13  ;;  %v4115_v1 = vld [vmem:[#allocation10] ss:$16 sps:$4 sm:$0xff]   ;;  %v4117_v13 = vld [vmem:[#allocation10 + $0x24] ss:$16 sps:$4 sm:$0xff]  }
 0xc72   :  { %4016 = vrcp.f32 %v2815_v38  ;;  %v4116_v38 = vld [vmem:[#allocation10 + $0x8] ss:$16 sps:$4 sm:$0xff]  }
 0xc73   :  { %4018 = vrcp.f32 %v2822_v63  ;;  %v4123_v63 = vld [vmem:[#allocation10 + $0x40] ss:$16 sps:$4 sm:$0xff]  }
 0xc7b   :  { %v4015_v11 = vpop.eup %4014 }
 0xc7c   :  { %v4017_v4 = vpop.eup %4016  ;;  %v2829_v46 = vmul.f32 %v4015_v11, %v4013_v56  ;;  %v4118_v56 = vld [vmem:[#allocation10 + $0x2c] ss:$16 sps:$4 sm:$0xff]   ;;  %v4119_v11 = vld [vmem:[#allocation10 + $0x20] ss:$16 sps:$4 sm:$0xff]  }
 0xc7d   :  { %v2828_v3 = vmul.f32 %v4017_v4, %v2826_v55  ;;  %v4019_v2 = vpop.eup %4018  ;;  %v4120_v55 = vld [vmem:[#allocation10 + $0x28] ss:$16 sps:$4 sm:$0xff]   ;;  %v4121_v4 = vld [vmem:[#allocation10 + $0x44] ss:$16 sps:$4 sm:$0xff]  }
 0xc7f   :  { %v5290_v39 = vadd.f32 %v2829_v46, %v2828_v3  ;;  %v4122_v46 = vld [vmem:[#allocation10 + $0x4c] ss:$16 sps:$4 sm:$0xff]   ;;  %v4124_v3 = vld [vmem:[#allocation10 + $0x48] ss:$16 sps:$4 sm:$0xff]  }
 0xc81   :  { %4020 = vtanh.f32 %v5290_v39 }
 0xc8b   :  { %v4021_v53 = vpop.eup %4020 }
 0xc8c   :  { %v2832_v47 = vmul.f32 %v4021_v53, %v4019_v2  ;;  %v4126_v2 = vld [vmem:[#allocation10 + $0x6c] ss:$16 sps:$4 sm:$0xff]   ;;  %v4127_v53 = vld [vmem:[#allocation10 + $0x60] ss:$16 sps:$4 sm:$0xff]  }
 0xc8e   :  { %v2833_v49 = vpack.c.bf16 %v2832_v47, %v2832_v47  ;;  %v5295_v9 = vsel %vm1920_vm4, %v5249_v54, %v2832_v47  ;;  %v4128_v47 = vld [vmem:[#allocation10 + $0x68] ss:$16 sps:$4 sm:$0xff]  }
 0xc90   :  { %v2835_v40 = vrot.slane %v2833_v49, 2  ;;  %v4130_v49 = vld [vmem:[#allocation10 + $0x8c] ss:$16 sps:$4 sm:$0xff]  }
 0xc92   :  { %2870 = vmatmul.mubr.bf16.vlgmr.msra.gmra.mrb[48].mxu0 %v2835_v40  ;;  %2911 = vmatmul.mubr.bf16.vlgmr.msra.gmra.mrb[56].mxu1 %v2835_v40  ;;  %v4132_v40 = vld [vmem:[#allocation10 + $0x88] ss:$16 sps:$4 sm:$0xff]  }
 0xc93   :  { %2969 = vmatpush1.bf16.msra.mxu0 %v4965_v57  ;;  %3010 = vmatpush1.bf16.msra.mxu1 %v4967_v52  ;;  %v4113_v57 = vld [vmem:[#allocation10 + $0x4] ss:$16 sps:$4 sm:$0xff]   ;;  %v4114_v52 = vld [vmem:[#allocation10 + $0xc] ss:$16 sps:$4 sm:$0xff]  }
 0xc94   :  { %2970 = vmatprep.subr.bf16.mxu0 %v4969_v58  ;;  %3011 = vmatprep.subr.bf16.mxu1 %v4971_v15 }
 0xc95   :  { %3000 = vmatprep.mubr.bf16.mxu0 %v5402_v5  ;;  %3041 = vmatprep.mubr.bf16.mxu1 %v5402_v5 }
 0xc97   :  { %2971 = vmatpush1.bf16.msra.mxu0 %v4975_v43  ;;  %3012 = vmatpush1.bf16.msra.mxu1 %v4977_v16 }
 0xc98   :  { %2972 = vmatprep.subr.bf16.mxu0 %v4981_v17  ;;  %3013 = vmatprep.subr.bf16.mxu1 %v4983_v18 }
 0xc9b   :  { %2973 = vmatpush1.bf16.msra.mxu0 %v4989_v19  ;;  %3014 = vmatpush1.bf16.msra.mxu1 %v4991_v21 }
 0xc9c   :  { %2974 = vmatprep.subr.bf16.mxu0 %v4995_v22  ;;  %3015 = vmatprep.subr.bf16.mxu1 %v4997_v23 }
 0xc9f   :  { %2975 = vmatpush1.bf16.msra.mxu0 %v5001_v24  ;;  %3016 = vmatpush1.bf16.msra.mxu1 %v5003_v25 }
 0xca0   :  { %2976 = vmatprep.subr.bf16.mxu0 %v5007_v26  ;;  %3017 = vmatprep.subr.bf16.mxu1 %v5009_v27 }
 0xca3   :  { %2977 = vmatpush1.bf16.msra.mxu0 %v5013_v28  ;;  %3018 = vmatpush1.bf16.msra.mxu1 %v5015_v29 }
 0xca4   :  { %2978 = vmatprep.subr.bf16.mxu0 %v5019_v30  ;;  %3019 = vmatprep.subr.bf16.mxu1 %v5021_v31 }
 0xca7   :  { %2979 = vmatpush1.bf16.msra.mxu0 %v5025_v32  ;;  %3020 = vmatpush1.bf16.msra.mxu1 %v5027_v33 }
 0xca8   :  { %2980 = vmatprep.subr.bf16.mxu0 %v5031_v34  ;;  %3021 = vmatprep.subr.bf16.mxu1 %v5033_v35 }
 0xcab   :  { %2981 = vmatpush1.bf16.msra.mxu0 %v5037_v36  ;;  %3022 = vmatpush1.bf16.msra.mxu1 %v5039_v37 }
 0xcac   :  { %2982 = vmatprep.subr.bf16.mxu0 %v5043_v41  ;;  %3023 = vmatprep.subr.bf16.mxu1 %v5045_v59 }
 0xcaf   :  { %2983 = vmatpush1.bf16.msra.mxu0 %v5049_v60  ;;  %3024 = vmatpush1.bf16.msra.mxu1 %v5051_v61  ;;  %v2955_v60 = vrot.slane %v5290_v39, 7  ;;  %v4125_v39 = vld [vmem:[#allocation10 + $0x64] ss:$16 sps:$4 sm:$0xff]  }
 0xcb0   :  { %3097 = vmatprep.subr.bf16.mxu0 %v4113_v57  ;;  %3138 = vmatprep.subr.bf16.mxu1 %v4114_v52  ;;  %v4133_v57 = vld [vmem:[#allocation10 + $0xa4] ss:$16 sps:$4 sm:$0xff]   ;;  %v4134_v52 = vld [vmem:[#allocation10 + $0xac] ss:$16 sps:$4 sm:$0xff]  }
 0xd65   :  { %v2871_v58 = vpop.f32.mrb[48].mxu0  ;;  %v2912_v15 = vpop.f32.mrb[56].mxu1 }
 0xd66   :  { %v2923_v43 = vrot.slane %v2871_v58, 3  ;;  %v2925_v16 = vrot.slane %v2912_v15, 3  ;;  %v2873_v17 = vpop.f32.mrb[49].mxu0  ;;  %v2914_v18 = vpop.f32.mrb[57].mxu1  ;;  %v4135_v58 = vld [vmem:[#allocation10 + $0xa0] ss:$16 sps:$4 sm:$0xff]  }
 0xd67   :  { %v2924_v19 = vrot.slane %v2873_v17, 3  ;;  %v2926_v21 = vrot.slane %v2914_v18, 3  ;;  %v2875_v22 = vpop.f32.mrb[50].mxu0  ;;  %v2916_v23 = vpop.f32.mrb[58].mxu1  ;;  %v4136_v15 = vld [vmem:[#allocation10 + $0xa8] ss:$16 sps:$4 sm:$0xff]  }
 0xd68   :  { %v2931_v24 = vadd.f32 %v2923_v43, %v5095_v62  ;;  %v2933_v25 = vadd.f32 %v2925_v16, %v5097_v20  ;;  %v2876_v26 = vpop.f32.mrb[51].mxu0  ;;  %v2917_v27 = vpop.f32.mrb[59].mxu1  ;;  %v4137_v43 = vld [vmem:[#allocation10 + $0xc4] ss:$16 sps:$4 sm:$0xff]   ;;  %v4138_v16 = vld [vmem:[#allocation10 + $0xcc] ss:$16 sps:$4 sm:$0xff]  }
 0xd69   :  { %v2932_v28 = vadd.f32 %v2924_v19, %v5099_v44  ;;  %v2934_v29 = vadd.f32 %v2926_v21, %v5101_v45  ;;  %v4139_v17 = vld [vmem:[#allocation10 + $0xc0] ss:$16 sps:$4 sm:$0xff]   ;;  %v4140_v18 = vld [vmem:[#allocation10 + $0xc8] ss:$16 sps:$4 sm:$0xff]   ;;  %v4141_v19 = vld [vmem:[#allocation10 + $0xe4] ss:$16 sps:$4 sm:$0xff]  }
 0xd6a   :  { %v3544_v30 = vmul.f32 -1.442695, %v2931_v24  ;;  %v4142_v21 = vld [vmem:[#allocation10 + $0xec] ss:$16 sps:$4 sm:$0xff]   ;;  %v4143_v22 = vld [vmem:[#allocation10 + $0xe0] ss:$16 sps:$4 sm:$0xff]  }
 0xd6b   :  { %v3545_v31 = vmul.f32 -1.442695, %v2932_v28  ;;  %v3546_v32 = vmul.f32 -1.442695, %v2934_v29  ;;  %v4144_v23 = vld [vmem:[#allocation10 + $0xe8] ss:$16 sps:$4 sm:$0xff]  }
 0xd6c   :  { %4022 = vpow2.f32 %v3544_v30 }
 0xd6d   :  { %4024 = vpow2.f32 %v3545_v31 }
 0xd6e   :  { %4026 = vpow2.f32 %v3546_v32 }
 0xd6f   :  { %4028 = vtanh.f32 %v2933_v25 }
 0xd76   :  { %v4023_v33 = vpop.eup %4022 }
 0xd77   :  { %v4025_v34 = vpop.eup %4024  ;;  %v2938_v35 = vadd.f32 1.0, %v4023_v33 }
 0xd78   :  { %v2944_v36 = vadd.f32 1.0, %v4025_v34  ;;  %v4027_v37 = vpop.eup %4026 }
 0xd79   :  { %4030 = vrcp.f32 %v2938_v35  ;;  %v4029_v41 = vpop.eup %4028  ;;  %v2951_v54 = vadd.f32 1.0, %v4027_v37 }
 0xd7a   :  { %4032 = vrcp.f32 %v2944_v36 }
 0xd7b   :  { %4034 = vrcp.f32 %v2951_v54 }
 0xd83   :  { %v4031_v59 = vpop.eup %4030 }
 0xd84   :  { %v4033_v61 = vpop.eup %4032  ;;  %v2958_v48 = vmul.f32 %v4031_v59, %v4029_v41 }
 0xd85   :  { %v2957_v10 = vmul.f32 %v4033_v61, %v2955_v60  ;;  %v4035_v14 = vpop.eup %4034 }
 0xd87   :  { %v5334_v6 = vadd.f32 %v2958_v48, %v2957_v10 }
 0xd89   :  { %4036 = vtanh.f32 %v5334_v6 }
 0xd93   :  { %v4037_v51 = vpop.eup %4036 }
 0xd94   :  { %v2961_v7 = vmul.f32 %v4037_v51, %v4035_v14 }
 0xd96   :  { %v2962_v8 = vpack.c.bf16 %v2961_v7, %v2961_v7  ;;  %v5338_v50 = vsel %vm3229_vm10, %v5295_v9, %v2961_v7  ;;  %v4131_v9 = vld [vmem:[#allocation10 + $0x80] ss:$16 sps:$4 sm:$0xff]  }
 0xd98   :  { %v2964_v0 = vshrl.u32 %v2962_v8, 16 }
 0xd9a   :  { %v2966_v12 = vrot.slane %v2964_v0, 2 }
 0xd9c   :  { %3001 = vmatmul.mubr.bf16.vlgmr.msra.gmra.mrb[52].mxu0 %v2966_v12  ;;  %3042 = vmatmul.mubr.bf16.vlgmr.msra.gmra.mrb[60].mxu1 %v2966_v12  ;;  %v3086_v12 = vrot.slane %v5334_v6, 7  ;;  %v3838_v6 = vld [vmem:[#allocation11] sm:$0xff]  }
 0xd9d   :  { %3098 = vmatpush1.bf16.msra.mxu0 %v4115_v1  ;;  %3139 = vmatpush1.bf16.msra.mxu1 %v4116_v38 }
 0xd9e   :  { %3099 = vmatprep.subr.bf16.mxu0 %v4117_v13  ;;  %3140 = vmatprep.subr.bf16.mxu1 %v4118_v56 }
 0xd9f   :  { %3129 = vmatprep.mubr.bf16.mxu0 %v5402_v5  ;;  %3170 = vmatprep.mubr.bf16.mxu1 %v5402_v5  ;;  %v4129_v5 = vld [vmem:[#allocation10 + $0x84] ss:$16 sps:$4 sm:$0xff]  }
 0xda1   :  { %3100 = vmatpush1.bf16.msra.mxu0 %v4119_v11  ;;  %3141 = vmatpush1.bf16.msra.mxu1 %v4120_v55 }
 0xda2   :  { %3101 = vmatprep.subr.bf16.mxu0 %v4121_v4  ;;  %3142 = vmatprep.subr.bf16.mxu1 %v4122_v46 }
 0xda5   :  { %3102 = vmatpush1.bf16.msra.mxu0 %v4123_v63  ;;  %3143 = vmatpush1.bf16.msra.mxu1 %v4124_v3 }
 0xda6   :  { %3103 = vmatprep.subr.bf16.mxu0 %v4125_v39  ;;  %3144 = vmatprep.subr.bf16.mxu1 %v4126_v2  ;;  %v3839_v2 = vld [vmem:[#allocation11 + $0x8] sm:$0xff]  }
 0xda9   :  { %3104 = vmatpush1.bf16.msra.mxu0 %v4127_v53  ;;  %3145 = vmatpush1.bf16.msra.mxu1 %v4128_v47  ;;  %v3840_v53 = vld [vmem:[#allocation11 + $0x10] sm:$0xff]   ;;  %v3841_v47 = vld [vmem:[#allocation11 + $0x18] sm:$0xff]  }
 0xdaa   :  { %3105 = vmatprep.subr.bf16.mxu0 %v4129_v5  ;;  %3146 = vmatprep.subr.bf16.mxu1 %v4130_v49  ;;  %v3843_v5 = vld [vmem:[#allocation11 + $0x28] sm:$0xff]   ;;  %v3844_v49 = vld [vmem:[#allocation11 + $0x30] sm:$0xff]  }
 0xdad   :  { %3106 = vmatpush1.bf16.msra.mxu0 %v4131_v9  ;;  %3147 = vmatpush1.bf16.msra.mxu1 %v4132_v40  ;;  %v3845_v9 = vld [vmem:[#allocation11 + $0x38] sm:$0xff]  }
 0xdae   :  { %3107 = vmatprep.subr.bf16.mxu0 %v4133_v57  ;;  %3148 = vmatprep.subr.bf16.mxu1 %v4134_v52 }
 0xdb1   :  { %3108 = vmatpush1.bf16.msra.mxu0 %v4135_v58  ;;  %3149 = vmatpush1.bf16.msra.mxu1 %v4136_v15 }
 0xdb2   :  { %3109 = vmatprep.subr.bf16.mxu0 %v4137_v43  ;;  %3150 = vmatprep.subr.bf16.mxu1 %v4138_v16 }
 0xdb5   :  { %3110 = vmatpush1.bf16.msra.mxu0 %v4139_v17  ;;  %3151 = vmatpush1.bf16.msra.mxu1 %v4140_v18 }
 0xdb6   :  { %3111 = vmatprep.subr.bf16.mxu0 %v4141_v19  ;;  %3152 = vmatprep.subr.bf16.mxu1 %v4142_v21 }
 0xdb9   :  { %3112 = vmatpush1.bf16.msra.mxu0 %v4143_v22  ;;  %3153 = vmatpush1.bf16.msra.mxu1 %v4144_v23 }
 0xdba   :  { %3571 = vmatprep.subr.bf16.mxu0 %v5403_v42 }
 0xe6f   :  { %v3002_v24 = vpop.f32.mrb[52].mxu0  ;;  %v3043_v25 = vpop.f32.mrb[60].mxu1 }
 0xe70   :  { %v3054_v26 = vrot.slane %v3002_v24, 2  ;;  %v3056_v27 = vrot.slane %v3043_v25, 2  ;;  %v3004_v28 = vpop.f32.mrb[53].mxu0  ;;  %v3045_v29 = vpop.f32.mrb[61].mxu1 }
 0xe71   :  { %v3055_v30 = vrot.slane %v3004_v28, 2  ;;  %v3057_v31 = vrot.slane %v3045_v29, 2  ;;  %v3006_v32 = vpop.f32.mrb[54].mxu0  ;;  %v3047_v33 = vpop.f32.mrb[62].mxu1 }
 0xe72   :  { %v3062_v34 = vadd.f32 %v3054_v26, %v5095_v62  ;;  %v3064_v35 = vadd.f32 %v3056_v27, %v5097_v20  ;;  %v3007_v36 = vpop.f32.mrb[55].mxu0  ;;  %v3048_v37 = vpop.f32.mrb[63].mxu1 }
 0xe73   :  { %v3063_v41 = vadd.f32 %v3055_v30, %v5099_v44  ;;  %v3065_v59 = vadd.f32 %v3057_v31, %v5101_v45 }
 0xe74   :  { %v3547_v60 = vmul.f32 -1.442695, %v3062_v34 }
 0xe75   :  { %v3548_v61 = vmul.f32 -1.442695, %v3063_v41  ;;  %v3549_v48 = vmul.f32 -1.442695, %v3065_v59 }
 0xe76   :  { %4038 = vpow2.f32 %v3547_v60 }
 0xe77   :  { %4040 = vpow2.f32 %v3548_v61 }
 0xe78   :  { %4042 = vpow2.f32 %v3549_v48 }
 0xe79   :  { %4044 = vtanh.f32 %v3064_v35 }
 0xe80   :  { %v4039_v54 = vpop.eup %4038 }
 0xe81   :  { %v4041_v10 = vpop.eup %4040  ;;  %v3069_v14 = vadd.f32 1.0, %v4039_v54  ;;  %v3553_v54 = vld [vmem:[%s5392_s9] ss:$0 sm:$0xff]  ;;  %s4277_s9 = scalar_lea.vmem %s3366_s13, 128 }
 0xe82   :  { %v3075_v51 = vadd.f32 1.0, %v4041_v10  ;;  %v4043_v7 = vpop.eup %4042  ;;  %p4278_p6 = scmp.ne.s32.totalorder %s3366_s13, %s4277_s9  ;;  %p4283_p8 = scmp.lt.s32.totalorder %s4277_s9, %s4277_s9 }
 0xe83   :  { %4046 = vrcp.f32 %v3069_v14  ;;  %v4045_v8 = vpop.eup %4044  ;;  %v3082_v13 = vadd.f32 1.0, %v4043_v7 }
 0xe84   :  { %4048 = vrcp.f32 %v3075_v51  ;;  %p4284_p9 = por %p4283_p8, %p4282_p7 }
 0xe85   :  { %4050 = vrcp.f32 %v3082_v13 }
 0xe86   :  { %p4285_p10 = pnand %p4284_p9, %p4278_p6 }
 0xe8d   :  { %v4047_v0 = vpop.eup %4046 }
 0xe8e   :  { %v4049_v1 = vpop.eup %4048  ;;  %v3089_v38 = vmul.f32 %v4047_v0, %v4045_v8 }
 0xe8f   :  { %v3088_v56 = vmul.f32 %v4049_v1, %v3086_v12  ;;  %v4051_v55 = vpop.eup %4050 }
 0xe91   :  { %v5348_v11 = vadd.f32 %v3089_v38, %v3088_v56 }
 0xe93   :  { %4052 = vtanh.f32 %v5348_v11 }
 0xe9d   :  { %v4053_v4 = vpop.eup %4052 }
 0xe9e   :  { %v3092_v46 = vmul.f32 %v4053_v4, %v4051_v55 }
 0xea0   :  { %v3093_v63 = vpack.c.bf16 %v3092_v46, %v3092_v46  ;;  %v5352_v3 = vsel %vm3231_vm11, %v5338_v50, %v3092_v46  ;;  %v3842_v50 = vld [vmem:[#allocation11 + $0x20] sm:$0xff]  }
 0xea2   :  { %v3095_v39 = vrot.slane %v3093_v63, 3 }
 0xea4   :  { %3130 = vmatmul.mubr.bf16.vlgmr.msra.gmra.mrb[56].mxu0 %v3095_v39  ;;  %3171 = vmatmul.mubr.bf16.vlgmr.msra.gmra.mrb[64].mxu1 %v3095_v39 }
 0xea5   :  { %3572 = vmatpush3.bf16.msra.mxu0 %v3838_v6  ;;  %3587 = vmatprep.mubr.msk.bf16.mxu0 %vm4326_vm12, %v5403_v42 }
 0xea6   :  { %3573 = vmatprep.subr.bf16.mxu0 %v5403_v42 }
 0xea9   :  { %3574 = vmatpush3.bf16.msra.mxu0 %v3839_v2 }
 0xeaa   :  { %3575 = vmatprep.subr.bf16.mxu0 %v5403_v42 }
 0xead   :  { %3576 = vmatpush3.bf16.msra.mxu0 %v3840_v53 }
 0xeae   :  { %3577 = vmatprep.subr.bf16.mxu0 %v5403_v42 }
 0xeb1   :  { %3578 = vmatpush3.bf16.msra.mxu0 %v3841_v47 }
 0xeb2   :  { %3579 = vmatprep.subr.bf16.mxu0 %v5403_v42 }
 0xeb5   :  { %3580 = vmatpush3.bf16.msra.mxu0 %v3842_v50 }
 0xeb6   :  { %3581 = vmatprep.subr.bf16.mxu0 %v5403_v42 }
 0xeb9   :  { %3582 = vmatpush3.bf16.msra.mxu0 %v3843_v5 }
 0xeba   :  { %3583 = vmatprep.subr.bf16.mxu0 %v5403_v42 }
 0xebd   :  { %3584 = vmatpush3.bf16.msra.mxu0 %v3844_v49 }
 0xebe   :  { %3585 = vmatprep.subr.bf16.mxu0 %v5403_v42 }
 0xec1   :  { %3586 = vmatpush3.bf16.msra.mxu0 %v3845_v9 }
 0xf77   :  { %v3131_v40 = vpop.f32.mrb[56].mxu0  ;;  %v3172_v57 = vpop.f32.mrb[64].mxu1 }
 0xf78   :  { %v3183_v52 = vrot.slane %v3131_v40, 1  ;;  %v3185_v58 = vrot.slane %v3172_v57, 1  ;;  %v3133_v15 = vpop.f32.mrb[57].mxu0  ;;  %v3174_v43 = vpop.f32.mrb[65].mxu1 }
 0xf79   :  { %v3184_v16 = vrot.slane %v3133_v15, 1  ;;  %v3186_v17 = vrot.slane %v3174_v43, 1  ;;  %v3135_v18 = vpop.f32.mrb[58].mxu0  ;;  %v3176_v19 = vpop.f32.mrb[66].mxu1 }
 0xf7a   :  { %v3191_v21 = vadd.f32 %v3183_v52, %v5095_v62  ;;  %v3193_v22 = vadd.f32 %v3185_v58, %v5097_v20  ;;  %v3136_v23 = vpop.f32.mrb[59].mxu0  ;;  %v3177_v24 = vpop.f32.mrb[67].mxu1 }
 0xf7b   :  { %v3192_v25 = vadd.f32 %v3184_v16, %v5099_v44  ;;  %v3194_v42 = vadd.f32 %v3186_v17, %v5101_v45  ;;  %v3215_v44 = vrot.slane %v5348_v11, 7 }
 0xf7c   :  { %v3550_v26 = vmul.f32 -1.442695, %v3191_v21 }
 0xf7d   :  { %v3551_v27 = vmul.f32 -1.442695, %v3192_v25  ;;  %v3552_v28 = vmul.f32 -1.442695, %v3194_v42 }
 0xf7e   :  { %4054 = vpow2.f32 %v3550_v26 }
 0xf7f   :  { %4056 = vpow2.f32 %v3551_v27 }
 0xf80   :  { %4058 = vpow2.f32 %v3552_v28 }
 0xf81   :  { %4060 = vtanh.f32 %v3193_v22 }
 0xf88   :  { %v4055_v29 = vpop.eup %4054 }
 0xf89   :  { %v4057_v30 = vpop.eup %4056  ;;  %v3198_v31 = vadd.f32 1.0, %v4055_v29 }
 0xf8a   :  { %v3204_v32 = vadd.f32 1.0, %v4057_v30  ;;  %v4059_v62 = vpop.eup %4058 }
 0xf8b   :  { %4062 = vrcp.f32 %v3198_v31  ;;  %v4061_v20 = vpop.eup %4060  ;;  %v3211_v35 = vadd.f32 1.0, %v4059_v62 }
 0xf8c   :  { %4064 = vrcp.f32 %v3204_v32 }
 0xf8d   :  { %4066 = vrcp.f32 %v3211_v35 }
 0xf95   :  { %v4063_v33 = vpop.eup %4062 }
 0xf96   :  { %v4065_v34 = vpop.eup %4064  ;;  %v3218_v45 = vmul.f32 %v4063_v33, %v4061_v20 }
 0xf97   :  { %v3217_v36 = vmul.f32 %v4065_v34, %v3215_v44  ;;  %v4067_v41 = vpop.eup %4066 }
 0xf99   :  { %v3219_v37 = vadd.f32 %v3218_v45, %v3217_v36 }
 0xf9b   :  { %4068 = vtanh.f32 %v3219_v37 }
 0xfa5   :  { %v4069_v59 = vpop.eup %4068 }
 0xfa6   :  { %v3221_v60 = vmul.f32 %v4069_v59, %v4067_v41 }
 0xfa8   :  { %v3234_v61 = vsel %vm3233_vm13, %v5352_v3, %v3221_v60 }
 0xfa9   :  { %v3235_v48 = vpack.c.bf16 %v3234_v61, %v3234_v61 }
 0xfab   :  { %3588 = vmatmul.mubr.bf16.vlgmr.msra.gmra.mrb[60].mxu0 %v3235_v48 }
0x107e   :  { %v3341_v10 = vpop.f32.mrb[60].mxu0 }
0x107f   :  { %v3342_v14 = vadd.f32 %v3553_v54, %v3341_v10  ;;  %v3589_v51 = vpop.f32.mrb[61].mxu0 }
0x1080   :  { %v3344_v7 = vpop.f32.mrb[62].mxu0 }
0x1081   :  { %3347 = vmax.xlane.f32.xlu0 %v3342_v14  ;;  %v3590_v8 = vpop.f32.mrb[63].mxu0 }
0x110e   :  { %v3348_v0 = vpop.xlane.xlu0 %3347 }
0x110f   :  { %v3349_v12 = vsub.f32 %v3342_v14, %v3348_v0 }
0x1111   :  { %v3350_v1 = vmul.f32 1.442695, %v3349_v12 }
0x1113   :  { %4070 = vpow2.f32 %v3350_v1 }
0x111d   :  { %v4071_v38 = vpop.eup %4070 }
0x111e   :  { %3352 = vadd.xlane.f32.xlu1 %v4071_v38 }
0x11ab   :  { %v3353_v13 = vpop.xlane.xlu1 %3352 }
0x11ac   :  { %4072 = vlog2.f32 %v3353_v13 }
0x11b6   :  { %v4073_v56 = vpop.eup %4072 }
0x11b7   :  { %v3355_v11 = vmul.f32 0.6931472, %v4073_v56 }
0x11b9   :  { %v3356_v55 = vadd.f32 %v3355_v11, %v3348_v0 }
0x11bb   :  { %v3357_v4 = vsub.f32 %v3342_v14, %v3356_v55 }
0x11bd   :  { %3358 = vst [vmem:[#allocation13] sm:$0xff] %v3357_v4 }
0x11be   :  { %4288 = shalt.err (!%p4285_p10)
}
0x11bf   :  { %s4289_s15 = scalar_lea.hbm %s5393_s10, 128 }
0x11c0   :  { %p4290_p11 = scmp.ne.s32.totalorder %s5393_s10, %s4289_s15  ;;  %p4293_p12 = scmp.lt.u32.totalorder %s4289_s15, %s5393_s10 }
0x11c2   :  { %p4295_p13 = pnand %p4293_p12, %p4290_p11 }
0x11c4   :  { %4298 = shalt.err (!%p4295_p13)
}
0x11c5   :  { %3368 = dma.vmem_to_hbm [thread:$0]  %s3366_s13, 128, %s5393_s10, [#allocation4]  }
0x11c6   :  { %4307 = dma.done.wait [#allocation4], 128  }
0x11c7   :  { %4308 = vsyncadd [#allocation4], 4294967168 }
0x11c8   :  { %3372 = vsyncpa [#allocation3], 1 }
0x11c9   :  { %3373 = vsyncpa [#allocation6], 1 }
0x11ca   :  { %3374 = vsyncpa [#allocation9], 1 }
0x11cb   :  { %3375 = vsyncpa [#allocation12], 1 }
0x11cc   :  { %3376 = vsyncpa [#allocation4], 1 }

</bundles_post_ra>
